<compile_context>
chip_gen: v5e
topology: v5e:2x2
jax: 0.10.0
libtpu: 0.0.40
codegen_flags: <defaults>
</compile_context>

<pallas_src>
import functools

import jax
import jax.numpy as jnp
import numpy as np
from jax.experimental import pallas as pl
from jax.experimental.pallas import tpu as pltpu

CIN, COUT, KH, KW = 480, 24, 3, 3
STRIDE, PAD = 2, 1
LIN1_OUT = 345
LIN2_OUT = 2
C_PT = 8                       # conv output channels handled per grid step (8-aligned)
assert COUT % C_PT == 0


# ---------------- fused Pallas kernel ----------------

def _fused_kernel(x_ref, wtT_ref, g_ref, w1_ref, b1_ref, w2_ref, b2_ref,
                  o_ref, flat_ref, acc_ref, *, wsp):
    """Single grid axis k tiles the (permuted, compacted) W1 contraction dim.

    x_ref    : (CIN, NB*H*W)         bf16  input, lanes ordered (n, ih, iw)
    wtT_ref  : (KH*KW*COUT, CIN)     bf16  conv weight, row = tap*COUT + c
    g_ref    : (4*NB*H*W, NV)        bf16  0/1 selection (drops invalid parity slots)
    w1_ref   : (C_PT*NV, LIN1_OUT)   bf16  K-tile of the permuted/compacted W1
    b1_ref   : (1, LIN1_OUT)         f32   linear1 bias (+ folded conv bias)
    w2_ref   : (LIN1_OUT, LIN2_OUT)  f32
    b2_ref   : (1, LIN2_OUT)         f32
    o_ref    : (1, LIN2_OUT)         f32
    flat_ref : (KT, C_PT*NV)         f32   scratch: one flat-activation row per K-tile
    acc_ref  : (1, LIN1_OUT)         f32   scratch: linear1 accumulator
    """
    k = pl.program_id(0)
    nv = g_ref.shape[1]

    @pl.when(k == 0)
    def _init():
        acc_ref[...] = jnp.zeros_like(acc_ref)
        # transposed-conv channel contraction: ONE bf16 MXU dot
        y = jnp.dot(wtT_ref[...], x_ref[...],
                    preferred_element_type=jnp.float32)          # (9*COUT, nb*h*w)

        def tap(t):                     # (COUT, nhw) contribution of tap (kh,kw)=(t//3,t%3)
            return y[t * COUT:(t + 1) * COUT, :]

        def sh(a, s):                   # a[:, i] <- a[:, (i+s) % nhw]
            # wrapped / row-crossing lanes only land on parity slots that g_ref
            # drops, so they never contaminate the result.
            # TODO(synk): pltpu.roll would put this on the XLU, but the whole
            #   _init already hides under the tile-0 W1 DMA.
            return jnp.concatenate([a[:, s:], a[:, :s]], axis=1)

        # stride-2 parity (pixel-shuffle) decomposition of the transposed conv
        ee = tap(4)                                              # (even oh, even ow)
        eo = sh(tap(3), 1) + tap(5)                              # (even oh, odd  ow)
        oe = sh(tap(1), wsp) + tap(7)                            # (odd  oh, even ow)
        oo = (sh(tap(0), wsp + 1) + sh(tap(2), wsp)
              + sh(tap(6), 1) + tap(8))                          # (odd  oh, odd  ow)
        slabs = jnp.concatenate([ee, eo, oe, oo], axis=1).astype(jnp.bfloat16)
        # drop the out-of-range parity slots via a 0/1 selection matmul
        flatc = jnp.dot(slabs, g_ref[...],
                        preferred_element_type=jnp.float32)      # (COUT, nv)
        # lay the flat activations out one row per K-tile: row t = channels [8t, 8t+8)
        for c in range(COUT):
            t, j = divmod(c, C_PT)
            flat_ref[t:t + 1, j * nv:(j + 1) * nv] = flatc[c:c + 1, :]

    # linear1: ONE (1, C_PT*nv) x (C_PT*nv, 345) GEMV per grid step, f32 accum
    lhs = flat_ref[pl.ds(k, 1), :].astype(jnp.bfloat16)
    acc_ref[...] += jnp.dot(lhs, w1_ref[...], preferred_element_type=jnp.float32)

    @pl.when(k == pl.num_programs(0) - 1)
    def _finalize():
        h1 = jnp.maximum(acc_ref[...] + b1_ref[...], 0.0)        # ReLU(linear1)
        o_ref[...] = (jnp.dot(h1, w2_ref[...],
                              preferred_element_type=jnp.float32)
                      + b2_ref[...])                             # linear2


# ---------------- forward ----------------

@jax.jit
def forward(x, prep):
    nb, cin, h, w = x.shape
    assert cin == CIN
    nhw = nb * h * w
    nv = prep["g"].shape[1]
    kt = COUT // C_PT
    tile = C_PT * nv
    # prep is specialized to one (nb, h, w); guard against silent mismatch
    assert prep["g"].shape[0] == 4 * nhw, "prep built for a different input shape"
    assert prep["w1p"].shape[0] == COUT * nv

    # layout plumbing only: lanes ordered (n, ih, iw); bf16 halves the x DMA
    x2d = jnp.transpose(x, (1, 0, 2, 3)).reshape(CIN, nhw).astype(jnp.bfloat16)

    out = pl.pallas_call(
        functools.partial(_fused_kernel, wsp=w),
        out_shape=jax.ShapeDtypeStruct((1, LIN2_OUT), jnp.float32),
        grid_spec=pltpu.PrefetchScalarGridSpec(
            num_scalar_prefetch=0,
            grid=(kt,),
            in_specs=[
                pl.BlockSpec((CIN, nhw), lambda k: (0, 0)),             # x2d
                pl.BlockSpec((KH * KW * COUT, CIN), lambda k: (0, 0)),  # wtT
                pl.BlockSpec((4 * nhw, nv), lambda k: (0, 0)),          # G
                pl.BlockSpec((tile, LIN1_OUT), lambda k: (k, 0)),       # W1 K-tile
                pl.BlockSpec((1, LIN1_OUT), lambda k: (0, 0)),          # b1e
                pl.BlockSpec((LIN1_OUT, LIN2_OUT), lambda k: (0, 0)),   # w2
                pl.BlockSpec((1, LIN2_OUT), lambda k: (0, 0)),          # b2
            ],
            out_specs=pl.BlockSpec((1, LIN2_OUT), lambda k: (0, 0)),
            scratch_shapes=[pltpu.VMEM((kt, tile), jnp.float32),
                            pltpu.VMEM((1, LIN1_OUT), jnp.float32)],
        ),
        compiler_params=pltpu.CompilerParams(
            dimension_semantics=("arbitrary",),
            vmem_limit_bytes=12 * 1024 * 1024),
    )(x2d, prep["wtT"], prep["g"], prep["w1p"], prep["b1e"], prep["w2"], prep["b2"])
    return out.reshape(LIN2_OUT)


# ---------------- parameter construction / one-time repack ----------------

def init_params(key, nb, h, w):
    hout = (h - 1) * STRIDE - 2 * PAD + KH
    wout = (w - 1) * STRIDE - 2 * PAD + KW
    feat = nb * COUT * hout * wout        # size of torch.flatten(conv_t(x))
    ks = jax.random.split(key, 6)

    def u(k, shape, fan_in):
        b = 1.0 / (fan_in ** 0.5)
        return jax.random.uniform(k, shape, jnp.float32, -b, b)

    return {
        "wt": u(ks[0], (CIN, COUT, KH, KW), COUT * KH * KW),  # ConvTranspose2d weight
        "bt": u(ks[1], (COUT,), COUT * KH * KW),
        "w1": u(ks[2], (feat, LIN1_OUT), feat),               # linear1 (already transposed)
        "b1": u(ks[3], (LIN1_OUT,), feat),
        "w2": u(ks[4], (LIN1_OUT, LIN2_OUT), LIN1_OUT),       # linear2 (already transposed)
        "b2": u(ks[5], (LIN2_OUT,), LIN1_OUT),
    }


def prepare_params(params, nb, h, w):
    """One-time repack of torch-layout params into the kernel layout.

    The permutation / selection / bias fold is specialized to this exact
    (nb, h, w); forward() asserts the shapes still match.
    """
    assert STRIDE == 2 and PAD == 1 and KH == 3 and KW == 3, \
        "parity / lane-shift construction assumes k=3, s=2, p=1 (odd Hout/Wout)"
    hout = (h - 1) * STRIDE - 2 * PAD + KH       # = 2h - 1
    wout = (w - 1) * STRIDE - 2 * PAD + KW       # = 2w - 1
    nhw = nb * h * w

    # conv weight (CIN, COUT, KH, KW) -> (KH*KW*COUT, CIN), row = tap*COUT + c
    wtT = jnp.transpose(params["wt"], (2, 3, 1, 0)).reshape(KH * KW * COUT, CIN)

    # Enumerate parity slots in the kernel's slab order (parity, n, ih, iw).
    p, n, ih, iw = np.meshgrid(np.arange(4), np.arange(nb), np.arange(h),
                               np.arange(w), indexing="ij")
    dh, dw = p // 2, p % 2
    oh, ow = 2 * ih + dh, 2 * iw + dw
    valid = ((oh < hout) & (ow < wout)).reshape(-1)
    n, oh, ow = n.reshape(-1), oh.reshape(-1), ow.reshape(-1)
    sel = np.flatnonzero(valid)                  # valid slab slots, slab order
    nv = sel.size
    assert nv == nb * hout * wout

    # 0/1 selection matrix used in-kernel to compact the slabs (drops ~16% slots,
    # including every lane a wrap-around shift could have contaminated).
    g = np.zeros((4 * nhw, nv), np.float32)
    g[sel, np.arange(nv)] = 1.0

    # Permute W1 rows: internal index (channel-major, then compact slot v) ->
    # torch flatten index (n, c, oh, ow) of the corresponding conv output.
    c_idx = np.repeat(np.arange(COUT), nv)
    n_v, oh_v, ow_v = (np.tile(a[sel], COUT) for a in (n, oh, ow))
    tidx = ((n_v * COUT + c_idx) * hout + oh_v) * wout + ow_v
    w1p = params["w1"][jnp.asarray(tidx)].astype(jnp.bfloat16)   # (COUT*nv, 345)

    # fold the conv bias (constant offset of every flattened feature) into b1
    bias_flat = jnp.broadcast_to(params["bt"][None, :, None, None],
                                 (nb, COUT, hout, wout)).reshape(-1)
    b1e = (params["b1"] + bias_flat @ params["w1"]).reshape(1, LIN1_OUT)

    return {"wtT": wtT.astype(jnp.bfloat16),
            "g": jnp.asarray(g, jnp.bfloat16),
            "w1p": w1p,
            "b1e": b1e.astype(jnp.float32),
            "w2": params["w2"].astype(jnp.float32),
            "b2": params["b2"].reshape(1, LIN2_OUT).astype(jnp.float32)}


# ---------------- pure-JAX reference (fp32) ----------------

@jax.jit
def _reference(x, params):
    nb, cin, h, w = x.shape
    hout = (h - 1) * STRIDE - 2 * PAD + KH
    wout = (w - 1) * STRIDE - 2 * PAD + KW
    canvas = jnp.zeros((nb, COUT, (h - 1) * STRIDE + KH, (w - 1) * STRIDE + KW),
                       jnp.float32)
    for kh in range(KH):
        for kw in range(KW):
            tap = jnp.einsum("nchw,co->nohw", x, params["wt"][:, :, kh, kw])
            canvas = canvas.at[:, :,
                               kh: kh + (h - 1) * STRIDE + 1: STRIDE,
                               kw: kw + (w - 1) * STRIDE + 1: STRIDE].add(tap)
    conv = (canvas[:, :, PAD:PAD + hout, PAD:PAD + wout]
            + params["bt"][None, :, None, None])
    flat = conv.reshape(-1)
    h1 = jnp.maximum(flat @ params["w1"] + params["b1"], 0.0)
    return h1 @ params["w2"] + params["b2"]


if __name__ == "__main__":
    key = jax.random.PRNGKey(0)
    kx, kp = jax.random.split(key)
    N, H, W = 2, 6, 6                           # small batch; conv fixes Cin=480
    x1 = jax.random.normal(kx, (N, CIN, H, W), jnp.float32)
    params = init_params(kp, N, H, W)
    prep = prepare_params(params, N, H, W)

    out = forward(x1, prep)
    out = jax.block_until_ready(out)
    assert out.shape == (LIN2_OUT,)

    ref = _reference(x1, params)                # fp32 reference (bf16 W1/x in kernel)
    assert jnp.allclose(out, ref, rtol=2e-2, atol=2e-2), (out, ref)
    print("KERNEL_OK")
</pallas_src>

<mosaic_0001>
module attributes {stable_mosaic.version = 11 : i64} {
  func.func @_fused_kernel(%arg0: i32, %arg1: memref<480x72xbf16, #tpu.memory_space<vmem>>, %arg2: memref<216x480xbf16, #tpu.memory_space<vmem>>, %arg3: memref<288x242xbf16, #tpu.memory_space<vmem>>, %arg4: memref<1936x345xbf16, #tpu.memory_space<vmem>>, %arg5: memref<1x345xf32, #tpu.memory_space<vmem>>, %arg6: memref<345x2xf32, #tpu.memory_space<vmem>>, %arg7: memref<1x2xf32, #tpu.memory_space<vmem>>, %arg8: memref<1x2xf32, #tpu.memory_space<vmem>>, %arg9: memref<3x1936xf32, #tpu.memory_space<vmem>>, %arg10: memref<1x345xf32, #tpu.memory_space<vmem>>) attributes {dimension_semantics = [#tpu.dimension_semantics<arbitrary>], iteration_bounds = array<i64: 3>, scalar_prefetch = 0 : i64, scratch_operands = 2 : i64, tpu.core_type = #tpu.core_type<tc>, window_params = [{pipeline_mode = #tpu.pipeline_mode<synchronous>, transform_indices = @transform_0, window_bounds = array<i64: 480, 72>}, {pipeline_mode = #tpu.pipeline_mode<synchronous>, transform_indices = @transform_1, window_bounds = array<i64: 216, 480>}, {pipeline_mode = #tpu.pipeline_mode<synchronous>, transform_indices = @transform_2, window_bounds = array<i64: 288, 242>}, {transform_indices = @transform_3, window_bounds = array<i64: 1936, 345>}, {pipeline_mode = #tpu.pipeline_mode<synchronous>, transform_indices = @transform_4, window_bounds = array<i64: 1, 345>}, {pipeline_mode = #tpu.pipeline_mode<synchronous>, transform_indices = @transform_5, window_bounds = array<i64: 345, 2>}, {pipeline_mode = #tpu.pipeline_mode<synchronous>, transform_indices = @transform_6, window_bounds = array<i64: 1, 2>}, {pipeline_mode = #tpu.pipeline_mode<synchronous>, transform_indices = @transform_7, window_bounds = array<i64: 1, 2>}]} {
    %c0_i32 = arith.constant 0 : i32
    %0 = arith.cmpi eq, %arg0, %c0_i32 : i32
    %1 = arith.extui %0 : i1 to i32
    %c0_i32_0 = arith.constant 0 : i32
    %2 = arith.cmpi ne, %1, %c0_i32_0 : i32
    scf.if %2 {
      %cst_8 = arith.constant 0.000000e+00 : f32
      %14 = vector.broadcast %cst_8 : f32 to vector<1x345xf32>
      %c0_9 = arith.constant 0 : index
      %c0_10 = arith.constant 0 : index
      %15 = vector.load %arg10[%c0_9, %c0_10] : memref<1x345xf32, #tpu.memory_space<vmem>>, vector<1x345xf32>
      tpu.vector_store %arg10[%c0_9, %c0_10], %14 {strides = array<i32>} : memref<1x345xf32, #tpu.memory_space<vmem>>, vector<1x345xf32>,
      %c0_11 = arith.constant 0 : index
      %c0_12 = arith.constant 0 : index
      %16 = vector.load %arg2[%c0_11, %c0_12] : memref<216x480xbf16, #tpu.memory_space<vmem>>, vector<216x480xbf16>
      %c0_13 = arith.constant 0 : index
      %c0_14 = arith.constant 0 : index
      %17 = vector.load %arg1[%c0_13, %c0_14] : memref<480x72xbf16, #tpu.memory_space<vmem>>, vector<480x72xbf16>
      %cst_15 = arith.constant dense<0.000000e+00> : vector<216x72xf32>
      %18 = tpu.matmul %16, %17, %cst_15 {dimension_numbers = #tpu.dot_dimension_numbers<[1], [0], [0], [1], [0, 0, 1, 1], [], []>} : vector<216x480xbf16>, vector<480x72xbf16>, vector<216x72xf32> -> vector<216x72xf32>
      %19 = vector.extract_strided_slice %18 {offsets = [96, 0], sizes = [24, 72], strides = [1, 1]} : vector<216x72xf32> to vector<24x72xf32>
      %20 = vector.extract_strided_slice %18 {offsets = [72, 0], sizes = [24, 72], strides = [1, 1]} : vector<216x72xf32> to vector<24x72xf32>
      %21 = vector.extract_strided_slice %20 {offsets = [0, 1], sizes = [24, 71], strides = [1, 1]} : vector<24x72xf32> to vector<24x71xf32>
      %22 = vector.extract_strided_slice %20 {offsets = [0, 0], sizes = [24, 1], strides = [1, 1]} : vector<24x72xf32> to vector<24x1xf32>
      %23 = tpu.concatenate %21, %22 in 1 : vector<24x71xf32>, vector<24x1xf32> -> vector<24x72xf32>
      %24 = vector.extract_strided_slice %18 {offsets = [120, 0], sizes = [24, 72], strides = [1, 1]} : vector<216x72xf32> to vector<24x72xf32>
      %25 = arith.addf %23, %24 : vector<24x72xf32>
      %26 = vector.extract_strided_slice %18 {offsets = [24, 0], sizes = [24, 72], strides = [1, 1]} : vector<216x72xf32> to vector<24x72xf32>
      %27 = vector.extract_strided_slice %26 {offsets = [0, 6], sizes = [24, 66], strides = [1, 1]} : vector<24x72xf32> to vector<24x66xf32>
      %28 = vector.extract_strided_slice %26 {offsets = [0, 0], sizes = [24, 6], strides = [1, 1]} : vector<24x72xf32> to vector<24x6xf32>
      %29 = tpu.concatenate %27, %28 in 1 : vector<24x66xf32>, vector<24x6xf32> -> vector<24x72xf32>
      %30 = vector.extract_strided_slice %18 {offsets = [168, 0], sizes = [24, 72], strides = [1, 1]} : vector<216x72xf32> to vector<24x72xf32>
      %31 = arith.addf %29, %30 : vector<24x72xf32>
      %32 = vector.extract_strided_slice %18 {offsets = [0, 0], sizes = [24, 72], strides = [1, 1]} : vector<216x72xf32> to vector<24x72xf32>
      %33 = vector.extract_strided_slice %32 {offsets = [0, 7], sizes = [24, 65], strides = [1, 1]} : vector<24x72xf32> to vector<24x65xf32>
      %34 = vector.extract_strided_slice %32 {offsets = [0, 0], sizes = [24, 7], strides = [1, 1]} : vector<24x72xf32> to vector<24x7xf32>
      %35 = tpu.concatenate %33, %34 in 1 : vector<24x65xf32>, vector<24x7xf32> -> vector<24x72xf32>
      %36 = vector.extract_strided_slice %18 {offsets = [48, 0], sizes = [24, 72], strides = [1, 1]} : vector<216x72xf32> to vector<24x72xf32>
      %37 = vector.extract_strided_slice %36 {offsets = [0, 6], sizes = [24, 66], strides = [1, 1]} : vector<24x72xf32> to vector<24x66xf32>
      %38 = vector.extract_strided_slice %36 {offsets = [0, 0], sizes = [24, 6], strides = [1, 1]} : vector<24x72xf32> to vector<24x6xf32>
      %39 = tpu.concatenate %37, %38 in 1 : vector<24x66xf32>, vector<24x6xf32> -> vector<24x72xf32>
      %40 = arith.addf %35, %39 : vector<24x72xf32>
      %41 = vector.extract_strided_slice %18 {offsets = [144, 0], sizes = [24, 72], strides = [1, 1]} : vector<216x72xf32> to vector<24x72xf32>
      %42 = vector.extract_strided_slice %41 {offsets = [0, 1], sizes = [24, 71], strides = [1, 1]} : vector<24x72xf32> to vector<24x71xf32>
      %43 = vector.extract_strided_slice %41 {offsets = [0, 0], sizes = [24, 1], strides = [1, 1]} : vector<24x72xf32> to vector<24x1xf32>
      %44 = tpu.concatenate %42, %43 in 1 : vector<24x71xf32>, vector<24x1xf32> -> vector<24x72xf32>
      %45 = arith.addf %40, %44 : vector<24x72xf32>
      %46 = vector.extract_strided_slice %18 {offsets = [192, 0], sizes = [24, 72], strides = [1, 1]} : vector<216x72xf32> to vector<24x72xf32>
      %47 = arith.addf %45, %46 : vector<24x72xf32>
      %48 = tpu.concatenate %19, %25, %31, %47 in 1 : vector<24x72xf32>, vector<24x72xf32>, vector<24x72xf32>, vector<24x72xf32> -> vector<24x288xf32>
      %49 = arith.truncf %48 : vector<24x288xf32> to vector<24x288xbf16>
      %c0_16 = arith.constant 0 : index
      %c0_17 = arith.constant 0 : index
      %50 = vector.load %arg3[%c0_16, %c0_17] : memref<288x242xbf16, #tpu.memory_space<vmem>>, vector<288x242xbf16>
      %cst_18 = arith.constant dense<0.000000e+00> : vector<24x242xf32>
      %51 = tpu.matmul %49, %50, %cst_18 {dimension_numbers = #tpu.dot_dimension_numbers<[1], [0], [0], [1], [0, 0, 1, 1], [], []>} : vector<24x288xbf16>, vector<288x242xbf16>, vector<24x242xf32> -> vector<24x242xf32>
      %52 = vector.extract_strided_slice %51 {offsets = [0, 0], sizes = [1, 242], strides = [1, 1]} : vector<24x242xf32> to vector<1x242xf32>
      %c0_19 = arith.constant 0 : index
      %c0_20 = arith.constant 0 : index
      %53 = vector.load %arg9[%c0_19, %c0_20] : memref<3x1936xf32, #tpu.memory_space<vmem>>, vector<1x242xf32>
      tpu.vector_store %arg9[%c0_19, %c0_20], %52 {strides = array<i32>} : memref<3x1936xf32, #tpu.memory_space<vmem>>, vector<1x242xf32>,
      %54 = vector.extract_strided_slice %51 {offsets = [1, 0], sizes = [1, 242], strides = [1, 1]} : vector<24x242xf32> to vector<1x242xf32>
      %c0_21 = arith.constant 0 : index
      %c242 = arith.constant 242 : index
      %55 = vector.load %arg9[%c0_21, %c242] : memref<3x1936xf32, #tpu.memory_space<vmem>>, vector<1x242xf32>
      tpu.vector_store %arg9[%c0_21, %c242], %54 {strides = array<i32>} : memref<3x1936xf32, #tpu.memory_space<vmem>>, vector<1x242xf32>,
      %56 = vector.extract_strided_slice %51 {offsets = [2, 0], sizes = [1, 242], strides = [1, 1]} : vector<24x242xf32> to vector<1x242xf32>
      %c0_22 = arith.constant 0 : index
      %c484 = arith.constant 484 : index
      %57 = vector.load %arg9[%c0_22, %c484] : memref<3x1936xf32, #tpu.memory_space<vmem>>, vector<1x242xf32>
      tpu.vector_store %arg9[%c0_22, %c484], %56 {strides = array<i32>} : memref<3x1936xf32, #tpu.memory_space<vmem>>, vector<1x242xf32>,
      %58 = vector.extract_strided_slice %51 {offsets = [3, 0], sizes = [1, 242], strides = [1, 1]} : vector<24x242xf32> to vector<1x242xf32>
      %c0_23 = arith.constant 0 : index
      %c726 = arith.constant 726 : index
      %59 = vector.load %arg9[%c0_23, %c726] : memref<3x1936xf32, #tpu.memory_space<vmem>>, vector<1x242xf32>
      tpu.vector_store %arg9[%c0_23, %c726], %58 {strides = array<i32>} : memref<3x1936xf32, #tpu.memory_space<vmem>>, vector<1x242xf32>,
      %60 = vector.extract_strided_slice %51 {offsets = [4, 0], sizes = [1, 242], strides = [1, 1]} : vector<24x242xf32> to vector<1x242xf32>
      %c0_24 = arith.constant 0 : index
      %c968 = arith.constant 968 : index
      %61 = vector.load %arg9[%c0_24, %c968] : memref<3x1936xf32, #tpu.memory_space<vmem>>, vector<1x242xf32>
      tpu.vector_store %arg9[%c0_24, %c968], %60 {strides = array<i32>} : memref<3x1936xf32, #tpu.memory_space<vmem>>, vector<1x242xf32>,
      %62 = vector.extract_strided_slice %51 {offsets = [5, 0], sizes = [1, 242], strides = [1, 1]} : vector<24x242xf32> to vector<1x242xf32>
      %c0_25 = arith.constant 0 : index
      %c1210 = arith.constant 1210 : index
      %63 = vector.load %arg9[%c0_25, %c1210] : memref<3x1936xf32, #tpu.memory_space<vmem>>, vector<1x242xf32>
      tpu.vector_store %arg9[%c0_25, %c1210], %62 {strides = array<i32>} : memref<3x1936xf32, #tpu.memory_space<vmem>>, vector<1x242xf32>,
      %64 = vector.extract_strided_slice %51 {offsets = [6, 0], sizes = [1, 242], strides = [1, 1]} : vector<24x242xf32> to vector<1x242xf32>
      %c0_26 = arith.constant 0 : index
      %c1452 = arith.constant 1452 : index
      %65 = vector.load %arg9[%c0_26, %c1452] : memref<3x1936xf32, #tpu.memory_space<vmem>>, vector<1x242xf32>
      tpu.vector_store %arg9[%c0_26, %c1452], %64 {strides = array<i32>} : memref<3x1936xf32, #tpu.memory_space<vmem>>, vector<1x242xf32>,
      %66 = vector.extract_strided_slice %51 {offsets = [7, 0], sizes = [1, 242], strides = [1, 1]} : vector<24x242xf32> to vector<1x242xf32>
      %c0_27 = arith.constant 0 : index
      %c1694 = arith.constant 1694 : index
      %67 = vector.load %arg9[%c0_27, %c1694] : memref<3x1936xf32, #tpu.memory_space<vmem>>, vector<1x242xf32>
      tpu.vector_store %arg9[%c0_27, %c1694], %66 {strides = array<i32>} : memref<3x1936xf32, #tpu.memory_space<vmem>>, vector<1x242xf32>,
      %68 = vector.extract_strided_slice %51 {offsets = [8, 0], sizes = [1, 242], strides = [1, 1]} : vector<24x242xf32> to vector<1x242xf32>
      %c1 = arith.constant 1 : index
      %c0_28 = arith.constant 0 : index
      %69 = vector.load %arg9[%c1, %c0_28] : memref<3x1936xf32, #tpu.memory_space<vmem>>, vector<1x242xf32>
      tpu.vector_store %arg9[%c1, %c0_28], %68 {strides = array<i32>} : memref<3x1936xf32, #tpu.memory_space<vmem>>, vector<1x242xf32>,
      %70 = vector.extract_strided_slice %51 {offsets = [9, 0], sizes = [1, 242], strides = [1, 1]} : vector<24x242xf32> to vector<1x242xf32>
      %c1_29 = arith.constant 1 : index
      %c242_30 = arith.constant 242 : index
      %71 = vector.load %arg9[%c1_29, %c242_30] : memref<3x1936xf32, #tpu.memory_space<vmem>>, vector<1x242xf32>
      tpu.vector_store %arg9[%c1_29, %c242_30], %70 {strides = array<i32>} : memref<3x1936xf32, #tpu.memory_space<vmem>>, vector<1x242xf32>,
      %72 = vector.extract_strided_slice %51 {offsets = [10, 0], sizes = [1, 242], strides = [1, 1]} : vector<24x242xf32> to vector<1x242xf32>
      %c1_31 = arith.constant 1 : index
      %c484_32 = arith.constant 484 : index
      %73 = vector.load %arg9[%c1_31, %c484_32] : memref<3x1936xf32, #tpu.memory_space<vmem>>, vector<1x242xf32>
      tpu.vector_store %arg9[%c1_31, %c484_32], %72 {strides = array<i32>} : memref<3x1936xf32, #tpu.memory_space<vmem>>, vector<1x242xf32>,
      %74 = vector.extract_strided_slice %51 {offsets = [11, 0], sizes = [1, 242], strides = [1, 1]} : vector<24x242xf32> to vector<1x242xf32>
      %c1_33 = arith.constant 1 : index
      %c726_34 = arith.constant 726 : index
      %75 = vector.load %arg9[%c1_33, %c726_34] : memref<3x1936xf32, #tpu.memory_space<vmem>>, vector<1x242xf32>
      tpu.vector_store %arg9[%c1_33, %c726_34], %74 {strides = array<i32>} : memref<3x1936xf32, #tpu.memory_space<vmem>>, vector<1x242xf32>,
      %76 = vector.extract_strided_slice %51 {offsets = [12, 0], sizes = [1, 242], strides = [1, 1]} : vector<24x242xf32> to vector<1x242xf32>
      %c1_35 = arith.constant 1 : index
      %c968_36 = arith.constant 968 : index
      %77 = vector.load %arg9[%c1_35, %c968_36] : memref<3x1936xf32, #tpu.memory_space<vmem>>, vector<1x242xf32>
      tpu.vector_store %arg9[%c1_35, %c968_36], %76 {strides = array<i32>} : memref<3x1936xf32, #tpu.memory_space<vmem>>, vector<1x242xf32>,
      %78 = vector.extract_strided_slice %51 {offsets = [13, 0], sizes = [1, 242], strides = [1, 1]} : vector<24x242xf32> to vector<1x242xf32>
      %c1_37 = arith.constant 1 : index
      %c1210_38 = arith.constant 1210 : index
      %79 = vector.load %arg9[%c1_37, %c1210_38] : memref<3x1936xf32, #tpu.memory_space<vmem>>, vector<1x242xf32>
      tpu.vector_store %arg9[%c1_37, %c1210_38], %78 {strides = array<i32>} : memref<3x1936xf32, #tpu.memory_space<vmem>>, vector<1x242xf32>,
      %80 = vector.extract_strided_slice %51 {offsets = [14, 0], sizes = [1, 242], strides = [1, 1]} : vector<24x242xf32> to vector<1x242xf32>
      %c1_39 = arith.constant 1 : index
      %c1452_40 = arith.constant 1452 : index
      %81 = vector.load %arg9[%c1_39, %c1452_40] : memref<3x1936xf32, #tpu.memory_space<vmem>>, vector<1x242xf32>
      tpu.vector_store %arg9[%c1_39, %c1452_40], %80 {strides = array<i32>} : memref<3x1936xf32, #tpu.memory_space<vmem>>, vector<1x242xf32>,
      %82 = vector.extract_strided_slice %51 {offsets = [15, 0], sizes = [1, 242], strides = [1, 1]} : vector<24x242xf32> to vector<1x242xf32>
      %c1_41 = arith.constant 1 : index
      %c1694_42 = arith.constant 1694 : index
      %83 = vector.load %arg9[%c1_41, %c1694_42] : memref<3x1936xf32, #tpu.memory_space<vmem>>, vector<1x242xf32>
      tpu.vector_store %arg9[%c1_41, %c1694_42], %82 {strides = array<i32>} : memref<3x1936xf32, #tpu.memory_space<vmem>>, vector<1x242xf32>,
      %84 = vector.extract_strided_slice %51 {offsets = [16, 0], sizes = [1, 242], strides = [1, 1]} : vector<24x242xf32> to vector<1x242xf32>
      %c2 = arith.constant 2 : index
      %c0_43 = arith.constant 0 : index
      %85 = vector.load %arg9[%c2, %c0_43] : memref<3x1936xf32, #tpu.memory_space<vmem>>, vector<1x242xf32>
      tpu.vector_store %arg9[%c2, %c0_43], %84 {strides = array<i32>} : memref<3x1936xf32, #tpu.memory_space<vmem>>, vector<1x242xf32>,
      %86 = vector.extract_strided_slice %51 {offsets = [17, 0], sizes = [1, 242], strides = [1, 1]} : vector<24x242xf32> to vector<1x242xf32>
      %c2_44 = arith.constant 2 : index
      %c242_45 = arith.constant 242 : index
      %87 = vector.load %arg9[%c2_44, %c242_45] : memref<3x1936xf32, #tpu.memory_space<vmem>>, vector<1x242xf32>
      tpu.vector_store %arg9[%c2_44, %c242_45], %86 {strides = array<i32>} : memref<3x1936xf32, #tpu.memory_space<vmem>>, vector<1x242xf32>,
      %88 = vector.extract_strided_slice %51 {offsets = [18, 0], sizes = [1, 242], strides = [1, 1]} : vector<24x242xf32> to vector<1x242xf32>
      %c2_46 = arith.constant 2 : index
      %c484_47 = arith.constant 484 : index
      %89 = vector.load %arg9[%c2_46, %c484_47] : memref<3x1936xf32, #tpu.memory_space<vmem>>, vector<1x242xf32>
      tpu.vector_store %arg9[%c2_46, %c484_47], %88 {strides = array<i32>} : memref<3x1936xf32, #tpu.memory_space<vmem>>, vector<1x242xf32>,
      %90 = vector.extract_strided_slice %51 {offsets = [19, 0], sizes = [1, 242], strides = [1, 1]} : vector<24x242xf32> to vector<1x242xf32>
      %c2_48 = arith.constant 2 : index
      %c726_49 = arith.constant 726 : index
      %91 = vector.load %arg9[%c2_48, %c726_49] : memref<3x1936xf32, #tpu.memory_space<vmem>>, vector<1x242xf32>
      tpu.vector_store %arg9[%c2_48, %c726_49], %90 {strides = array<i32>} : memref<3x1936xf32, #tpu.memory_space<vmem>>, vector<1x242xf32>,
      %92 = vector.extract_strided_slice %51 {offsets = [20, 0], sizes = [1, 242], strides = [1, 1]} : vector<24x242xf32> to vector<1x242xf32>
      %c2_50 = arith.constant 2 : index
      %c968_51 = arith.constant 968 : index
      %93 = vector.load %arg9[%c2_50, %c968_51] : memref<3x1936xf32, #tpu.memory_space<vmem>>, vector<1x242xf32>
      tpu.vector_store %arg9[%c2_50, %c968_51], %92 {strides = array<i32>} : memref<3x1936xf32, #tpu.memory_space<vmem>>, vector<1x242xf32>,
      %94 = vector.extract_strided_slice %51 {offsets = [21, 0], sizes = [1, 242], strides = [1, 1]} : vector<24x242xf32> to vector<1x242xf32>
      %c2_52 = arith.constant 2 : index
      %c1210_53 = arith.constant 1210 : index
      %95 = vector.load %arg9[%c2_52, %c1210_53] : memref<3x1936xf32, #tpu.memory_space<vmem>>, vector<1x242xf32>
      tpu.vector_store %arg9[%c2_52, %c1210_53], %94 {strides = array<i32>} : memref<3x1936xf32, #tpu.memory_space<vmem>>, vector<1x242xf32>,
      %96 = vector.extract_strided_slice %51 {offsets = [22, 0], sizes = [1, 242], strides = [1, 1]} : vector<24x242xf32> to vector<1x242xf32>
      %c2_54 = arith.constant 2 : index
      %c1452_55 = arith.constant 1452 : index
      %97 = vector.load %arg9[%c2_54, %c1452_55] : memref<3x1936xf32, #tpu.memory_space<vmem>>, vector<1x242xf32>
      tpu.vector_store %arg9[%c2_54, %c1452_55], %96 {strides = array<i32>} : memref<3x1936xf32, #tpu.memory_space<vmem>>, vector<1x242xf32>,
      %98 = vector.extract_strided_slice %51 {offsets = [23, 0], sizes = [1, 242], strides = [1, 1]} : vector<24x242xf32> to vector<1x242xf32>
      %c2_56 = arith.constant 2 : index
      %c1694_57 = arith.constant 1694 : index
      %99 = vector.load %arg9[%c2_56, %c1694_57] : memref<3x1936xf32, #tpu.memory_space<vmem>>, vector<1x242xf32>
      tpu.vector_store %arg9[%c2_56, %c1694_57], %98 {strides = array<i32>} : memref<3x1936xf32, #tpu.memory_space<vmem>>, vector<1x242xf32>,
    } else {
    }
    %3 = arith.index_cast %arg0 : i32 to index
    %c0 = arith.constant 0 : index
    %4 = vector.load %arg9[%3, %c0] : memref<3x1936xf32, #tpu.memory_space<vmem>>, vector<1x1936xf32>
    %5 = arith.truncf %4 : vector<1x1936xf32> to vector<1x1936xbf16>
    %c0_1 = arith.constant 0 : index
    %c0_2 = arith.constant 0 : index
    %6 = vector.load %arg10[%c0_1, %c0_2] : memref<1x345xf32, #tpu.memory_space<vmem>>, vector<1x345xf32>
    %c0_3 = arith.constant 0 : index
    %c0_4 = arith.constant 0 : index
    %7 = vector.load %arg4[%c0_3, %c0_4] : memref<1936x345xbf16, #tpu.memory_space<vmem>>, vector<1936x345xbf16>
    %cst = arith.constant dense<0.000000e+00> : vector<1x345xf32>
    %8 = tpu.matmul %5, %7, %cst {dimension_numbers = #tpu.dot_dimension_numbers<[1], [0], [0], [1], [0, 0, 1, 1], [], []>} : vector<1x1936xbf16>, vector<1936x345xbf16>, vector<1x345xf32> -> vector<1x345xf32>
    %9 = arith.addf %6, %8 : vector<1x345xf32>
    %c0_5 = arith.constant 0 : index
    %c0_6 = arith.constant 0 : index
    %10 = vector.load %arg10[%c0_5, %c0_6] : memref<1x345xf32, #tpu.memory_space<vmem>>, vector<1x345xf32>
    tpu.vector_store %arg10[%c0_5, %c0_6], %9 {strides = array<i32>} : memref<1x345xf32, #tpu.memory_space<vmem>>, vector<1x345xf32>,
    %c2_i32 = arith.constant 2 : i32
    %11 = arith.cmpi eq, %arg0, %c2_i32 : i32
    %12 = arith.extui %11 : i1 to i32
    %c0_i32_7 = arith.constant 0 : i32
    %13 = arith.cmpi ne, %12, %c0_i32_7 : i32
    scf.if %13 {
      %c0_8 = arith.constant 0 : index
      %c0_9 = arith.constant 0 : index
      %14 = vector.load %arg10[%c0_8, %c0_9] : memref<1x345xf32, #tpu.memory_space<vmem>>, vector<1x345xf32>
      %c0_10 = arith.constant 0 : index
      %c0_11 = arith.constant 0 : index
      %15 = vector.load %arg5[%c0_10, %c0_11] : memref<1x345xf32, #tpu.memory_space<vmem>>, vector<1x345xf32>
      %16 = arith.addf %14, %15 : vector<1x345xf32>
      %cst_12 = arith.constant 0.000000e+00 : f32
      %17 = vector.broadcast %cst_12 : f32 to vector<1x345xf32>
      %18 = arith.maximumf %16, %17 : vector<1x345xf32>
      %c0_13 = arith.constant 0 : index
      %c0_14 = arith.constant 0 : index
      %19 = vector.load %arg6[%c0_13, %c0_14] : memref<345x2xf32, #tpu.memory_space<vmem>>, vector<345x2xf32>
      %cst_15 = arith.constant dense<0.000000e+00> : vector<1x2xf32>
      %20 = tpu.matmul %18, %19, %cst_15 {dimension_numbers = #tpu.dot_dimension_numbers<[1], [0], [0], [1], [0, 0, 1, 1], [], []>} : vector<1x345xf32>, vector<345x2xf32>, vector<1x2xf32> -> vector<1x2xf32>
      %c0_16 = arith.constant 0 : index
      %c0_17 = arith.constant 0 : index
      %21 = vector.load %arg7[%c0_16, %c0_17] : memref<1x2xf32, #tpu.memory_space<vmem>>, vector<1x2xf32>
      %22 = arith.addf %20, %21 : vector<1x2xf32>
      %c0_18 = arith.constant 0 : index
      %c0_19 = arith.constant 0 : index
      %23 = vector.load %arg8[%c0_18, %c0_19] : memref<1x2xf32, #tpu.memory_space<vmem>>, vector<1x2xf32>
      tpu.vector_store %arg8[%c0_18, %c0_19], %22 {strides = array<i32>} : memref<1x2xf32, #tpu.memory_space<vmem>>, vector<1x2xf32>,
    } else {
    }
    return
  }
  func.func @transform_0(%arg0: i32) -> (i32, i32) {
    %c0_i32 = arith.constant 0 : i32
    %c0_i32_0 = arith.constant 0 : i32
    %c0_i32_1 = arith.constant 0 : i32
    return %c0_i32, %c0_i32_0 : i32, i32
  }
  func.func @transform_1(%arg0: i32) -> (i32, i32) {
    %c0_i32 = arith.constant 0 : i32
    %c0_i32_0 = arith.constant 0 : i32
    %c0_i32_1 = arith.constant 0 : i32
    return %c0_i32, %c0_i32_0 : i32, i32
  }
  func.func @transform_2(%arg0: i32) -> (i32, i32) {
    %c0_i32 = arith.constant 0 : i32
    %c0_i32_0 = arith.constant 0 : i32
    %c0_i32_1 = arith.constant 0 : i32
    return %c0_i32, %c0_i32_0 : i32, i32
  }
  func.func @transform_3(%arg0: i32) -> (i32, i32) {
    %c0_i32 = arith.constant 0 : i32
    %c0_i32_0 = arith.constant 0 : i32
    return %arg0, %c0_i32 : i32, i32
  }
  func.func @transform_4(%arg0: i32) -> (i32, i32) {
    %c0_i32 = arith.constant 0 : i32
    %c0_i32_0 = arith.constant 0 : i32
    %c0_i32_1 = arith.constant 0 : i32
    return %c0_i32, %c0_i32_0 : i32, i32
  }
  func.func @transform_5(%arg0: i32) -> (i32, i32) {
    %c0_i32 = arith.constant 0 : i32
    %c0_i32_0 = arith.constant 0 : i32
    %c0_i32_1 = arith.constant 0 : i32
    return %c0_i32, %c0_i32_0 : i32, i32
  }
  func.func @transform_6(%arg0: i32) -> (i32, i32) {
    %c0_i32 = arith.constant 0 : i32
    %c0_i32_0 = arith.constant 0 : i32
    %c0_i32_1 = arith.constant 0 : i32
    return %c0_i32, %c0_i32_0 : i32, i32
  }
  func.func @transform_7(%arg0: i32) -> (i32, i32) {
    %c0_i32 = arith.constant 0 : i32
    %c0_i32_0 = arith.constant 0 : i32
    %c0_i32_1 = arith.constant 0 : i32
    return %c0_i32, %c0_i32_0 : i32, i32
  }
}

</mosaic_0001>

<bundles_post_ra>
// kernel: forward.1
= control target key start
LH: loop header
LB: loop body
LE: loop exit
PB: predicated region body
PF: predicated region fallthrough
CT: control target
= control target key end

     0   :  { %12 = vsyncpa [#allocation5], 0  ;;  %s7911_s24 = smov 0   ;;  %s9917_s0 = inlined_call_operand.vmem [shape: bf16[480,72], index: 0, kind: input, shape index: {}]   ;;  %s9918_s1 = inlined_call_operand.vmem [shape: bf16[216,480], index: 1, kind: input, shape index: {}]   ;;  %s9919_s2 = inlined_call_operand.vmem [shape: bf16[288,242], index: 2, kind: input, shape index: {}]   ;;  %s9920_s3 = inlined_call_operand.vmem [shape: bf16[5808,345], index: 3, kind: input, shape index: {}]   ;;  %s9921_s4 = inlined_call_operand.vmem [shape: f32[1,345], index: 4, kind: input, shape index: {}]   ;;  %s9922_s5 = inlined_call_operand.vmem [shape: f32[345,2], index: 5, kind: input, shape index: {}]   ;;  %s9923_s6 = inlined_call_operand.vmem [shape: f32[1,2], index: 6, kind: input, shape index: {}]   ;;  %s9924_s7 = inlined_call_operand.hbm [shape: f32[1,2], index: 7, kind: output, shape index: {}]  }
   0x1 LB: > { %s7917_s25 = sadd.s32 4294967295, %s7852_s24   ;;  %p5308_p0 = scmp.ge.s32.totalorder %s7852_s24, 1  ;;  %s7852_s24 = sphi %s7911_s24, %s18_s24  }
   0x2   : > { %p235_p1 = scmp.lt.s32.totalorder %s7852_s24, 4 }
   0x4   : > { %p236_p2 = pnand %p5308_p0, %p235_p1 }
   0x5   : > { %s263_s26 = smul.u32 (!%p236_p2), 242, %s7917_s25  ;;  %p5310_p4 = scmp.ne.s32.totalorder (!%p236_p2), %s7917_s25, 0 }
   0x6   : > { %239 = sbr.rel (%p236_p2) target bundleno = 1712 (0x6b0), region = 48 }
   0x7   : > { %p264_p3 = scmp.lt.s32.totalorder (!%p236_p2), %s263_s26, 725 }
   0xb   : > { %s9942_s26 = smov (!%p264_p3, %s263_s26), 725  ;;  %274 = sbr.rel (%p5310_p4) target bundleno = 1020 (0x3fc), region = 52 }
   0xc   : > { %s7767_s27 = smul.u32 12, %s9942_s26  ;;  %s7854_s18 = smov (!%p5310_p4), 121  }
   0xd   : > { %s7855_s9 = smov (!%p5310_p4), 65   ;;  %s7857_s29 = smov (!%p5310_p4), 66  }
   0xe   : > { %s7925_s30 = scalar_lea.vmem %s9920_s3, %s7767_s27  ;;  %s7858_s27 = smov (!%p5310_p4), 71  }
   0xf   : > { %s7859_s28 = smov (!%p5310_p4), 127   ;;  %s7861_s17 = smov (!%p5310_p4), 16  }
  0x10   : > { %v7327_v0 = vld [vmem:[%s9917_s0 + $0x38] sm:$0xff]  ;;  %v7349_v3 = vld [vmem:[%s9917_s0 + $0xe8] sm:$0xff]  ;;  %v7326_v4 = vld [vmem:[%s9917_s0 + $0x30] sm:$0xff]  ;;  %vm834_vm0 = vcmask 785408   ;;  %vm1266_vm1 = vcmask 531456   ;;  %vm1238_vm2 = vcmask 539648  }
  0x11   : > { %v7335_v1 = vld [vmem:[%s9917_s0 + $0x78] sm:$0xff]  ;;  %877 = vmatpush.bf16.msra.mxu0 %v7327_v0  ;;  %v7334_v5 = vld [vmem:[%s9917_s0 + $0x70] sm:$0xff]  ;;  %1113 = vmatpush.bf16.msra.mxu3 %v7349_v3  ;;  %v7348_v7 = vld [vmem:[%s9917_s0 + $0xe0] sm:$0xff]  ;;  %vm1210_vm3 = vcmask 580608   ;;  %s7862_s12 = smov 88   ;;  %vm1363_vm4 = vcmask 588800  }
  0x12   : > { %v7343_v2 = vld [vmem:[%s9917_s0 + $0xb8] sm:$0xff]  ;;  %955 = vmatpush.bf16.msra.mxu1 %v7335_v1  ;;  %v7342_v6 = vld [vmem:[%s9917_s0 + $0xb0] sm:$0xff]  ;;  %v7325_v8 = vld [vmem:[%s9917_s0 + $0x28] sm:$0xff]  ;;  %vm1367_vm5 = vcmask 130048   ;;  %vm1371_vm6 = vcmask 719872   ;;  %vm1597_vm7 = vcmask 261120  }
  0x13   : > { %1033 = vmatpush.bf16.msra.mxu2 %v7343_v2  ;;  %v7333_v9 = vld [vmem:[%s9917_s0 + $0x68] sm:$0xff]  ;;  %v7347_v11 = vld [vmem:[%s9917_s0 + $0xd8] sm:$0xff]  ;;  %v7324_v12 = vld [vmem:[%s9917_s0 + $0x20] sm:$0xff]  ;;  %vm1715_vm8 = vcmask 1040384   ;;  %s7864_s8 = smov 100   ;;  %s7867_s10 = smov 44  }
  0x14   : > { %v7341_v10 = vld [vmem:[%s9917_s0 + $0xa8] sm:$0xff]  ;;  %v7332_v13 = vld [vmem:[%s9917_s0 + $0x60] sm:$0xff]  ;;  %v7346_v15 = vld [vmem:[%s9917_s0 + $0xd0] sm:$0xff]  ;;  %vm1728_vm13 = vcmask 932864   ;;  %s7869_s11 = smov 30  }
  0x15   : > { %878 = vmatpush.bf16.msra.mxu0 %v7326_v4  ;;  %1114 = vmatpush.bf16.msra.mxu3 %v7348_v7  ;;  %v7340_v14 = vld [vmem:[%s9917_s0 + $0xa0] sm:$0xff]  ;;  %v7323_v16 = vld [vmem:[%s9917_s0 + $0x18] sm:$0xff]  ;;  %v7345_v19 = vld [vmem:[%s9917_s0 + $0xc8] sm:$0xff] }
  0x16   : > { %956 = vmatpush.bf16.msra.mxu1 %v7334_v5  ;;  %v7331_v17 = vld [vmem:[%s9917_s0 + $0x58] sm:$0xff]  ;;  %v7322_v20 = vld [vmem:[%s9917_s0 + $0x10] sm:$0xff]  ;;  %v7344_v23 = vld [vmem:[%s9917_s0 + $0xc0] sm:$0xff] }
  0x17   : > { %1034 = vmatpush.bf16.msra.mxu2 %v7342_v6  ;;  %v7339_v18 = vld [vmem:[%s9917_s0 + $0x98] sm:$0xff]  ;;  %v7330_v21 = vld [vmem:[%s9917_s0 + $0x50] sm:$0xff]  ;;  %v7269_v24 = vld [vmem:[%s9918_s1 + $0xc] sm:$0xf] }
  0x18   : > { %v7338_v22 = vld [vmem:[%s9917_s0 + $0x90] sm:$0xff]  ;;  %v5323_v25 = vld [vmem:[%s9918_s1 + $0x18] sm:$0xf0]  ;;  %v7321_v26 = vld [vmem:[%s9917_s0 + $0x8] sm:$0xff] }
  0x19   : > { %879 = vmatpush.bf16.msra.mxu0 %v7325_v8  ;;  %1115 = vmatpush.bf16.msra.mxu3 %v7347_v11  ;;  %v7329_v27 = vld [vmem:[%s9917_s0 + $0x48] sm:$0xff]  ;;  %v5326_v29 = vor.u32 %v7269_v24, %v5323_v25  ;;  %v7320_v30 = vld [vmem:[%s9917_s0] sm:$0xff]  ;;  %v7270_v33 = vld [vmem:[%s9918_s1 + $0xc] sm:$0xf0] }
  0x1a   : > { %957 = vmatpush.bf16.msra.mxu1 %v7333_v9  ;;  %v7337_v28 = vld [vmem:[%s9917_s0 + $0x88] sm:$0xff]  ;;  %v7328_v31 = vld [vmem:[%s9917_s0 + $0x40] sm:$0xff]  ;;  %v5315_v35 = vld [vmem:[%s9918_s1 + $0x10] sm:$0xf0] }
  0x1b   : > { %1035 = vmatpush.bf16.msra.mxu2 %v7341_v10  ;;  %v5313_v32 = vld [vmem:[%s9918_s1] sm:$0xf]  ;;  %v7268_v34 = vld [vmem:[%s9918_s1 + $0x4] sm:$0xf]  ;;  %v5321_v37 = vld [vmem:[%s9918_s1 + $0x8] sm:$0xf] }
  0x1c   : > { %v7336_v36 = vld [vmem:[%s9917_s0 + $0x80] sm:$0xff]  ;;  %v7271_v38 = vld [vmem:[%s9918_s1 + $0x14] sm:$0xf0]  ;;  %v5314_v39 = vor.u32 %v7270_v33, %v5313_v32  ;;  %v5318_v40 = vor.u32 %v7268_v34, %v5315_v35  ;;  %v7273_v42 = vld [vmem:[%s9918_s1 + $0x2c] sm:$0xf] }
  0x1d   : > { %880 = vmatpush.bf16.msra.mxu0 %v7324_v12  ;;  %1116 = vmatpush.bf16.msra.mxu3 %v7346_v15  ;;  %v5322_v41 = vor.u32 %v7271_v38, %v5321_v37  ;;  %v5339_v43 = vld [vmem:[%s9918_s1 + $0x38] sm:$0xf0]  ;;  %v5329_v45 = vld [vmem:[%s9918_s1 + $0x20] sm:$0xf]  ;;  %v7274_v46 = vld [vmem:[%s9918_s1 + $0x2c] sm:$0xf0] }
  0x1e   : > { %958 = vmatpush.bf16.msra.mxu1 %v7332_v13  ;;  %v5342_v44 = vor.u32 %v7273_v42, %v5339_v43  ;;  %v7272_v47 = vld [vmem:[%s9918_s1 + $0x24] sm:$0xf]  ;;  %v5331_v48 = vld [vmem:[%s9918_s1 + $0x30] sm:$0xf0]  ;;  %v5337_v49 = vld [vmem:[%s9918_s1 + $0x28] sm:$0xf]  ;;  %v5330_v51 = vor.u32 %v7274_v46, %v5329_v45 }
  0x1f   : > { %1036 = vmatpush.bf16.msra.mxu2 %v7340_v14  ;;  %v7275_v50 = vld [vmem:[%s9918_s1 + $0x34] sm:$0xf0]  ;;  %v5334_v52 = vor.u32 %v7272_v47, %v5331_v48  ;;  %v7277_v54 = vld [vmem:[%s9918_s1 + $0x4c] sm:$0xf]  ;;  %v5355_v55 = vld [vmem:[%s9918_s1 + $0x58] sm:$0xf0] }
  0x20   : > { %v5338_v53 = vor.u32 %v7275_v50, %v5337_v49  ;;  %v5358_v56 = vor.u32 %v7277_v54, %v5355_v55  ;;  %v5345_v57 = vld [vmem:[%s9918_s1 + $0x40] sm:$0xf]  ;;  %v7278_v58 = vld [vmem:[%s9918_s1 + $0x4c] sm:$0xf0]  ;;  %v7276_v59 = vld [vmem:[%s9918_s1 + $0x44] sm:$0xf] }
  0x21   : > { %881 = vmatpush.bf16.msra.mxu0 %v7323_v16  ;;  %1117 = vmatpush.bf16.msra.mxu3 %v7345_v19  ;;  %v5347_v60 = vld [vmem:[%s9918_s1 + $0x50] sm:$0xf0]  ;;  %v5353_v61 = vld [vmem:[%s9918_s1 + $0x48] sm:$0xf]  ;;  %v7279_v62 = vld [vmem:[%s9918_s1 + $0x54] sm:$0xf0]  ;;  %v5346_v63 = vor.u32 %v7278_v58, %v5345_v57 }
  0x22   : > { %959 = vmatpush.bf16.msra.mxu1 %v7331_v17  ;;  %v5350_v0 = vor.u32 %v7276_v59, %v5347_v60  ;;  %v5354_v1 = vor.u32 %v7279_v62, %v5353_v61  ;;  %v7281_v2 = vld [vmem:[%s9918_s1 + $0x6c] sm:$0xf]  ;;  %v5371_v3 = vld [vmem:[%s9918_s1 + $0x78] sm:$0xf0]  ;;  %v5361_v5 = vld [vmem:[%s9918_s1 + $0x60] sm:$0xf] }
  0x23   : > { %1037 = vmatpush.bf16.msra.mxu2 %v7339_v18  ;;  %v5374_v4 = vor.u32 %v7281_v2, %v5371_v3  ;;  %v7282_v6 = vld [vmem:[%s9918_s1 + $0x6c] sm:$0xf0]  ;;  %v7280_v7 = vld [vmem:[%s9918_s1 + $0x64] sm:$0xf]  ;;  %v5363_v8 = vld [vmem:[%s9918_s1 + $0x70] sm:$0xf0] }
  0x24   : > { %v5369_v9 = vld [vmem:[%s9918_s1 + $0x68] sm:$0xf]  ;;  %v7283_v10 = vld [vmem:[%s9918_s1 + $0x74] sm:$0xf0]  ;;  %v5362_v11 = vor.u32 %v7282_v6, %v5361_v5  ;;  %v5366_v12 = vor.u32 %v7280_v7, %v5363_v8  ;;  %v7285_v14 = vld [vmem:[%s9918_s1 + $0x8c] sm:$0xf] }
  0x25   : > { %882 = vmatpush.bf16.msra.mxu0 %v7322_v20  ;;  %1118 = vmatpush.bf16.msra.mxu3 %v7344_v23  ;;  %v5370_v13 = vor.u32 %v7283_v10, %v5369_v9  ;;  %v5387_v15 = vld [vmem:[%s9918_s1 + $0x98] sm:$0xf0]  ;;  %v5377_v17 = vld [vmem:[%s9918_s1 + $0x80] sm:$0xf]  ;;  %v7286_v18 = vld [vmem:[%s9918_s1 + $0x8c] sm:$0xf0] }
  0x26   : > { %960 = vmatpush.bf16.msra.mxu1 %v7330_v21  ;;  %v5390_v16 = vor.u32 %v7285_v14, %v5387_v15  ;;  %v7284_v19 = vld [vmem:[%s9918_s1 + $0x84] sm:$0xf]  ;;  %v5379_v20 = vld [vmem:[%s9918_s1 + $0x90] sm:$0xf0]  ;;  %v5385_v21 = vld [vmem:[%s9918_s1 + $0x88] sm:$0xf]  ;;  %v5378_v23 = vor.u32 %v7286_v18, %v5377_v17 }
  0x27   : > { %1038 = vmatpush.bf16.msra.mxu2 %v7338_v22  ;;  %v7287_v22 = vld [vmem:[%s9918_s1 + $0x94] sm:$0xf0]  ;;  %v5382_v24 = vor.u32 %v7284_v19, %v5379_v20  ;;  %v5395_v32 = vld [vmem:[%s9918_s1 + $0xb0] sm:$0xf0]  ;;  %v5401_v33 = vld [vmem:[%s9918_s1 + $0xa8] sm:$0xf] }
  0x28   : > { %5639 = vmatmul.msk.bf16.vlgmr.msra.gmra.mxu3 %vm834_vm0, %v5326_v29  ;;  %v5386_v25 = vor.u32 %v7287_v22, %v5385_v21  ;;  %v5393_v29 = vld [vmem:[%s9918_s1 + $0xa0] sm:$0xf]  ;;  %v7291_v34 = vld [vmem:[%s9918_s1 + $0xb4] sm:$0xf0]  ;;  %v7293_v38 = vld [vmem:[%s9918_s1 + $0xcc] sm:$0xf] }
  0x29   : > { %883 = vmatpush.bf16.msra.mxu0 %v7321_v26  ;;  %v7289_v26 = vld [vmem:[%s9918_s1 + $0xac] sm:$0xf]  ;;  %v5402_v37 = vor.u32 %v7291_v34, %v5401_v33  ;;  %v7294_v42 = vld [vmem:[%s9918_s1 + $0xcc] sm:$0xf0]  ;;  %v7292_v43 = vld [vmem:[%s9918_s1 + $0xc4] sm:$0xf] }
  0x2a   : > { %961 = vmatpush.bf16.msra.mxu1 %v7329_v27  ;;  %v5403_v27 = vld [vmem:[%s9918_s1 + $0xb8] sm:$0xf0]  ;;  %v5417_v45 = vld [vmem:[%s9918_s1 + $0xc8] sm:$0xf]  ;;  %v7295_v46 = vld [vmem:[%s9918_s1 + $0xd4] sm:$0xf0] }
  0x2b   : > { %1039 = vmatpush.bf16.msra.mxu2 %v7337_v28  ;;  %v5406_v28 = vor.u32 %v7289_v26, %v5403_v27  ;;  %v5418_v49 = vor.u32 %v7295_v46, %v5417_v45  ;;  %v7297_v50 = vld [vmem:[%s9918_s1 + $0xec] sm:$0xf]  ;;  %v7298_v54 = vld [vmem:[%s9918_s1 + $0xec] sm:$0xf0]  ;;  %v7296_v55 = vld [vmem:[%s9918_s1 + $0xe4] sm:$0xf] }
  0x2c   : > { %v5433_v57 = vld [vmem:[%s9918_s1 + $0xe8] sm:$0xf]  ;;  %v7299_v58 = vld [vmem:[%s9918_s1 + $0xf4] sm:$0xf0]  ;;  %v7301_v62 = vld [vmem:[%s9918_s1 + $0x10c] sm:$0xf] }
  0x2d   : > { %884 = vmatpush.bf16.msra.mxu0 %v7320_v30  ;;  %v7290_v30 = vld [vmem:[%s9918_s1 + $0xac] sm:$0xf0]  ;;  %v5434_v61 = vor.u32 %v7299_v58, %v5433_v57  ;;  %v7300_v3 = vld [vmem:[%s9918_s1 + $0x104] sm:$0xf]  ;;  %v5449_v5 = vld [vmem:[%s9918_s1 + $0x108] sm:$0xf] }
  0x2e   : > { %962 = vmatpush.bf16.msra.mxu1 %v7328_v31  ;;  %v7288_v31 = vld [vmem:[%s9918_s1 + $0xa4] sm:$0xf]  ;;  %v5394_v35 = vor.u32 %v7290_v30, %v5393_v29  ;;  %v7302_v2 = vld [vmem:[%s9918_s1 + $0x10c] sm:$0xf0]  ;;  %v7303_v6 = vld [vmem:[%s9918_s1 + $0x114] sm:$0xf0] }
  0x2f   : > { %1040 = vmatpush.bf16.msra.mxu2 %v7336_v36  ;;  %v5398_v36 = vor.u32 %v7288_v31, %v5395_v32  ;;  %v7305_v14 = vld [vmem:[%s9918_s1 + $0x12c] sm:$0xf]  ;;  %v5467_v15 = vld [vmem:[%s9918_s1 + $0x138] sm:$0xf0]  ;;  %v5459_v26 = vld [vmem:[%s9918_s1 + $0x130] sm:$0xf0] }
  0x30   : > { %885 = vmatmul.bf16.vlgmr.msra.gmra.mxu0 %v5314_v39  ;;  %v5419_v39 = vld [vmem:[%s9918_s1 + $0xd8] sm:$0xf0]  ;;  %v5470_v21 = vor.u32 %v7305_v14, %v5467_v15  ;;  %v5465_v27 = vld [vmem:[%s9918_s1 + $0x128] sm:$0xf] }
  0x31   : > { %963 = vmatmul.bf16.vlgmr.msra.gmra.mxu1 %v5318_v40  ;;  %v5422_v40 = vor.u32 %v7293_v38, %v5419_v39 }
  0x32   : > { %1041 = vmatmul.bf16.vlgmr.msra.gmra.mxu2 %v5322_v41  ;;  %v5409_v41 = vld [vmem:[%s9918_s1 + $0xc0] sm:$0xf] }
  0x33   : > { %v5410_v47 = vor.u32 %v7294_v42, %v5409_v41  ;;  %v5483_v41 = vld [vmem:[%s9918_s1 + $0x158] sm:$0xf0] }
  0x38   : > { %5640 = vmatmul.msk.bf16.gmra.mxu3 %vm834_vm0, %v5342_v44  ;;  %v5411_v44 = vld [vmem:[%s9918_s1 + $0xd0] sm:$0xf0] }
  0x39   : > { %v5414_v48 = vor.u32 %v7292_v43, %v5411_v44 }
  0x40   : > { %890 = vmatmul.bf16.gmra.mxu0 %v5330_v51  ;;  %v5435_v51 = vld [vmem:[%s9918_s1 + $0xf8] sm:$0xf0] }
  0x41   : > { %968 = vmatmul.bf16.gmra.mxu1 %v5334_v52  ;;  %v5438_v52 = vor.u32 %v7297_v50, %v5435_v51  ;;  %v7310_v50 = vld [vmem:[%s9918_s1 + $0x14c] sm:$0xf0]  ;;  %v7308_v51 = vld [vmem:[%s9918_s1 + $0x144] sm:$0xf] }
  0x42   : > { %1046 = vmatmul.bf16.gmra.mxu2 %v5338_v53  ;;  %v5425_v53 = vld [vmem:[%s9918_s1 + $0xe0] sm:$0xf] }
  0x43   : > { %v5426_v59 = vor.u32 %v7298_v54, %v5425_v53  ;;  %v5481_v53 = vld [vmem:[%s9918_s1 + $0x148] sm:$0xf]  ;;  %v7311_v54 = vld [vmem:[%s9918_s1 + $0x154] sm:$0xf0] }
  0x48   : > { %5641 = vmatmul.msk.bf16.gmra.mxu3 %vm834_vm0, %v5358_v56  ;;  %v5427_v56 = vld [vmem:[%s9918_s1 + $0xf0] sm:$0xf0] }
  0x49   : > { %v5430_v60 = vor.u32 %v7296_v55, %v5427_v56 }
  0x50   : > { %895 = vmatmul.bf16.gmra.mxu0 %v5346_v63  ;;  %v5451_v63 = vld [vmem:[%s9918_s1 + $0x118] sm:$0xf0] }
  0x51   : > { %973 = vmatmul.bf16.gmra.mxu1 %v5350_v0  ;;  %v5454_v0 = vor.u32 %v7301_v62, %v5451_v63  ;;  %v5482_v62 = vor.u32 %v7311_v54, %v5481_v53 }
  0x52   : > { %1051 = vmatmul.bf16.gmra.mxu2 %v5354_v1  ;;  %v5441_v1 = vld [vmem:[%s9918_s1 + $0x100] sm:$0xf] }
  0x53   : > { %v5442_v7 = vor.u32 %v7302_v2, %v5441_v1 }
  0x58   : > { %5642 = vmatmul.msk.bf16.gmra.mxu3 %vm834_vm0, %v5374_v4  ;;  %v5443_v4 = vld [vmem:[%s9918_s1 + $0x110] sm:$0xf0] }
  0x59   : > { %v5446_v8 = vor.u32 %v7300_v3, %v5443_v4 }
  0x60   : > { %900 = vmatmul.bf16.gmra.mxu0 %v5362_v11  ;;  %v5450_v11 = vor.u32 %v7303_v6, %v5449_v5 }
  0x61   : > { %978 = vmatmul.bf16.gmra.mxu1 %v5366_v12 }
  0x62   : > { %1056 = vmatmul.bf16.gmra.mxu2 %v5370_v13 }
  0x68   : > { %5643 = vmatmul.msk.bf16.gmra.mxu3 %vm834_vm0, %v5390_v16 }
  0x70   : > { %905 = vmatmul.bf16.gmra.mxu0 %v5378_v23  ;;  %v5457_v23 = vld [vmem:[%s9918_s1 + $0x120] sm:$0xf] }
  0x71   : > { %983 = vmatmul.bf16.gmra.mxu1 %v5382_v24  ;;  %v7306_v24 = vld [vmem:[%s9918_s1 + $0x12c] sm:$0xf0] }
  0x72   : > { %1061 = vmatmul.bf16.gmra.mxu2 %v5386_v25  ;;  %v7304_v25 = vld [vmem:[%s9918_s1 + $0x124] sm:$0xf]  ;;  %v5458_v31 = vor.u32 %v7306_v24, %v5457_v23 }
  0x73   : > { %v5462_v32 = vor.u32 %v7304_v25, %v5459_v26 }
  0x78   : > { %5644 = vmatmul.msk.bf16.gmra.mxu3 %vm834_vm0, %v5406_v28  ;;  %v7307_v28 = vld [vmem:[%s9918_s1 + $0x134] sm:$0xf0] }
  0x80   : > { %910 = vmatmul.bf16.gmra.mxu0 %v5394_v35 }
  0x81   : > { %988 = vmatmul.bf16.gmra.mxu1 %v5398_v36  ;;  %v5466_v36 = vor.u32 %v7307_v28, %v5465_v27 }
  0x82   : > { %1066 = vmatmul.bf16.gmra.mxu2 %v5402_v37 }
  0x88   : > { %5645 = vmatmul.msk.bf16.gmra.mxu3 %vm834_vm0, %v5422_v40  ;;  %v7309_v40 = vld [vmem:[%s9918_s1 + $0x14c] sm:$0xf] }
  0x90   : > { %915 = vmatmul.bf16.gmra.mxu0 %v5410_v47  ;;  %v5486_v47 = vor.u32 %v7309_v40, %v5483_v41  ;;  %v5499_v40 = vld [vmem:[%s9918_s1 + $0x178] sm:$0xf0] }
  0x91   : > { %993 = vmatmul.bf16.gmra.mxu1 %v5414_v48 }
  0x92   : > { %1071 = vmatmul.bf16.gmra.mxu2 %v5418_v49  ;;  %v5473_v49 = vld [vmem:[%s9918_s1 + $0x140] sm:$0xf] }
  0x93   : > { %v5474_v57 = vor.u32 %v7310_v50, %v5473_v49 }
  0x98   : > { %5646 = vmatmul.msk.bf16.gmra.mxu3 %vm834_vm0, %v5438_v52  ;;  %v5475_v52 = vld [vmem:[%s9918_s1 + $0x150] sm:$0xf0] }
  0x99   : > { %v5478_v58 = vor.u32 %v7308_v51, %v5475_v52 }
  0xa0   : > { %920 = vmatmul.bf16.gmra.mxu0 %v5426_v59 }
  0xa1   : > { %998 = vmatmul.bf16.gmra.mxu1 %v5430_v60 }
  0xa2   : > { %1076 = vmatmul.bf16.gmra.mxu2 %v5434_v61 }
  0xa8   : > { %5647 = vmatmul.msk.bf16.gmra.mxu3 %vm834_vm0, %v5454_v0 }
  0xab   : > { %v1120_v12 = vpop.f32.mrf.mxu3 }
  0xad   : > { %v886_v9 = vpop.f32.mrf.mxu0 }
  0xae   : > { %v964_v10 = vpop.f32.mrf.mxu1 }
  0xaf   : > { %v965_v13 = vadd.f32 %v964_v10, %v886_v9 }
  0xb0   : > { %925 = vmatmul.bf16.gmra.mxu0 %v5442_v7 }
  0xb1   : > { %1003 = vmatmul.bf16.gmra.mxu1 %v5446_v8 }
  0xb2   : > { %1081 = vmatmul.bf16.gmra.mxu2 %v5450_v11 }
  0xb3   : > { %v1122_v20 = vpop.f32.mrf.mxu3 }
  0xb5   : > { %v1042_v16 = vpop.f32.mrf.mxu2  ;;  %v888_v18 = vpop.f32.mrf.mxu0 }
  0xb6   : > { %v1043_v17 = vadd.f32 %v1042_v16, %v965_v13  ;;  %v966_v19 = vpop.f32.mrf.mxu1 }
  0xb7   : > { %v967_v29 = vadd.f32 %v966_v19, %v888_v18 }
  0xb8   : > { %v1121_v22 = vadd.f32 %v1120_v12, %v1043_v17  ;;  %5648 = vmatmul.msk.bf16.gmra.mxu3 %vm834_vm0, %v5470_v21 }
  0xba   : > { %1248 = vrot.lane.b32.xlu0 %v1121_v22, %s7854_s18 }
  0xbb   : > { %v1125_v37 = vpop.f32.mrf.mxu3 }
  0xbd   : > { %v1044_v30 = vpop.f32.mrf.mxu2  ;;  %v891_v34 = vpop.f32.mrf.mxu0 }
  0xbe   : > { %v1045_v33 = vadd.f32 %v1044_v30, %v967_v29  ;;  %v969_v35 = vpop.f32.mrf.mxu1 }
  0xbf   : > { %v970_v39 = vadd.f32 %v969_v35, %v891_v34  ;;  %v5497_v34 = vld [vmem:[%s9918_s1 + $0x168] sm:$0xf]  ;;  %v7315_v35 = vld [vmem:[%s9918_s1 + $0x174] sm:$0xf0] }
  0xc0   : > { %v1123_v38 = vadd.f32 %v1122_v20, %v1045_v33  ;;  %930 = vmatmul.bf16.gmra.mxu0 %v5458_v31 }
  0xc1   : > { %1008 = vmatmul.bf16.gmra.mxu1 %v5462_v32 }
  0xc2   : > { %1086 = vmatmul.bf16.gmra.mxu2 %v5466_v36  ;;  %1250 = vrot.lane.b32.xlu1 %v1123_v38, %s7854_s18 }
  0xc3   : > { %1257 = vrot.lane.b32.xlu0 %v1121_v22, %s7855_s9  ;;  %v1127_v46 = vpop.f32.mrf.mxu3 }
  0xc5   : > { %v1047_v42 = vpop.f32.mrf.mxu2  ;;  %v893_v44 = vpop.f32.mrf.mxu0 }
  0xc6   : > { %v1048_v43 = vadd.f32 %v1047_v42, %v970_v39  ;;  %v971_v45 = vpop.f32.mrf.mxu1  ;;  %v7313_v39 = vld [vmem:[%s9918_s1 + $0x16c] sm:$0xf]  ;;  %v5489_v42 = vld [vmem:[%s9918_s1 + $0x160] sm:$0xf] }
  0xc7   : > { %v972_v55 = vadd.f32 %v971_v45, %v893_v44  ;;  %v5502_v41 = vor.u32 %v7313_v39, %v5499_v40  ;;  %v7312_v45 = vld [vmem:[%s9918_s1 + $0x164] sm:$0xf] }
  0xc8   : > { %v1126_v48 = vadd.f32 %v1125_v37, %v1048_v43  ;;  %5649 = vmatmul.msk.bf16.gmra.mxu3 %vm834_vm0, %v5486_v47  ;;  %v5498_v37 = vor.u32 %v7315_v35, %v5497_v34  ;;  %v7314_v43 = vld [vmem:[%s9918_s1 + $0x16c] sm:$0xf0] }
  0xc9   : > { %v5490_v44 = vor.u32 %v7314_v43, %v5489_v42 }
  0xca   : > { %1252 = vrot.lane.b32.xlu2 %v1126_v48, %s7854_s18  ;;  %1259 = vrot.lane.b32.xlu1 %v1123_v38, %s7855_s9  ;;  %s7856_s18 = smov 122  }
  0xcb   : > { %v1130_v63 = vpop.f32.mrf.mxu3 }
  0xcd   : > { %v1049_v56 = vpop.f32.mrf.mxu2  ;;  %v896_v60 = vpop.f32.mrf.mxu0 }
  0xce   : > { %v1050_v59 = vadd.f32 %v1049_v56, %v972_v55  ;;  %v974_v61 = vpop.f32.mrf.mxu1 }
  0xcf   : > { %v975_v1 = vadd.f32 %v974_v61, %v896_v60  ;;  %v5513_v60 = vld [vmem:[%s9918_s1 + $0x188] sm:$0xf]  ;;  %v7319_v61 = vld [vmem:[%s9918_s1 + $0x194] sm:$0xf0] }
  0xd0   : > { %v8298_v0 = vadd.f32 %v1127_v46, %v1050_v59  ;;  %935 = vmatmul.bf16.gmra.mxu0 %v5474_v57  ;;  %v5491_v46 = vld [vmem:[%s9918_s1 + $0x170] sm:$0xf0] }
  0xd1   : > { %1013 = vmatmul.bf16.gmra.mxu1 %v5478_v58 }
  0xd2   : > { %1091 = vmatmul.bf16.gmra.mxu2 %v5482_v62  ;;  %1261 = vrot.lane.b32.xlu2 %v1126_v48, %s7855_s9  ;;  %v5494_v48 = vor.u32 %v7312_v45, %v5491_v46  ;;  %s7866_s9 = smov 58  }
  0xd3   : > { %1220 = vrot.lane.b32.xlu0 %v8298_v0, %s7856_s18  ;;  %v1132_v6 = vpop.f32.mrf.mxu3 }
  0xd5   : > { %v1052_v2 = vpop.f32.mrf.mxu2  ;;  %v898_v4 = vpop.f32.mrf.mxu0 }
  0xd6   : > { %v1053_v3 = vadd.f32 %v1052_v2, %v975_v1  ;;  %v976_v5 = vpop.f32.mrf.mxu1  ;;  %v7317_v2 = vld [vmem:[%s9918_s1 + $0x18c] sm:$0xf] }
  0xd7   : > { %v977_v8 = vadd.f32 %v976_v5, %v898_v4  ;;  %v5505_v4 = vld [vmem:[%s9918_s1 + $0x180] sm:$0xf] }
  0xd8   : > { %v8303_v7 = vadd.f32 %v1130_v63, %v1053_v3  ;;  %5650 = vmatmul.msk.bf16.gmra.mxu3 %vm834_vm0, %v5502_v41  ;;  %v5514_v63 = vor.u32 %v7319_v61, %v5513_v60  ;;  %v5515_v3 = vld [vmem:[%s9918_s1 + $0x198] sm:$0xf0] }
  0xd9   : > { %v5518_v5 = vor.u32 %v7317_v2, %v5515_v3 }
  0xda   : > { %1222 = vrot.lane.b32.xlu1 %v8303_v7, %s7856_s18 }
  0xdb   : > { %v1135_v13 = vpop.f32.mrf.mxu3 }
  0xdd   : > { %v1054_v9 = vpop.f32.mrf.mxu2  ;;  %v901_v11 = vpop.f32.mrf.mxu0 }
  0xde   : > { %v1055_v10 = vadd.f32 %v1054_v9, %v977_v8  ;;  %v979_v12 = vpop.f32.mrf.mxu1  ;;  %v7316_v8 = vld [vmem:[%s9918_s1 + $0x184] sm:$0xf]  ;;  %v5507_v9 = vld [vmem:[%s9918_s1 + $0x190] sm:$0xf0] }
  0xdf   : > { %v980_v15 = vadd.f32 %v979_v12, %v901_v11  ;;  %v5510_v11 = vor.u32 %v7316_v8, %v5507_v9 }
  0xe0   : > { %v8307_v14 = vadd.f32 %v1132_v6, %v1055_v10  ;;  %940 = vmatmul.bf16.gmra.mxu0 %v5490_v44  ;;  %v7318_v6 = vld [vmem:[%s9918_s1 + $0x18c] sm:$0xf0] }
  0xe1   : > { %1018 = vmatmul.bf16.gmra.mxu1 %v5494_v48  ;;  %v5506_v10 = vor.u32 %v7318_v6, %v5505_v4 }
  0xe2   : > { %1224 = vrot.lane.b32.xlu2 %v8307_v14, %s7856_s18  ;;  %1096 = vmatmul.bf16.gmra.mxu2 %v5498_v37 }
  0xe3   : > { %v1137_v20 = vpop.f32.mrf.mxu3 }
  0xe5   : > { %v1057_v16 = vpop.f32.mrf.mxu2  ;;  %v903_v18 = vpop.f32.mrf.mxu0 }
  0xe6   : > { %v1058_v17 = vadd.f32 %v1057_v16, %v980_v15  ;;  %v981_v19 = vpop.f32.mrf.mxu1 }
  0xe7   : > { %v982_v22 = vadd.f32 %v981_v19, %v903_v18 }
  0xe8   : > { %v1136_v21 = vadd.f32 %v1135_v13, %v1058_v17  ;;  %5651 = vmatmul.msk.bf16.gmra.mxu3 %vm834_vm0, %v5518_v5 }
  0xea   : > { %1273 = vrot.lane.b32.xlu0 %v1136_v21, %s7856_s18 }
  0xeb   : > { %v1140_v27 = vpop.f32.mrf.mxu3 }
  0xed   : > { %v1059_v23 = vpop.f32.mrf.mxu2  ;;  %v906_v25 = vpop.f32.mrf.mxu0 }
  0xee   : > { %v1060_v24 = vadd.f32 %v1059_v23, %v982_v22  ;;  %v984_v26 = vpop.f32.mrf.mxu1 }
  0xef   : > { %v985_v29 = vadd.f32 %v984_v26, %v906_v25 }
  0xf0   : > { %v1138_v28 = vadd.f32 %v1137_v20, %v1060_v24  ;;  %945 = vmatmul.bf16.gmra.mxu0 %v5506_v10 }
  0xf1   : > { %1023 = vmatmul.bf16.gmra.mxu1 %v5510_v11 }
  0xf2   : > { %1275 = vrot.lane.b32.xlu1 %v1138_v28, %s7856_s18  ;;  %1282 = vrot.lane.b32.xlu0 %v1136_v21, %s7857_s29  ;;  %v333_v21 = vld [vmem:[%s9918_s1 + $0x1a8] sm:$0xff] }
  0xf3   : > { %v1142_v36 = vpop.f32.mrf.mxu3  ;;  %1101 = vmatmul.bf16.gmra.mxu2 %v5514_v63  ;;  %v554_v23 = vunpack.c.l.b16 %v333_v21  ;;  %v7364_v63 = vld [vmem:[%s9919_s2 + $0x74] sm:$0xf] }
  0xf5   : > { %v1062_v30 = vpop.f32.mrf.mxu2  ;;  %v908_v32 = vpop.f32.mrf.mxu0 }
  0xf6   : > { %v1063_v31 = vadd.f32 %v1062_v30, %v985_v29  ;;  %v986_v33 = vpop.f32.mrf.mxu1  ;;  %v555_v29 = vunpack.c.h.b16 %v333_v21  ;;  %v610_v30 = vpack.c.b16 %v554_v23, %v554_v23 }
  0xf7   : > { %v987_v47 = vadd.f32 %v986_v33, %v908_v32  ;;  %v332_v32 = vld [vmem:[%s9918_s1 + $0x1a0] sm:$0xff] }
  0xf8   : > { %v1141_v38 = vadd.f32 %v1140_v27, %v1063_v31  ;;  %v611_v33 = vpack.c.b16 %v555_v29, %v555_v29  ;;  %v552_v34 = vunpack.c.l.b16 %v332_v32  ;;  %v553_v35 = vunpack.c.h.b16 %v332_v32 }
  0xfa   : > { %1277 = vrot.lane.b32.xlu2 %v1141_v38, %s7856_s18  ;;  %1284 = vrot.lane.b32.xlu1 %v1138_v28, %s7857_s29  ;;  %v609_v37 = vpack.c.b16 %v553_v35, %v553_v35  ;;  %s7863_s18 = smov 114  }
  0xfb   : > { %v1145_v53 = vpop.f32.mrf.mxu3  ;;  %5652 = vmatmul.msk.bf16.gmra.mxu3 %vm834_vm0, %v611_v33 }
  0xfd   : > { %v1064_v49 = vpop.f32.mrf.mxu2  ;;  %v911_v51 = vpop.f32.mrf.mxu0 }
  0xfe   : > { %v1065_v50 = vadd.f32 %v1064_v49, %v987_v47  ;;  %v989_v52 = vpop.f32.mrf.mxu1 }
  0xff   : > { %v990_v55 = vadd.f32 %v989_v52, %v911_v51 }
 0x100   : > { %v1143_v54 = vadd.f32 %v1142_v36, %v1065_v50  ;;  %v608_v36 = vpack.c.b16 %v552_v34, %v552_v34 }
 0x101   : > { %1028 = vmatmul.bf16.gmra.mxu1 %v609_v37  ;;  %v7362_v37 = vld [vmem:[%s9919_s2 + $0x64] sm:$0xf] }
 0x102   : > { %1286 = vrot.lane.b32.xlu2 %v1141_v38, %s7857_s29  ;;  %1201 = vrot.lane.b32.xlu1 %v1143_v54, %s7858_s27 }
 0x103   : > { %1192 = vrot.lane.b32.xlu0 %v1143_v54, %s7859_s28  ;;  %v1147_v62 = vpop.f32.mrf.mxu3  ;;  %1106 = vmatmul.bf16.gmra.mxu2 %v610_v30 }
 0x104   : > { %950 = vmatmul.bf16.gmra.mxu0 %v608_v36 }
 0x105   : > { %v1067_v56 = vpop.f32.mrf.mxu2  ;;  %v913_v58 = vpop.f32.mrf.mxu0 }
 0x106   : > { %v1068_v57 = vadd.f32 %v1067_v56, %v990_v55  ;;  %v991_v59 = vpop.f32.mrf.mxu1 }
 0x107   : > { %v992_v12 = vadd.f32 %v991_v59, %v913_v58 }
 0x108   : > { %v1146_v1 = vadd.f32 %v1145_v53, %v1068_v57 }
 0x10a   : > { %1203 = vrot.lane.b32.xlu1 %v1146_v1, %s7858_s27 }
 0x10b   : > { %1194 = vrot.lane.b32.xlu0 %v1146_v1, %s7859_s28  ;;  %v1150_v19 = vpop.f32.mrf.mxu3  ;;  %v5713_v1 = vld [vmem:[%s9919_s2 + $0x78] sm:$0xf0] }
 0x10c   : > { %v5716_v2 = vor.u32 %v7364_v63, %v5713_v1 }
 0x10d   : > { %v1069_v13 = vpop.f32.mrf.mxu2  ;;  %v916_v16 = vpop.f32.mrf.mxu0 }
 0x10e   : > { %v1070_v15 = vadd.f32 %v1069_v13, %v992_v12  ;;  %v994_v17 = vpop.f32.mrf.mxu1  ;;  %1658 = vmatpush.bf16.msrb.mxu2 %v5716_v2 }
 0x10f   : > { %v995_v18 = vadd.f32 %v994_v17, %v916_v16 }
 0x110   : > { %v1148_v20 = vadd.f32 %v1147_v62, %v1070_v15 }
 0x112   : > { %1196 = vrot.lane.b32.xlu2 %v1148_v20, %s7859_s28 }
 0x113   : > { %v1152_v28 = vpop.f32.mrf.mxu3 }
 0x115   : > { %v1072_v22 = vpop.f32.mrf.mxu2  ;;  %v918_v25 = vpop.f32.mrf.mxu0 }
 0x116   : > { %v1073_v24 = vadd.f32 %v1072_v22, %v995_v18  ;;  %v996_v26 = vpop.f32.mrf.mxu1 }
 0x117   : > { %v997_v27 = vadd.f32 %v996_v26, %v918_v25  ;;  %v5775_v26 = vld [vmem:[%s9919_s2 + $0xf0] sm:$0xf] }
 0x118   : > { %v8375_v31 = vadd.f32 %v1150_v19, %v1073_v24 }
 0x11a   : > { %1205 = vrot.lane.b32.xlu2 %v1148_v20, %s7858_s27 }
 0x11b   : > { %v1155_v43 = vpop.f32.mrf.mxu3 }
 0x11d   : > { %v1074_v38 = vpop.f32.mrf.mxu2  ;;  %v921_v40 = vpop.f32.mrf.mxu0 }
 0x11e   : > { %v1075_v39 = vadd.f32 %v1074_v38, %v997_v27  ;;  %v999_v41 = vpop.f32.mrf.mxu1  ;;  %v7381_v27 = vld [vmem:[%s9919_s2 + $0xf4] sm:$0xf0]  ;;  %v5705_v38 = vld [vmem:[%s9919_s2 + $0x68] sm:$0xf0] }
 0x11f   : > { %v1000_v42 = vadd.f32 %v999_v41, %v921_v40  ;;  %v5708_v40 = vor.u32 %v7362_v37, %v5705_v38  ;;  %v7365_v41 = vld [vmem:[%s9919_s2 + $0x74] sm:$0xf0] }
 0x120   : > { %v8382_v44 = vadd.f32 %v1152_v28, %v1075_v39  ;;  %v5776_v28 = vor.u32 %v7381_v27, %v5775_v26  ;;  %v5711_v39 = vld [vmem:[%s9919_s2 + $0x70] sm:$0xf]  ;;  %v7358_v26 = vld [vmem:[%s9919_s2 + $0x44] sm:$0xf] }
 0x121   : > { %1659 = vmatpush.bf16.msrb.mxu2 %v5708_v40 }
 0x122   : > { %1622 = vmatpush.bf16.msrb.mxu0 %v5776_v28  ;;  %7751 = vmatpush.bf16.msrb.mxu1 %v5776_v28 }
 0x123   : > { %v1157_v51 = vpop.f32.mrf.mxu3 }
 0x124   : > { %v1253_v45 = vpop.permute.xlu2 %1252 }
 0x125   : > { %v1077_v46 = vpop.f32.mrf.mxu2  ;;  %v923_v48 = vpop.f32.mrf.mxu0 }
 0x126   : > { %v1078_v47 = vadd.f32 %v1077_v46, %v1000_v42  ;;  %v1001_v49 = vpop.f32.mrf.mxu1 }
 0x127   : > { %v1002_v50 = vadd.f32 %v1001_v49, %v923_v48 }
 0x128   : > { %v8384_v52 = vadd.f32 %v1155_v43, %v1078_v47  ;;  %v5712_v43 = vor.u32 %v7365_v41, %v5711_v39 }
 0x12a   : > { %1604 = vmatpush.bf16.msrb.mxu3 %v5712_v43 }
 0x12b   : > { %v1160_v61 = vpop.f32.mrf.mxu3 }
 0x12c   : > { %v1262_v53 = vpop.permute.xlu2 %1261  ;;  %v1249_v54 = vpop.permute.xlu0 %1248 }
 0x12d   : > { %v8387_v55 = vsel %vm1266_vm1, %v1253_v45, %v1262_v53  ;;  %v1079_v56 = vpop.f32.mrf.mxu2  ;;  %v926_v58 = vpop.f32.mrf.mxu0 }
 0x12e   : > { %v1080_v57 = vadd.f32 %v1079_v56, %v1002_v50  ;;  %v1004_v59 = vpop.f32.mrf.mxu1 }
 0x12f   : > { %v1005_v60 = vadd.f32 %v1004_v59, %v926_v58 }
 0x130   : > { %v8389_v62 = vadd.f32 %v1157_v51, %v1080_v57 }
 0x133   : > { %v8406_v12 = vpop.f32.mrf.mxu3 }
 0x134   : > { %v1251_v3 = vpop.permute.xlu1 %1250 }
 0x135   : > { %v1258_v4 = vpop.permute.xlu0 %1257  ;;  %v1082_v5 = vpop.f32.mrf.mxu2 }
 0x136   : > { %v8398_v6 = vsel %vm1266_vm1, %v1249_v54, %v1258_v4  ;;  %v1083_v8 = vadd.f32 %v1082_v5, %v1005_v60  ;;  %v8400_v9 = vpop.f32.mrf.mxu0  ;;  %v8402_v10 = vpop.f32.mrf.mxu1  ;;  %v7379_v4 = vld [vmem:[%s9919_s2 + $0xe4] sm:$0xf0] }
 0x138   : > { %v8404_v11 = vadd.f32 %v1160_v61, %v1083_v8 }
 0x13b   : > { %v1165_v20 = vpop.f32.mrf.mxu3 }
 0x13c   : > { %v1260_v13 = vpop.permute.xlu1 %1259  ;;  %v8420_v29 = vpop.permute.xlu2 %1224 }
 0x13d   : > { %v8409_v15 = vsel %vm1266_vm1, %v1251_v3, %v1260_v13  ;;  %v8411_v16 = vpop.f32.mrf.mxu2  ;;  %vm1743_vm1 = vcmask 818176  }
 0x13e   : > { %v931_v17 = vpop.f32.mrf.mxu0  ;;  %v1009_v18 = vpop.f32.mrf.mxu1 }
 0x13f   : > { %v1010_v19 = vadd.f32 %v1009_v18, %v931_v17  ;;  %v5697_v17 = vld [vmem:[%s9919_s2 + $0x58] sm:$0xf0]  ;;  %v7363_v18 = vld [vmem:[%s9919_s2 + $0x64] sm:$0xf0] }
 0x143   : > { %v1167_v32 = vpop.f32.mrf.mxu3 }
 0x145   : > { %v1087_v21 = vpop.f32.mrf.mxu2  ;;  %v8436_v46 = vpop.permute.xlu0 %1220 }
 0x146   : > { %v1088_v22 = vadd.f32 %v1087_v21, %v1010_v19  ;;  %v933_v23 = vpop.f32.mrf.mxu0  ;;  %v1011_v24 = vpop.f32.mrf.mxu1 }
 0x147   : > { %v1012_v30 = vadd.f32 %v1011_v24, %v933_v23  ;;  %v5759_v23 = vld [vmem:[%s9919_s2 + $0xd0] sm:$0xf]  ;;  %v7377_v24 = vld [vmem:[%s9919_s2 + $0xd4] sm:$0xf0] }
 0x148   : > { %v1166_v25 = vadd.f32 %v1165_v20, %v1088_v22 }
 0x14a   : > { %1300 = vrot.lane.b32.xlu0 %v1166_v25, %s7859_s28 }
 0x14b   : > { %v1170_v49 = vpop.f32.mrf.mxu3 }
 0x14c   : > { %v8440_v57 = vpop.permute.xlu1 %1222 }
 0x14d   : > { %v1089_v33 = vpop.f32.mrf.mxu2 }
 0x14e   : > { %v1090_v34 = vadd.f32 %v1089_v33, %v1012_v30  ;;  %v936_v35 = vpop.f32.mrf.mxu0  ;;  %v1014_v36 = vpop.f32.mrf.mxu1  ;;  %v1007_v33 = vadd.f32 %v8402_v10, %v8400_v9 }
 0x14f   : > { %v1015_v45 = vadd.f32 %v1014_v36, %v936_v35  ;;  %v5695_v35 = vld [vmem:[%s9919_s2 + $0x50] sm:$0xf] }
 0x150   : > { %v1168_v42 = vadd.f32 %v1167_v32, %v1090_v34  ;;  %v1085_v37 = vadd.f32 %v8411_v16, %v1007_v33 }
 0x152   : > { %1302 = vrot.lane.b32.xlu1 %v1168_v42, %s7859_s28  ;;  %1309 = vrot.lane.b32.xlu0 %v1166_v25, %s7858_s27  ;;  %v5760_v25 = vor.u32 %v7377_v24, %v5759_v23  ;;  %v1163_v38 = vadd.f32 %v8406_v12, %v1085_v37  ;;  %v5681_v23 = vld [vmem:[%s9919_s2 + $0x38] sm:$0xf0] }
 0x153   : > { %v1172_v63 = vpop.f32.mrf.mxu3 }
 0x154   : > { %v1278_v47 = vpop.permute.xlu2 %1277 }
 0x155   : > { %v1092_v48 = vpop.f32.mrf.mxu2 }
 0x156   : > { %v1093_v50 = vadd.f32 %v1092_v48, %v1015_v45  ;;  %v938_v51 = vpop.f32.mrf.mxu0  ;;  %v1016_v53 = vpop.f32.mrf.mxu1 }
 0x157   : > { %v1017_v54 = vadd.f32 %v1016_v53, %v938_v51 }
 0x158   : > { %v1171_v56 = vadd.f32 %v1170_v49, %v1093_v50 }
 0x15a   : > { %1304 = vrot.lane.b32.xlu2 %v1171_v56, %s7859_s28  ;;  %1311 = vrot.lane.b32.xlu1 %v1168_v42, %s7858_s27  ;;  %s7865_s28 = smov 86  }
 0x15b   : > { %1229 = vrot.lane.b32.xlu0 %v8298_v0, %s7857_s29  ;;  %v5767_v0 = vld [vmem:[%s9919_s2 + $0xe0] sm:$0xf]  ;;  %v1175_v50 = vpop.f32.mrf.mxu3 }
 0x15c   : > { %v1287_v58 = vpop.permute.xlu2 %1286  ;;  %v1274_v59 = vpop.permute.xlu0 %1273  ;;  %v5768_v13 = vor.u32 %v7379_v4, %v5767_v0 }
 0x15d   : > { %v1293_v60 = vsel %vm1238_vm2, %v1278_v47, %v1287_v58  ;;  %v1094_v61 = vpop.f32.mrf.mxu2 }
 0x15e   : > { %v8446_v1 = vadd.f32 %v1293_v60, %v8387_v55  ;;  %v1095_v2 = vadd.f32 %v1094_v61, %v1017_v54  ;;  %v7360_v55 = vld [vmem:[%s9919_s2 + $0x54] sm:$0xf]  ;;  %1623 = vmatpush.bf16.msrb.mxu0 %v5768_v13  ;;  %7752 = vmatpush.bf16.msrb.mxu1 %v5768_v13  ;;  %v941_v41 = vpop.f32.mrf.mxu0  ;;  %v1019_v42 = vpop.f32.mrf.mxu1 }
 0x15f   : > { %v5700_v20 = vor.u32 %v7360_v55, %v5697_v17  ;;  %v1020_v47 = vadd.f32 %v1019_v42, %v941_v41  ;;  %v5679_v41 = vld [vmem:[%s9919_s2 + $0x30] sm:$0xf]  ;;  %v7357_v42 = vld [vmem:[%s9919_s2 + $0x34] sm:$0xf0] }
 0x160   : > { %v8448_v3 = vadd.f32 %v1172_v63, %v1095_v2 }
 0x161   : > { %1660 = vmatpush.bf16.msrb.mxu2 %v5700_v20  ;;  %v7356_v20 = vld [vmem:[%s9919_s2 + $0x34] sm:$0xf] }
 0x162   : > { %1313 = vrot.lane.b32.xlu2 %v1171_v56, %s7858_s27  ;;  %1231 = vrot.lane.b32.xlu1 %v8303_v7, %s7857_s29  ;;  %v5703_v7 = vld [vmem:[%s9919_s2 + $0x60] sm:$0xf]  ;;  %v5684_v24 = vor.u32 %v7356_v20, %v5681_v23 }
 0x163   : > { %v5704_v21 = vor.u32 %v7363_v18, %v5703_v7  ;;  %1624 = vmatpush.bf16.msrb.mxu0 %v5760_v25  ;;  %7753 = vmatpush.bf16.msrb.mxu1 %v5760_v25  ;;  %v1177_v61 = vpop.f32.mrf.mxu3  ;;  %v5751_v18 = vld [vmem:[%s9919_s2 + $0xc0] sm:$0xf] }
 0x164   : > { %v1276_v5 = vpop.permute.xlu1 %1275  ;;  %v1283_v8 = vpop.permute.xlu0 %1282 }
 0x165   : > { %v1291_v19 = vsel %vm1238_vm2, %v1274_v59, %v1283_v8  ;;  %1605 = vmatpush.bf16.msrb.mxu3 %v5704_v21  ;;  %v1097_v16 = vpop.f32.mrf.mxu2 }
 0x166   : > { %v8473_v22 = vadd.f32 %v1291_v19, %v8398_v6  ;;  %v5689_v6 = vld [vmem:[%s9919_s2 + $0x48] sm:$0xf0]  ;;  %v1098_v12 = vadd.f32 %v1097_v16, %v1020_v47  ;;  %v943_v58 = vpop.f32.mrf.mxu0  ;;  %v1021_v59 = vpop.f32.mrf.mxu1  ;;  %v7375_v19 = vld [vmem:[%s9919_s2 + $0xc4] sm:$0xf0] }
 0x167   : > { %v5692_v27 = vor.u32 %v7358_v26, %v5689_v6  ;;  %v5752_v21 = vor.u32 %v7375_v19, %v5751_v18 }
 0x168   : > { %v8509_v54 = vadd.f32 %v1175_v50, %v1098_v12 }
 0x169   : > { %1661 = vmatpush.bf16.msrb.mxu2 %v5692_v27  ;;  %1625 = vmatpush.bf16.msrb.mxu0 %v5752_v21 }
 0x16a   : > { %1233 = vrot.lane.b32.xlu2 %v8307_v14, %s7857_s29  ;;  %v7361_v14 = vld [vmem:[%s9919_s2 + $0x54] sm:$0xf0]  ;;  %s7860_s29 = smov 72   ;;  %7754 = vmatpush.bf16.msrb.mxu1 %v5752_v21 }
 0x16b   : > { %v5696_v36 = vor.u32 %v7361_v14, %v5695_v35  ;;  %v1180_v4 = vpop.f32.mrf.mxu3  ;;  %v5743_v35 = vld [vmem:[%s9919_s2 + $0xb0] sm:$0xf]  ;;  %v7373_v14 = vld [vmem:[%s9919_s2 + $0xb4] sm:$0xf0] }
 0x16c   : > { %v1197_v28 = vpop.permute.xlu2 %1196  ;;  %v1285_v30 = vpop.permute.xlu1 %1284  ;;  %v5744_v37 = vor.u32 %v7373_v14, %v5743_v35 }
 0x16d   : > { %v1292_v32 = vsel %vm1238_vm2, %v1276_v5, %v1285_v30  ;;  %1606 = vmatpush.bf16.msrb.mxu3 %v5696_v36  ;;  %v1099_v60 = vpop.f32.mrf.mxu2  ;;  %1662 = vmatpush.bf16.msrb.mxu2 %v5684_v24  ;;  %v7359_v30 = vld [vmem:[%s9919_s2 + $0x44] sm:$0xf0]  ;;  %v7354_v36 = vld [vmem:[%s9919_s2 + $0x24] sm:$0xf] }
 0x16e   : > { %v8493_v34 = vadd.f32 %v1292_v32, %v8409_v15  ;;  %v946_v63 = vpop.f32.mrf.mxu0  ;;  %v1024_v2 = vpop.f32.mrf.mxu1  ;;  %1626 = vmatpush.bf16.msrb.mxu0 %v5744_v37  ;;  %7755 = vmatpush.bf16.msrb.mxu1 %v5744_v37 }
 0x16f   : > { %v1025_v47 = vadd.f32 %v1024_v2, %v946_v63  ;;  %v5671_v63 = vld [vmem:[%s9919_s2 + $0x20] sm:$0xf]  ;;  %v5663_v2 = vld [vmem:[%s9919_s2 + $0x10] sm:$0xf] }
 0x173   : > { %v8512_v13 = vpop.f32.mrf.mxu3 }
 0x174   : > { %v1206_v39 = vpop.permute.xlu2 %1205  ;;  %v1202_v9 = vpop.permute.xlu1 %1201 }
 0x175   : > { %v1213_v10 = vsel %vm1210_vm3, %v1197_v28, %v1206_v39  ;;  %v1193_v15 = vpop.permute.xlu0 %1192  ;;  %v5687_v28 = vld [vmem:[%s9919_s2 + $0x40] sm:$0xf]  ;;  %v1022_v39 = vadd.f32 %v1021_v59, %v943_v58 }
 0x176   : > { %v1216_v40 = vadd.f32 %v1213_v10, %v1163_v38  ;;  %v1211_v43 = vsel %vm1210_vm3, %v1193_v15, %v1202_v9  ;;  %v1102_v0 = vpop.f32.mrf.mxu2  ;;  %v948_v55 = vpop.f32.mrf.mxu0  ;;  %v5688_v32 = vor.u32 %v7359_v30, %v5687_v28  ;;  %v5673_v38 = vld [vmem:[%s9919_s2 + $0x28] sm:$0xf0]  ;;  %v7351_v28 = vld [vmem:[%s9919_s2 + $0x4] sm:$0xf0] }
 0x177   : > { %v1214_v51 = vadd.f32 %v1211_v43, %v8389_v62  ;;  %v1026_v5 = vpop.f32.mrf.mxu1  ;;  %v5676_v15 = vor.u32 %v7354_v36, %v5673_v38  ;;  %v5680_v43 = vor.u32 %v7357_v42, %v5679_v41  ;;  %v5719_v42 = vld [vmem:[%s9919_s2 + $0x80] sm:$0xf] }
 0x178   : > { %1334 = vrot.lane.b32.xlu1 %v1216_v40, %s7860_s29  ;;  %1607 = vmatpush.bf16.msrb.mxu3 %v5688_v32  ;;  %v1100_v40 = vadd.f32 %v1099_v60, %v1022_v39  ;;  %v1027_v12 = vadd.f32 %v1026_v5, %v948_v55  ;;  %v5665_v5 = vld [vmem:[%s9919_s2 + $0x18] sm:$0xf0] }
 0x179   : > { %1663 = vmatpush.bf16.msrb.mxu2 %v5676_v15 }
 0x17c   : > { %v1204_v45 = vpop.permute.xlu1 %1203  ;;  %1608 = vmatpush.bf16.msrb.mxu3 %v5680_v43  ;;  %v7367_v43 = vld [vmem:[%s9919_s2 + $0x84] sm:$0xf0] }
 0x17d   : > { %v1195_v48 = vpop.permute.xlu0 %1194 }
 0x17e   : > { %v1212_v49 = vsel %vm1210_vm3, %v1195_v48, %v1204_v45  ;;  %v1104_v8 = vpop.f32.mrf.mxu2  ;;  %v8520_v7 = vpop.f32.mrf.mxu3  ;;  %v1178_v45 = vadd.f32 %v1177_v61, %v1100_v40  ;;  %v5769_v40 = vld [vmem:[%s9919_s2 + $0xe8] sm:$0xf0] }
 0x17f   : > { %v1215_v53 = vadd.f32 %v1212_v49, %v8404_v11  ;;  %v8516_v11 = vpop.f32.mrf.mxu1  ;;  %v1105_v58 = vadd.f32 %v1104_v8, %v1027_v12 }
 0x181   : > { %v7799_v56 = vpack.i.bf16 %v1215_v53, %v1214_v51  ;;  %v8514_v62 = vpop.f32.mrf.mxu0  ;;  %v1103_v53 = vadd.f32 %v1102_v0, %v1025_v47  ;;  %v1183_v8 = vadd.f32 %v8512_v13, %v1105_v58  ;;  %v5655_v13 = vld [vmem:[%s9919_s2] sm:$0xf]  ;;  %v5720_v47 = vor.u32 %v7367_v43, %v5719_v42 }
 0x182   : > { %v5656_v30 = vor.u32 %v7351_v28, %v5655_v13  ;;  %v7382_v28 = vld [vmem:[%s9919_s2 + $0x104] sm:$0xf] }
 0x183   : > { %7800 = vrot.lane.b32.xlu0 %v7799_v56, %s7860_s29  ;;  %v1181_v59 = vadd.f32 %v1180_v4, %v1103_v53  ;;  %v7352_v4 = vld [vmem:[%s9919_s2 + $0x14] sm:$0xf] }
 0x184   : > { %v5668_v19 = vor.u32 %v7352_v4, %v5665_v5  ;;  %v7368_v5 = vld [vmem:[%s9919_s2 + $0x94] sm:$0xf] }
 0x186   : > { %v8518_v17 = vpop.f32.mrf.mxu2  ;;  %v1187_v27 = vpop.f32.mrf.mxu3  ;;  %1664 = vmatpush.bf16.msrb.mxu2 %v5668_v19  ;;  %v5721_v19 = vld [vmem:[%s9919_s2 + $0x88] sm:$0xf0] }
 0x187   : > { %v1031_v26 = vpop.f32.mrf.mxu1 }
 0x189   : > { %v953_v25 = vpop.f32.mrf.mxu0 }
 0x18e   : > { %v1109_v6 = vpop.f32.mrf.mxu2 }
 0x18f   : > { %v1030_v6 = vadd.f32 %v8516_v11, %v8514_v62 }
 0x191   : > { %v1108_v35 = vadd.f32 %v8518_v17, %v1030_v6  ;;  %v7384_v6 = vld [vmem:[%s9919_s2 + $0x114] sm:$0xf] }
 0x193   : > { %v1186_v38 = vadd.f32 %v8520_v7, %v1108_v35  ;;  %v7378_v7 = vld [vmem:[%s9919_s2 + $0xe4] sm:$0xf] }
 0x1b4   : > { %v8540_v33 = vpop.permute.xlu2 %1304 }
 0x1bc   : > { %v8554_v9 = vpop.permute.xlu2 %1313  ;;  %v1301_v10 = vpop.permute.xlu0 %1300 }
 0x1bd   : > { %v1320_v36 = vsel %vm1210_vm3, %v8540_v33, %v8554_v9  ;;  %v5727_v33 = vld [vmem:[%s9919_s2 + $0x90] sm:$0xf]  ;;  %v7369_v9 = vld [vmem:[%s9919_s2 + $0x94] sm:$0xf0] }
 0x1be   : > { %v1323_v17 = vadd.f32 %v1320_v36, %v8446_v1  ;;  %v5728_v15 = vor.u32 %v7369_v9, %v5727_v33  ;;  %v5777_v1 = vld [vmem:[%s9919_s2 + $0xf8] sm:$0xf0] }
 0x1c0   : > { %v1326_v39 = vadd.f32 %v1323_v17, %v1186_v38 }
 0x1c4   : > { %v1234_v16 = vpop.permute.xlu2 %1233  ;;  %v1303_v48 = vpop.permute.xlu1 %1302 }
 0x1c5   : > { %v1241_v49 = vsel %vm1238_vm2, %v8420_v29, %v1234_v16  ;;  %v1310_v51 = vpop.permute.xlu0 %1309  ;;  %v7355_v29 = vld [vmem:[%s9919_s2 + $0x24] sm:$0xf0]  ;;  %v7376_v16 = vld [vmem:[%s9919_s2 + $0xd4] sm:$0xf] }
 0x1c6   : > { %v1244_v50 = vadd.f32 %v1241_v49, %v1178_v45  ;;  %v1318_v56 = vsel %vm1210_vm3, %v1301_v10, %v1310_v51  ;;  %v5672_v55 = vor.u32 %v7355_v29, %v5671_v63  ;;  %v7380_v10 = vld [vmem:[%s9919_s2 + $0xf4] sm:$0xf]  ;;  %v5772_v45 = vor.u32 %v7378_v7, %v5769_v40  ;;  %v5753_v51 = vld [vmem:[%s9919_s2 + $0xc8] sm:$0xf0]  ;;  %v5745_v29 = vld [vmem:[%s9919_s2 + $0xb8] sm:$0xf0] }
 0x1c7   : > { %v1321_v60 = vadd.f32 %v1318_v56, %v8473_v22  ;;  %v7353_v22 = vld [vmem:[%s9919_s2 + $0x14] sm:$0xf0]  ;;  %v5780_v41 = vor.u32 %v7380_v10, %v5777_v1  ;;  %v7372_v63 = vld [vmem:[%s9919_s2 + $0xb4] sm:$0xf] }
 0x1c8   : > { %1346 = vrot.lane.b32.xlu0 %v1244_v50, %s7861_s17  ;;  %1609 = vmatpush.bf16.msrb.mxu3 %v5672_v55  ;;  %v5664_v20 = vor.u32 %v7353_v22, %v5663_v2  ;;  %v7374_v50 = vld [vmem:[%s9919_s2 + $0xc4] sm:$0xf]  ;;  %v5748_v2 = vor.u32 %v7372_v63, %v5745_v29  ;;  %v5737_v22 = vld [vmem:[%s9919_s2 + $0xa8] sm:$0xf0]  ;;  %v275_v29 = vlaneseq }
 0x1c9   : > { %v1324_v21 = vadd.f32 %v1321_v60, %v1181_v59  ;;  %v5756_v60 = vor.u32 %v7374_v50, %v5753_v51  ;;  %v7370_v55 = vld [vmem:[%s9919_s2 + $0xa4] sm:$0xf] }
 0x1ca   : > { %v5740_v4 = vor.u32 %v7370_v55, %v5737_v22  ;;  %vm8724_vm9 = vcmp.lt.s32.totalorder %v275_v29, 242  ;;  %vm277_vm10 = vcmp.lt.s32.totalorder %v275_v29, 345  ;;  %vm1731_vm11 = vcmp.ge.s32.totalorder %v275_v29, 114 }
 0x1cb   : > { %vm1732_vm12 = vcmp.lt.s32.totalorder %v275_v29, 356  ;;  %vm1746_vm15 = vcmp.ge.s32.totalorder %v275_v29, 100  ;;  %vm1747_vm0 = vcmp.lt.s32.totalorder %v275_v29, 342 }
 0x1cc   : > { %v1312_v61 = vpop.permute.xlu1 %1311  ;;  %1610 = vmatpush.bf16.msrb.mxu3 %v5664_v20  ;;  %vm8780_vm14 = vmand %vm1731_vm11, %vm1732_vm12  ;;  %vm1790_vm11 = vcmp.ge.s32.totalorder %v275_v29, 58  ;;  %vm1791_vm12 = vcmp.lt.s32.totalorder %v275_v29, 300 }
 0x1cd   : > { %v1319_v0 = vsel %vm1210_vm3, %v1303_v48, %v1312_v61  ;;  %v1230_v24 = vpop.permute.xlu0 %1229  ;;  %v5761_v48 = vld [vmem:[%s9919_s2 + $0xd8] sm:$0xf0]  ;;  %vm1762_vm3 = vcmp.lt.s32.totalorder %v275_v29, 328 }
 0x1ce   : > { %v1322_v18 = vadd.f32 %v1319_v0, %v8493_v34  ;;  %v1239_v26 = vsel %vm1238_vm2, %v8436_v46, %v1230_v24  ;;  %v7350_v46 = vld [vmem:[%s9919_s2 + $0x4] sm:$0xf]  ;;  %v5764_v49 = vor.u32 %v7376_v16, %v5761_v48 }
 0x1cf   : > { %v1242_v62 = vadd.f32 %v1239_v26, %v8448_v3  ;;  %v5735_v3 = vld [vmem:[%s9919_s2 + $0xa0] sm:$0xf]  ;;  %v7383_v26 = vld [vmem:[%s9919_s2 + $0x104] sm:$0xf0] }
 0x1d0   : > { %v1325_v23 = vadd.f32 %v1322_v18, %v1183_v8  ;;  %1611 = vmatpush.bf16.msrb.mxu3 %v5656_v30  ;;  %v7366_v18 = vld [vmem:[%s9919_s2 + $0x84] sm:$0xf] }
 0x1d1   : > { %v5724_v20 = vor.u32 %v7366_v18, %v5721_v19 }
 0x1d2   : > { %v7809_v25 = vpack.i.bf16 %v1325_v23, %v1324_v21  ;;  %v5791_v21 = vld [vmem:[%s9919_s2 + $0x110] sm:$0xf]  ;;  %v7385_v23 = vld [vmem:[%s9919_s2 + $0x114] sm:$0xf0] }
 0x1d3   : > { %v5792_v24 = vor.u32 %v7385_v23, %v5791_v21 }
 0x1d4   : > { %v1232_v27 = vpop.permute.xlu1 %1231  ;;  %7810 = vrot.lane.b32.xlu1 %v7809_v25, %s7862_s12  ;;  %7759 = vmatpush.bf16.msra.mxu3 %v5780_v41  ;;  %v5783_v25 = vld [vmem:[%s9919_s2 + $0x100] sm:$0xf] }
 0x1d5   : > { %v1240_v34 = vsel %vm1238_vm2, %v8440_v57, %v1232_v27  ;;  %v5657_v57 = vld [vmem:[%s9919_s2 + $0x8] sm:$0xf0]  ;;  %v5793_v27 = vld [vmem:[%s9919_s2 + $0x118] sm:$0xf0]  ;;  %vm1761_vm2 = vcmp.ge.s32.totalorder %v275_v29, 86 }
 0x1d6   : > { %v1243_v11 = vadd.f32 %v1240_v34, %v8509_v54  ;;  %v5660_v32 = vor.u32 %v7350_v46, %v5657_v57  ;;  %v7371_v54 = vld [vmem:[%s9919_s2 + $0xa4] sm:$0xf0]  ;;  %v5784_v34 = vor.u32 %v7383_v26, %v5783_v25  ;;  %v5796_v13 = vor.u32 %v7384_v6, %v5793_v27  ;;  %v5785_v46 = vld [vmem:[%s9919_s2 + $0x108] sm:$0xf0] }
 0x1d7   : > { %v5736_v37 = vor.u32 %v7371_v54, %v5735_v3 }
 0x1d8   : > { %v7804_v14 = vpack.i.bf16 %v1243_v11, %v1242_v62  ;;  %1665 = vmatpush.bf16.msrb.mxu2 %v5660_v32  ;;  %7760 = vmatpush.bf16.msra.mxu3 %v5772_v45  ;;  %v5788_v62 = vor.u32 %v7382_v28, %v5785_v46 }
 0x1d9   : > { %1627 = vmatpush.bf16.msrb.mxu0 %v5736_v37  ;;  %7756 = vmatpush.bf16.msrb.mxu1 %v5736_v37 }
 0x1da   : > { %7805 = vrot.lane.b32.xlu2 %v7804_v14, %s7861_s17 }
 0x1dc   : > { %1676 = vmatpush.bf16.msra.mxu2 %v5780_v41  ;;  %7761 = vmatpush.bf16.msra.mxu3 %v5764_v49 }
 0x1dd   : > { %1628 = vmatpush.bf16.msrb.mxu0 %v5728_v15  ;;  %7757 = vmatpush.bf16.msrb.mxu1 %v5728_v15 }
 0x1e0   : > { %1677 = vmatpush.bf16.msra.mxu2 %v5772_v45  ;;  %7762 = vmatpush.bf16.msra.mxu3 %v5756_v60 }
 0x1e1   : > { %1629 = vmatpush.bf16.msrb.mxu0 %v5720_v47  ;;  %7758 = vmatpush.bf16.msrb.mxu1 %v5720_v47 }
 0x1e2   : > { %1358 = vrot.lane.b32.xlu2 %v1326_v39, %s7862_s12 }
 0x1e4   : > { %1678 = vmatpush.bf16.msra.mxu2 %v5764_v49  ;;  %7763 = vmatpush.bf16.msra.mxu3 %v5748_v2 }
 0x1e5   : > { %1646 = vmatpush.bf16.msra.mxu1 %v5792_v24  ;;  %1700 = vmatpush.bf16.msra.mxu0 %v5796_v13 }
 0x1e8   : > { %1679 = vmatpush.bf16.msra.mxu2 %v5756_v60  ;;  %7764 = vmatpush.bf16.msra.mxu3 %v5740_v4 }
 0x1e9   : > { %1647 = vmatpush.bf16.msra.mxu1 %v5784_v34  ;;  %1701 = vmatpush.bf16.msra.mxu0 %v5788_v62 }
 0x1ec   : > { %1680 = vmatpush.bf16.msra.mxu2 %v5748_v2 }
 0x1f0   : > { %1681 = vmatpush.bf16.msra.mxu2 %v5740_v4 }
 0x1f5   : > { %v8651_v12 = vpop.permute.xlu0 %7800 }
 0x1f6   : > { %v7803_v53 = vunpack.i.h.bf16 %v8651_v12  ;;  %v7802_v56 = vunpack.i.l.bf16 %v8651_v12 }
 0x1f8   : > { %v1365_v58 = vsel %vm1363_vm4, %v8382_v44, %v7803_v53  ;;  %v1364_v59 = vsel %vm1363_vm4, %v8375_v31, %v7802_v56  ;;  %v1335_v44 = vpop.permute.xlu1 %1334 }
 0x1f9   : > { %v1375_v61 = vpack.c.bf16 %v1365_v58, %v1364_v59  ;;  %v1366_v31 = vsel %vm1363_vm4, %v8384_v52, %v1335_v44  ;;  %v5729_v52 = vld [vmem:[%s9919_s2 + $0x98] sm:$0xf0] }
 0x1fa   : > { %v1378_v0 = vpack.c.bf16 %v1366_v31, %v1366_v31  ;;  %v5732_v8 = vor.u32 %v7368_v5, %v5729_v52 }
 0x1fb   : > { %1612 = vmatmul.bf16.vlgmr.msrb.gmra.mxu3 %v1375_v61  ;;  %1666 = vmatmul.bf16.vlgmr.msrb.gmra.mxu2 %v1375_v61 }
 0x1fc   : > { %7765 = vmatpush.bf16.msra.mxu3 %v5732_v8  ;;  %1682 = vmatpush.bf16.msra.mxu2 %v5732_v8 }
 0x200   : > { %7766 = vmatpush.bf16.msra.mxu3 %v5724_v20  ;;  %1683 = vmatpush.bf16.msra.mxu2 %v5724_v20 }
 0x20b   : > { %1617 = vmatmul.bf16.gmra.mxu3 %v1378_v0  ;;  %1671 = vmatmul.bf16.gmra.mxu2 %v1378_v0 }
 0x234   : > { %v7806_v11 = vpop.permute.xlu2 %7805 }
 0x235   : > { %v7808_v36 = vunpack.i.h.bf16 %v7806_v11  ;;  %v7807_v3 = vunpack.i.l.bf16 %v7806_v11 }
 0x237   : > { %v1368_v38 = vsel %vm1367_vm5, %v7802_v56, %v7807_v3  ;;  %v1369_v39 = vsel %vm1367_vm5, %v7803_v53, %v7808_v36 }
 0x23a   : > { %v1347_v30 = vpop.permute.xlu0 %1346 }
 0x23b   : > { %v1370_v57 = vsel %vm1367_vm5, %v1335_v44, %v1347_v30  ;;  %vm1758_vm5 = vcmask 703488  }
 0x23c   : > { %v1359_v32 = vpop.permute.xlu2 %1358 }
 0x23d   : > { %v1374_v35 = vsel %vm1371_vm6, %v1370_v57, %v1359_v32  ;;  %v1380_v1 = vpack.c.bf16 %v1359_v32, %v1359_v32 }
 0x23e   : > { %v1379_v14 = vpack.c.bf16 %v1374_v35, %v1374_v35 }
 0x240   : > { %1635 = vmatmul.bf16.vlgmr.msrb.gmra.mxu1 %v1379_v14  ;;  %1689 = vmatmul.bf16.vlgmr.msra.gmra.mxu3 %v1379_v14 }
 0x246   : > { %v7811_v54 = vpop.permute.xlu1 %7810 }
 0x247   : > { %v7813_v37 = vunpack.i.h.bf16 %v7811_v54  ;;  %v7812_v17 = vunpack.i.l.bf16 %v7811_v54 }
 0x249   : > { %v1372_v33 = vsel %vm1371_vm6, %v1368_v38, %v7812_v17  ;;  %v1373_v9 = vsel %vm1371_vm6, %v1369_v39, %v7813_v37  ;;  %v1377_v15 = vpack.c.bf16 %v7813_v37, %v7812_v17  ;;  %v7868_v37 = vmov 0.0   ;;  %vm8793_vm6 = vmand %vm1746_vm15, %vm1747_vm0 }
 0x24a   : > { %v1376_v10 = vpack.c.bf16 %v1373_v9, %v1372_v33  ;;  %279 = vst.msk [vmem:[#allocation3] sm:$0x7] %vm277_vm10, %v7868_v37  ;;  %vm1787_vm15 = vcmask 474112   ;;  %vm8828_vm0 = vmand %vm1790_vm11, %vm1791_vm12  ;;  %vm1820_vm11 = vcmp.ge.s32.totalorder %v275_v29, 30 }
 0x24c   : > { %1630 = vmatmul.bf16.vlgmr.msrb.gmra.mxu0 %v1376_v10  ;;  %1684 = vmatmul.bf16.vlgmr.msra.gmra.mxu2 %v1376_v10 }
 0x250   : > { %5797 = vmatmul.msk.bf16.vlgmr.msra.gmra.mxu1 %vm1597_vm7, %v1377_v15 }
 0x25c   : > { %5799 = vmatmul.msk.bf16.vlgmr.msra.gmra.mxu0 %vm1597_vm7, %v1377_v15 }
 0x260   : > { %5798 = vmatmul.msk.bf16.gmra.mxu1 %vm1597_vm7, %v1380_v1 }
 0x26c   : > { %5800 = vmatmul.msk.bf16.gmra.mxu0 %vm1597_vm7, %v1380_v1  ;;  %vm8800_vm7 = vmand %vm1761_vm2, %vm1762_vm3  ;;  %vm1805_vm2 = vcmp.ge.s32.totalorder %v275_v29, 44  ;;  %vm1806_vm3 = vcmp.lt.s32.totalorder %v275_v29, 286 }
 0x27e   : > { %v1613_v7 = vpop.f32.mrf.mxu3  ;;  %v1667_v40 = vpop.f32.mrf.mxu2 }
 0x286   : > { %v1615_v41 = vpop.f32.mrf.mxu3  ;;  %v1669_v42 = vpop.f32.mrf.mxu2 }
 0x28e   : > { %v1618_v43 = vpop.f32.mrf.mxu3  ;;  %v1672_v45 = vpop.f32.mrf.mxu2 }
 0x296   : > { %v1620_v47 = vpop.f32.mrf.mxu3  ;;  %v1674_v16 = vpop.f32.mrf.mxu2 }
 0x2bd   : > { %v1636_v48 = vpop.f32.mrf.mxu1 }
 0x2be   : > { %v1637_v6 = vadd.f32 %v1636_v48, %v1618_v43 }
 0x2c3   : > { %v1690_v49 = vpop.f32.mrf.mxu3 }
 0x2c4   : > { %v1691_v25 = vadd.f32 %v1690_v49, %v1672_v45 }
 0x2c5   : > { %v1638_v12 = vpop.f32.mrf.mxu1 }
 0x2c9   : > { %v1631_v50 = vpop.f32.mrf.mxu0 }
 0x2ca   : > { %v1632_v53 = vadd.f32 %v1631_v50, %v1613_v7 }
 0x2cb   : > { %v1692_v51 = vpop.f32.mrf.mxu3 }
 0x2cd   : > { %v1649_v56 = vpop.f32.mrf.mxu1 }
 0x2ce   : > { %v1650_v58 = vadd.f32 %v1649_v56, %v1632_v53 }
 0x2cf   : > { %v1685_v60 = vpop.f32.mrf.mxu2 }
 0x2d0   : > { %1721 = vst [vmem:[#allocation1] sm:$0xff] %v1650_v58  ;;  %v1686_v63 = vadd.f32 %v1685_v60, %v1667_v40 }
 0x2d1   : > { %v1633_v59 = vpop.f32.mrf.mxu0 }
 0x2d2   : > { %v1634_v8 = vadd.f32 %v1633_v59, %v1615_v41 }
 0x2d5   : > { %v1651_v61 = vpop.f32.mrf.mxu1 }
 0x2d6   : > { %v8733_v20 = vadd.f32 %v1651_v61, %v1634_v8 }
 0x2d7   : > { %v1687_v55 = vpop.f32.mrf.mxu2 }
 0x2d8   : > { %v1688_v5 = vadd.f32 %v1687_v55, %v1669_v42 }
 0x2d9   : > { %v1703_v2 = vpop.f32.mrf.mxu0 }
 0x2da   : > { %v1704_v44 = vadd.f32 %v1703_v2, %v1686_v63 }
 0x2dc   : > { %1722 = vst [vmem:[#allocation1 + $0x9] sm:$0xff] %v1704_v44  ;;  %v1714_v31 = vrot.slane %v1704_v44, 7 }
 0x2dd   : > { %v1654_v22 = vpop.f32.mrf.mxu1 }
 0x2de   : > { %v1716_v4 = vsel %vm1715_vm8, %v1650_v58, %v1714_v31  ;;  %v8743_v13 = vadd.f32 %v1654_v22, %v1637_v6 }
 0x2df   : > { %1720 = vst.msk [vmem:[#allocation2] ss:$4 sm:$0x3] %vm8724_vm9, %v1716_v4 }
 0x2e1   : > { %v1705_v52 = vpop.f32.mrf.mxu0 }
 0x2e2   : > { %v8731_v18 = vadd.f32 %v1705_v52, %v1688_v5 }
 0x2e3   : > { %v1724_v19 = vld [vmem:[#allocation1 + $0x1] ss:$9 sm:$0xff] }
 0x2e4   : > { %1736 = vst [vmem:[#allocation1] sm:$0xff] %v1650_v58  ;;  %1725 = vrot.lane.b32.xlu0 %v1724_v19, %s7863_s18  ;;  %v1827_v21 = vrot.slane %v8731_v18, 7 }
 0x2e5   : > { %1737 = vst [vmem:[#allocation1 + $0x9] sm:$0xff] %v1704_v44  ;;  %v1656_v23 = vpop.f32.mrf.mxu1 }
 0x2e6   : > { %v1828_v24 = vsel %vm1715_vm8, %v8733_v20, %v1827_v21 }
 0x2e7   : > { %1831 = vst.msk [vmem:[#allocation2 + $0x1] ss:$4 sm:$0x3] %vm8724_vm9, %v1828_v24 }
 0x2e9   : > { %v1708_v26 = vpop.f32.mrf.mxu0 }
 0x2ea   : > { %v8741_v27 = vadd.f32 %v1708_v26, %v1691_v25 }
 0x2ec   : > { %v1739_v34 = vld [vmem:[#allocation1 + $0x2] ss:$9 sm:$0xff]  ;;  %v1911_v28 = vrot.slane %v8741_v27, 7 }
 0x2ed   : > { %1751 = vst [vmem:[#allocation1] sm:$0xff] %v1650_v58  ;;  %1740 = vrot.lane.b32.xlu1 %v1739_v34, %s7864_s8 }
 0x2ee   : > { %1752 = vst [vmem:[#allocation1 + $0x9] sm:$0xff] %v1704_v44  ;;  %v1912_v46 = vsel %vm1715_vm8, %v8743_v13, %v1911_v28  ;;  %vm1775_vm8 = vcmp.ge.s32.totalorder %v275_v29, 72 }
 0x2ef   : > { %1915 = vst.msk [vmem:[#allocation2 + $0x2] ss:$4 sm:$0x3] %vm8724_vm9, %v1912_v46  ;;  %vm1776_vm9 = vcmp.lt.s32.totalorder %v275_v29, 314 }
 0x2f0   : > { %vm8815_vm10 = vmand %vm1775_vm8, %vm1776_vm9  ;;  %vm1802_vm8 = vcmask 359424  }
 0x2f1   : > { %v1710_v62 = vpop.f32.mrf.mxu0  ;;  %vm8845_vm9 = vmand %vm1805_vm2, %vm1806_vm3 }
 0x2f5   : > { %v1754_v11 = vld [vmem:[#allocation1 + $0x3] ss:$9 sm:$0xff] }
 0x2f6   : > { %1766 = vst [vmem:[#allocation1] sm:$0xff] %v1650_v58  ;;  %1755 = vrot.lane.b32.xlu2 %v1754_v11, %s7865_s28 }
 0x2f7   : > { %1767 = vst [vmem:[#allocation1 + $0x9] sm:$0xff] %v1704_v44 }
 0x2fe   : > { %v1769_v30 = vld [vmem:[#allocation1 + $0x4] ss:$9 sm:$0xff] }
 0x2ff   : > { %1780 = vst [vmem:[#allocation1] sm:$0xff] %v1650_v58  ;;  %1770 = vrot.lane.b32.xlu0 %v1769_v30, %s7860_s29 }
 0x300   : > { %1781 = vst [vmem:[#allocation1 + $0x9] sm:$0xff] %v1704_v44 }
 0x307   : > { %v1783_v57 = vld [vmem:[#allocation1 + $0x5] ss:$9 sm:$0xff] }
 0x308   : > { %1795 = vst [vmem:[#allocation1] sm:$0xff] %v1650_v58  ;;  %1784 = vrot.lane.b32.xlu1 %v1783_v57, %s7866_s9 }
 0x309   : > { %1796 = vst [vmem:[#allocation1 + $0x9] sm:$0xff] %v1704_v44 }
 0x310   : > { %v1798_v32 = vld [vmem:[#allocation1 + $0x6] ss:$9 sm:$0xff] }
 0x311   : > { %1810 = vst [vmem:[#allocation1] sm:$0xff] %v1650_v58  ;;  %1799 = vrot.lane.b32.xlu0 %v1798_v32, %s7867_s10 }
 0x312   : > { %1811 = vst [vmem:[#allocation1 + $0x9] sm:$0xff] %v1704_v44 }
 0x319   : > { %v8755_v35 = vld [vmem:[#allocation1 + $0x7] ss:$9 sm:$0xff] }
 0x31a   : > { %1832 = vst [vmem:[#allocation1] sm:$0xff] %v8733_v20 }
 0x31b   : > { %1833 = vst [vmem:[#allocation1 + $0x9] sm:$0xff] %v8731_v18 }
 0x322   : > { %v1835_v14 = vld [vmem:[#allocation1 + $0x1] ss:$9 sm:$0xff] }
 0x323   : > { %1843 = vst [vmem:[#allocation1] sm:$0xff] %v8733_v20  ;;  %1836 = vrot.lane.b32.xlu2 %v1835_v14, %s7863_s18 }
 0x324   : > { %1844 = vst [vmem:[#allocation1 + $0x9] sm:$0xff] %v8731_v18 }
 0x32b   : > { %v1846_v36 = vld [vmem:[#allocation1 + $0x2] ss:$9 sm:$0xff] }
 0x32c   : > { %1854 = vst [vmem:[#allocation1] sm:$0xff] %v8733_v20  ;;  %1847 = vrot.lane.b32.xlu1 %v1846_v36, %s7864_s8 }
 0x32d   : > { %1855 = vst [vmem:[#allocation1 + $0x9] sm:$0xff] %v8731_v18 }
 0x334   : > { %v1857_v3 = vld [vmem:[#allocation1 + $0x3] ss:$9 sm:$0xff] }
 0x335   : > { %1865 = vst [vmem:[#allocation1] sm:$0xff] %v8733_v20  ;;  %1858 = vrot.lane.b32.xlu0 %v1857_v3, %s7865_s28 }
 0x336   : > { %1866 = vst [vmem:[#allocation1 + $0x9] sm:$0xff] %v8731_v18 }
 0x33d   : > { %v1868_v54 = vld [vmem:[#allocation1 + $0x4] ss:$9 sm:$0xff] }
 0x33e   : > { %1877 = vst [vmem:[#allocation1 + $0x9] sm:$0xff] %v8731_v18  ;;  %1869 = vrot.lane.b32.xlu2 %v1868_v54, %s7860_s29 }
 0x33f   : > { %1876 = vst [vmem:[#allocation1] sm:$0xff] %v8733_v20 }
 0x346   : > { %v1879_v17 = vld [vmem:[#allocation1 + $0x5] ss:$9 sm:$0xff] }
 0x347   : > { %1880 = vrot.lane.b32.xlu1 %v1879_v17, %s7866_s9  ;;  %1887 = vst [vmem:[#allocation1] sm:$0xff] %v8733_v20 }
 0x348   : > { %1888 = vst [vmem:[#allocation1 + $0x9] sm:$0xff] %v8731_v18 }
 0x34f   : > { %v1890_v38 = vld [vmem:[#allocation1 + $0x6] ss:$9 sm:$0xff] }
 0x350   : > { %1891 = vrot.lane.b32.xlu1 %v1890_v38, %s7867_s10  ;;  %1898 = vst [vmem:[#allocation1] sm:$0xff] %v8733_v20  ;;  %v1756_v1 = vpop.permute.xlu2 %1755 }
 0x351   : > { %1899 = vst [vmem:[#allocation1 + $0x9] sm:$0xff] %v8731_v18  ;;  %v1757_v40 = vrot.slane %v1756_v1, 7 }
 0x353   : > { %v1759_v16 = vsel %vm1758_vm5, %v1757_v40, %v1756_v1 }
 0x356   : > { %v1726_v39 = vpop.permute.xlu0 %1725 }
 0x357   : > { %v1727_v33 = vrot.slane %v1726_v39, 7 }
 0x358   : > { %v1901_v9 = vld [vmem:[#allocation1 + $0x7] ss:$9 sm:$0xff] }
 0x359   : > { %1916 = vst [vmem:[#allocation1] sm:$0xff] %v8743_v13  ;;  %v1729_v15 = vsel %vm1728_vm13, %v1727_v33, %v1726_v39 }
 0x35a   : > { %1917 = vst [vmem:[#allocation1 + $0x9] sm:$0xff] %v8741_v27 }
 0x35b   : > { %1735 = vst.msk [vmem:[#allocation2 + $0x4] ss:$4 sm:$0x7] %vm8780_vm14, %v1729_v15 }
 0x35f   : > { %v1741_v7 = vpop.permute.xlu1 %1740 }
 0x360   : > { %v1742_v41 = vrot.slane %v1741_v7, 7 }
 0x361   : > { %v1919_v42 = vld [vmem:[#allocation1 + $0x1] ss:$9 sm:$0xff] }
 0x362   : > { %1920 = vrot.lane.b32.xlu0 %v1919_v42, %s7863_s18  ;;  %1927 = vst [vmem:[#allocation1] sm:$0xff] %v8743_v13  ;;  %v1744_v45 = vsel %vm1743_vm1, %v1742_v41, %v1741_v7 }
 0x363   : > { %1928 = vst [vmem:[#allocation1 + $0x9] sm:$0xff] %v8741_v27 }
 0x364   : > { %1750 = vst.msk [vmem:[#allocation2 + $0xc] ss:$4 sm:$0x7] %vm8793_vm6, %v1744_v45 }
 0x365   : > { %1765 = vst.msk [vmem:[#allocation2 + $0x14] ss:$4 sm:$0x7] %vm8800_vm7, %v1759_v16 }
 0x36a   : > { %v1930_v48 = vld [vmem:[#allocation1 + $0x2] ss:$9 sm:$0xff] }
 0x36b   : > { %1931 = vrot.lane.b32.xlu2 %v1930_v48, %s7864_s8  ;;  %1938 = vst [vmem:[#allocation1] sm:$0xff] %v8743_v13 }
 0x36c   : > { %1939 = vst [vmem:[#allocation1 + $0x9] sm:$0xff] %v8741_v27 }
 0x371   : > { %v1771_v49 = vpop.permute.xlu0 %1770 }
 0x372   : > { %v1772_v12 = vrot.slane %v1771_v49, 7 }
 0x373   : > { %v1941_v50 = vld [vmem:[#allocation1 + $0x3] ss:$9 sm:$0xff] }
 0x374   : > { %1942 = vrot.lane.b32.xlu1 %v1941_v50, %s7865_s28  ;;  %1949 = vst [vmem:[#allocation1] sm:$0xff] %v8743_v13  ;;  %v1773_v53 = vsel %vm1363_vm4, %v1772_v12, %v1771_v49 }
 0x375   : > { %1950 = vst [vmem:[#allocation1 + $0x9] sm:$0xff] %v8741_v27 }
 0x376   : > { %1779 = vst.msk [vmem:[#allocation2 + $0x1c] ss:$4 sm:$0x7] %vm8815_vm10, %v1773_v53 }
 0x37a   : > { %v1785_v56 = vpop.permute.xlu1 %1784 }
 0x37b   : > { %v1786_v58 = vrot.slane %v1785_v56, 7 }
 0x37c   : > { %1902 = vrot.lane.b32.xlu1 %v1901_v9, %s7869_s11  ;;  %v1952_v59 = vld [vmem:[#allocation1 + $0x4] ss:$9 sm:$0xff] }
 0x37d   : > { %1953 = vrot.lane.b32.xlu0 %v1952_v59, %s7860_s29  ;;  %1960 = vst [vmem:[#allocation1] sm:$0xff] %v8743_v13  ;;  %v1788_v61 = vsel %vm1787_vm15, %v1786_v58, %v1785_v56  ;;  %v1837_v63 = vpop.permute.xlu2 %1836 }
 0x37e   : > { %1961 = vst [vmem:[#allocation1 + $0x9] sm:$0xff] %v8741_v27  ;;  %v1838_v2 = vrot.slane %v1837_v63, 7 }
 0x37f   : > { %1794 = vst.msk [vmem:[#allocation2 + $0x24] ss:$4 sm:$0x7] %vm8828_vm0, %v1788_v61 }
 0x380   : > { %v1839_v44 = vsel %vm1728_vm13, %v1838_v2, %v1837_v63 }
 0x381   : > { %1842 = vst.msk [vmem:[#allocation2 + $0x5] ss:$4 sm:$0x7] %vm8780_vm14, %v1839_v44 }
 0x383   : > { %v1800_v31 = vpop.permute.xlu0 %1799 }
 0x384   : > { %v1801_v0 = vrot.slane %v1800_v31, 7 }
 0x385   : > { %1814 = vrot.lane.b32.xlu0 %v8755_v35, %s7869_s11  ;;  %v1963_v55 = vld [vmem:[#allocation1 + $0x5] ss:$9 sm:$0xff] }
 0x386   : > { %1964 = vrot.lane.b32.xlu2 %v1963_v55, %s7866_s9  ;;  %1971 = vst [vmem:[#allocation1] sm:$0xff] %v8743_v13  ;;  %v1803_v4 = vsel %vm1802_vm8, %v1801_v0, %v1800_v31 }
 0x387   : > { %1972 = vst [vmem:[#allocation1 + $0x9] sm:$0xff] %v8741_v27 }
 0x388   : > { %1809 = vst.msk [vmem:[#allocation2 + $0x2c] ss:$4 sm:$0x7] %vm8845_vm9, %v1803_v4 }
 0x38e   : > { %v1974_v5 = vld [vmem:[#allocation1 + $0x6] ss:$9 sm:$0xff] }
 0x38f   : > { %1975 = vrot.lane.b32.xlu2 %v1974_v5, %s7867_s10  ;;  %1982 = vst [vmem:[#allocation1] sm:$0xff] %v8743_v13 }
 0x390   : > { %1983 = vst [vmem:[#allocation1 + $0x9] sm:$0xff] %v8741_v27 }
 0x397   : > { %v1985_v52 = vld [vmem:[#allocation1 + $0x7] ss:$9 sm:$0xff] }
 0x398   : > { %1986 = vrot.lane.b32.xlu2 %v1985_v52, %s7869_s11  ;;  %v1870_v20 = vpop.permute.xlu2 %1869 }
 0x399   : > { %v1871_v21 = vrot.slane %v1870_v20, 7 }
 0x39b   : > { %v1872_v26 = vsel %vm1363_vm4, %v1871_v21, %v1870_v20 }
 0x39e   : > { %v1848_v8 = vpop.permute.xlu1 %1847 }
 0x39f   : > { %v1849_v18 = vrot.slane %v1848_v8, 7 }
 0x3a1   : > { %v1850_v19 = vsel %vm1743_vm1, %v1849_v18, %v1848_v8 }
 0x3a2   : > { %1853 = vst.msk [vmem:[#allocation2 + $0xd] ss:$4 sm:$0x7] %vm8793_vm6, %v1850_v19 }
 0x3a7   : > { %v1859_v23 = vpop.permute.xlu0 %1858 }
 0x3a8   : > { %v1860_v24 = vrot.slane %v1859_v23, 7 }
 0x3aa   : > { %v1861_v25 = vsel %vm1758_vm5, %v1860_v24, %v1859_v23 }
 0x3ab   : > { %1864 = vst.msk [vmem:[#allocation2 + $0x15] ss:$4 sm:$0x7] %vm8800_vm7, %v1861_v25 }
 0x3ac   : > { %1875 = vst.msk [vmem:[#allocation2 + $0x1d] ss:$4 sm:$0x7] %vm8815_vm10, %v1872_v26 }
 0x3b9   : > { %v1881_v6 = vpop.permute.xlu1 %1880 }
 0x3ba   : > { %v1882_v27 = vrot.slane %v1881_v6, 7 }
 0x3bc   : > { %v1883_v34 = vsel %vm1787_vm15, %v1882_v27, %v1881_v6 }
 0x3bd   : > { %1886 = vst.msk [vmem:[#allocation2 + $0x25] ss:$4 sm:$0x7] %vm8828_vm0, %v1883_v34 }
 0x3c2   : > { %v1892_v13 = vpop.permute.xlu1 %1891 }
 0x3c3   : > { %v1893_v28 = vrot.slane %v1892_v13, 7 }
 0x3c5   : > { %v1894_v46 = vsel %vm1802_vm8, %v1893_v28, %v1892_v13  ;;  %v1932_v62 = vpop.permute.xlu2 %1931 }
 0x3c6   : > { %1897 = vst.msk [vmem:[#allocation2 + $0x2d] ss:$4 sm:$0x7] %vm8845_vm9, %v1894_v46  ;;  %v1933_v11 = vrot.slane %v1932_v62, 7 }
 0x3c8   : > { %v1934_v35 = vsel %vm1743_vm1, %v1933_v11, %v1932_v62  ;;  %vm1817_vm1 = vcmask 244736  }
 0x3d4   : > { %v1921_v30 = vpop.permute.xlu0 %1920 }
 0x3d5   : > { %v1922_v57 = vrot.slane %v1921_v30, 7 }
 0x3d7   : > { %v1923_v32 = vsel %vm1728_vm13, %v1922_v57, %v1921_v30  ;;  %vm1821_vm13 = vcmp.lt.s32.totalorder %v275_v29, 272 }
 0x3d8   : > { %1926 = vst.msk [vmem:[#allocation2 + $0x6] ss:$4 sm:$0x7] %vm8780_vm14, %v1923_v32  ;;  %vm8885_vm14 = vmand %vm1820_vm11, %vm1821_vm13 }
 0x3d9   : > { %1937 = vst.msk [vmem:[#allocation2 + $0xe] ss:$4 sm:$0x7] %vm8793_vm6, %v1934_v35 }
 0x3e0   : > { %v1965_v14 = vpop.permute.xlu2 %1964 }
 0x3e1   : > { %v1966_v38 = vrot.slane %v1965_v14, 7 }
 0x3e3   : > { %v1967_v29 = vsel %vm1787_vm15, %v1966_v38, %v1965_v14 }
 0x3e6   : > { %v1943_v36 = vpop.permute.xlu1 %1942 }
 0x3e7   : > { %v1944_v3 = vrot.slane %v1943_v36, 7 }
 0x3e9   : > { %v1945_v54 = vsel %vm1758_vm5, %v1944_v3, %v1943_v36  ;;  %v1976_v37 = vpop.permute.xlu2 %1975 }
 0x3ea   : > { %1948 = vst.msk [vmem:[#allocation2 + $0x16] ss:$4 sm:$0x7] %vm8800_vm7, %v1945_v54  ;;  %v1977_v10 = vrot.slane %v1976_v37, 7 }
 0x3ec   : > { %v1978_v42 = vsel %vm1802_vm8, %v1977_v10, %v1976_v37 }
 0x3ee   : > { %v1903_v17 = vpop.permute.xlu1 %1902 }
 0x3ef   : > { %v1904_v33 = vrot.slane %v1903_v17, 7  ;;  %v1954_v9 = vpop.permute.xlu0 %1953 }
 0x3f0   : > { %v1955_v15 = vrot.slane %v1954_v9, 7 }
 0x3f1   : > { %v1905_v1 = vsel %vm1817_vm1, %v1904_v33, %v1903_v17 }
 0x3f2   : > { %1908 = vst.msk [vmem:[#allocation2 + $0x35] ss:$4 sm:$0x7] %vm8885_vm14, %v1905_v1  ;;  %v1956_v7 = vsel %vm1363_vm4, %v1955_v15, %v1954_v9  ;;  %v1987_v40 = vpop.permute.xlu2 %1986 }
 0x3f3   : > { %1959 = vst.msk [vmem:[#allocation2 + $0x1e] ss:$4 sm:$0x7] %vm8815_vm10, %v1956_v7  ;;  %v1988_v41 = vrot.slane %v1987_v40, 7 }
 0x3f4   : > { %1970 = vst.msk [vmem:[#allocation2 + $0x26] ss:$4 sm:$0x7] %vm8828_vm0, %v1967_v29 }
 0x3f5   : > { %1981 = vst.msk [vmem:[#allocation2 + $0x2e] ss:$4 sm:$0x7] %vm8845_vm9, %v1978_v42  ;;  %v1989_v43 = vsel %vm1817_vm1, %v1988_v41, %v1987_v40 }
 0x3f6   : > { %1992 = vst.msk [vmem:[#allocation2 + $0x36] ss:$4 sm:$0x7] %vm8885_vm14, %v1989_v43 }
 0x3f7   : > { %v1815_v45 = vpop.permute.xlu0 %1814 }
 0x3f8   : > { %v1816_v47 = vrot.slane %v1815_v45, 7 }
 0x3fa   : > { %v1818_v16 = vsel %vm1817_vm1, %v1816_v47, %v1815_v45 }
 0x3fb   : > { %1824 = vst.msk [vmem:[#allocation2 + $0x34] ss:$4 sm:$0x7] %vm8885_vm14, %v1818_v16 }
 0x3fc PF: > { %v5892_v48 = vld [vmem:[%s7925_s30 + $0xa8] sm:$0xf]  ;;  %v7410_v49 = vld [vmem:[%s7925_s30 + $0xb0] sm:$0xf0]  ;;  %v5880_v63 = vld [vmem:[%s7925_s30 + $0x90] sm:$0xf] }
 0x3fd   : > { %v6084_v12 = vld [vmem:[%s7925_s30 + $0x228] sm:$0xf]  ;;  %v5893_v50 = vor.u32 %v7410_v49, %v5892_v48  ;;  %v7458_v51 = vld [vmem:[%s7925_s30 + $0x230] sm:$0xf0]  ;;  %v7407_v44 = vld [vmem:[%s7925_s30 + $0x98] sm:$0xf0] }
 0x3fe   : > { %v6180_v53 = vld [vmem:[%s7925_s30 + $0x2e8] sm:$0xf]  ;;  %v7482_v56 = vld [vmem:[%s7925_s30 + $0x2f0] sm:$0xf0]  ;;  %v6085_v58 = vor.u32 %v7458_v51, %v6084_v12  ;;  %v6072_v31 = vld [vmem:[%s7925_s30 + $0x210] sm:$0xf]  ;;  %v5881_v55 = vor.u32 %v7407_v44, %v5880_v63 }
 0x3ff   : > { %v6181_v59 = vor.u32 %v7482_v56, %v6180_v53  ;;  %v5988_v60 = vld [vmem:[%s7925_s30 + $0x168] sm:$0xf]  ;;  %v7434_v61 = vld [vmem:[%s7925_s30 + $0x170] sm:$0xf0]  ;;  %4482 = vmatpush.bf16.msra.mxu0 %v5893_v50  ;;  %v7455_v0 = vld [vmem:[%s7925_s30 + $0x218] sm:$0xf0] }
 0x400   : > { %v5989_v2 = vor.u32 %v7434_v61, %v5988_v60  ;;  %4508 = vmatpush.bf16.msra.mxu2 %v6085_v58  ;;  %v6073_v22 = vor.u32 %v7455_v0, %v6072_v31  ;;  %v6168_v4 = vld [vmem:[%s7925_s30 + $0x2d0] sm:$0xf]  ;;  %v7479_v5 = vld [vmem:[%s7925_s30 + $0x2d8] sm:$0xf0]  ;;  %v5868_v19 = vld [vmem:[%s7925_s30 + $0x78] sm:$0xf] }
 0x401   : > { %4521 = vmatpush.bf16.msra.mxu3 %v6181_v59  ;;  %v5976_v52 = vld [vmem:[%s7925_s30 + $0x150] sm:$0xf]  ;;  %v6169_v8 = vor.u32 %v7479_v5, %v6168_v4  ;;  %v7431_v18 = vld [vmem:[%s7925_s30 + $0x158] sm:$0xf0]  ;;  %v7404_v20 = vld [vmem:[%s7925_s30 + $0x80] sm:$0xf0] }
 0x402   : > { %4495 = vmatpush.bf16.msra.mxu1 %v5989_v2  ;;  %v5977_v21 = vor.u32 %v7431_v18, %v5976_v52  ;;  %v6060_v23 = vld [vmem:[%s7925_s30 + $0x1f8] sm:$0xf]  ;;  %v7452_v24 = vld [vmem:[%s7925_s30 + $0x200] sm:$0xf0]  ;;  %v5869_v26 = vor.u32 %v7404_v20, %v5868_v19  ;;  %v5856_v46 = vld [vmem:[%s7925_s30 + $0x60] sm:$0xf] }
 0x403   : > { %v6156_v25 = vld [vmem:[%s7925_s30 + $0x2b8] sm:$0xf]  ;;  %4483 = vmatpush.bf16.msra.mxu0 %v5881_v55  ;;  %v7476_v6 = vld [vmem:[%s7925_s30 + $0x2c0] sm:$0xf0]  ;;  %v6061_v13 = vor.u32 %v7452_v24, %v6060_v23  ;;  %v7401_v62 = vld [vmem:[%s7925_s30 + $0x68] sm:$0xf0] }
 0x404   : > { %v5964_v27 = vld [vmem:[%s7925_s30 + $0x138] sm:$0xf]  ;;  %v7428_v34 = vld [vmem:[%s7925_s30 + $0x140] sm:$0xf0]  ;;  %4509 = vmatpush.bf16.msra.mxu2 %v6073_v22  ;;  %v6157_v28 = vor.u32 %v7476_v6, %v6156_v25  ;;  %v6048_v11 = vld [vmem:[%s7925_s30 + $0x1e0] sm:$0xf]  ;;  %v5857_v3 = vor.u32 %v7401_v62, %v5856_v46 }
 0x405   : > { %4522 = vmatpush.bf16.msra.mxu3 %v6169_v8  ;;  %v5965_v30 = vor.u32 %v7428_v34, %v5964_v27  ;;  %v7449_v57 = vld [vmem:[%s7925_s30 + $0x1e8] sm:$0xf0]  ;;  %v6144_v32 = vld [vmem:[%s7925_s30 + $0x2a0] sm:$0xf]  ;;  %v5844_v17 = vld [vmem:[%s7925_s30 + $0x48] sm:$0xf] }
 0x406   : > { %4496 = vmatpush.bf16.msra.mxu1 %v5977_v21  ;;  %v7473_v35 = vld [vmem:[%s7925_s30 + $0x2a8] sm:$0xf0]  ;;  %v5952_v14 = vld [vmem:[%s7925_s30 + $0x120] sm:$0xf]  ;;  %v6049_v54 = vor.u32 %v7449_v57, %v6048_v11  ;;  %v7398_v38 = vld [vmem:[%s7925_s30 + $0x50] sm:$0xf0] }
 0x407   : > { %v7425_v36 = vld [vmem:[%s7925_s30 + $0x128] sm:$0xf0]  ;;  %4484 = vmatpush.bf16.msra.mxu0 %v5869_v26  ;;  %v6145_v37 = vor.u32 %v7473_v35, %v6144_v32  ;;  %v6036_v39 = vld [vmem:[%s7925_s30 + $0x1c8] sm:$0xf]  ;;  %v7446_v9 = vld [vmem:[%s7925_s30 + $0x1d0] sm:$0xf0]  ;;  %v5845_v40 = vor.u32 %v7398_v38, %v5844_v17 }
 0x408   : > { %4510 = vmatpush.bf16.msra.mxu2 %v6061_v13  ;;  %v5953_v33 = vor.u32 %v7425_v36, %v5952_v14  ;;  %v6132_v10 = vld [vmem:[%s7925_s30 + $0x288] sm:$0xf]  ;;  %v7470_v15 = vld [vmem:[%s7925_s30 + $0x290] sm:$0xf0]  ;;  %v6037_v29 = vor.u32 %v7446_v9, %v6036_v39  ;;  %v5832_v42 = vld [vmem:[%s7925_s30 + $0x30] sm:$0xf] }
 0x409   : > { %4523 = vmatpush.bf16.msra.mxu3 %v6157_v28  ;;  %v5940_v1 = vld [vmem:[%s7925_s30 + $0x108] sm:$0xf]  ;;  %v7422_v7 = vld [vmem:[%s7925_s30 + $0x110] sm:$0xf0]  ;;  %v6133_v41 = vor.u32 %v7470_v15, %v6132_v10  ;;  %v7395_v43 = vld [vmem:[%s7925_s30 + $0x38] sm:$0xf0] }
 0x40a   : > { %4497 = vmatpush.bf16.msra.mxu1 %v5965_v30  ;;  %v6024_v45 = vld [vmem:[%s7925_s30 + $0x1b0] sm:$0xf]  ;;  %v5941_v47 = vor.u32 %v7422_v7, %v5940_v1  ;;  %v7443_v16 = vld [vmem:[%s7925_s30 + $0x1b8] sm:$0xf0]  ;;  %v5833_v51 = vor.u32 %v7395_v43, %v5832_v42  ;;  %v5820_v58 = vld [vmem:[%s7925_s30 + $0x18] sm:$0xf] }
 0x40b   : > { %4485 = vmatpush.bf16.msra.mxu0 %v5857_v3  ;;  %v6120_v48 = vld [vmem:[%s7925_s30 + $0x270] sm:$0xf]  ;;  %v7467_v49 = vld [vmem:[%s7925_s30 + $0x278] sm:$0xf0]  ;;  %v6025_v53 = vor.u32 %v7443_v16, %v6024_v45  ;;  %v7392_v59 = vld [vmem:[%s7925_s30 + $0x20] sm:$0xf0] }
 0x40c   : > { %4511 = vmatpush.bf16.msra.mxu2 %v6049_v54  ;;  %v5928_v12 = vld [vmem:[%s7925_s30 + $0xf0] sm:$0xf]  ;;  %v7419_v50 = vld [vmem:[%s7925_s30 + $0xf8] sm:$0xf0]  ;;  %v6121_v56 = vor.u32 %v7467_v49, %v6120_v48  ;;  %v6012_v60 = vld [vmem:[%s7925_s30 + $0x198] sm:$0xf]  ;;  %v5821_v55 = vor.u32 %v7392_v59, %v5820_v58 }
 0x40d   : > { %4524 = vmatpush.bf16.msra.mxu3 %v6145_v37  ;;  %v5929_v61 = vor.u32 %v7419_v50, %v5928_v12  ;;  %v7440_v63 = vld [vmem:[%s7925_s30 + $0x1a0] sm:$0xf0]  ;;  %v6108_v2 = vld [vmem:[%s7925_s30 + $0x258] sm:$0xf]  ;;  %v5808_v22 = vld [vmem:[%s7925_s30] sm:$0xf] }
 0x40e   : > { %4498 = vmatpush.bf16.msra.mxu1 %v5953_v33  ;;  %v7464_v44 = vld [vmem:[%s7925_s30 + $0x260] sm:$0xf0]  ;;  %v5916_v31 = vld [vmem:[%s7925_s30 + $0xd8] sm:$0xf]  ;;  %v7389_v4 = vld [vmem:[%s7925_s30 + $0x8] sm:$0xf0]  ;;  %v6013_v5 = vor.u32 %v7440_v63, %v6012_v60 }
 0x40f   : > { %4486 = vmatpush.bf16.msra.mxu0 %v5845_v40  ;;  %v7416_v0 = vld [vmem:[%s7925_s30 + $0xe0] sm:$0xf0]  ;;  %v6109_v52 = vor.u32 %v7464_v44, %v6108_v2  ;;  %v6000_v8 = vld [vmem:[%s7925_s30 + $0x180] sm:$0xf]  ;;  %v7437_v18 = vld [vmem:[%s7925_s30 + $0x188] sm:$0xf0]  ;;  %v5809_v27 = vor.u32 %v7389_v4, %v5808_v22 }
 0x410   : > { %4512 = vmatpush.bf16.msra.mxu2 %v6037_v29  ;;  %v6096_v19 = vld [vmem:[%s7925_s30 + $0x240] sm:$0xf]  ;;  %v5917_v20 = vor.u32 %v7416_v0, %v5916_v31  ;;  %v7461_v21 = vld [vmem:[%s7925_s30 + $0x248] sm:$0xf0]  ;;  %v6276_v23 = vld [vmem:[%s7925_s30 + $0x3a8] sm:$0xf]  ;;  %v6001_v46 = vor.u32 %v7437_v18, %v6000_v8 }
 0x411   : > { %4525 = vmatpush.bf16.msra.mxu3 %v6133_v41  ;;  %v7506_v24 = vld [vmem:[%s7925_s30 + $0x3b0] sm:$0xf0]  ;;  %v6468_v25 = vld [vmem:[%s7925_s30 + $0x528] sm:$0xf]  ;;  %v5904_v13 = vld [vmem:[%s7925_s30 + $0xc0] sm:$0xf]  ;;  %v6097_v62 = vor.u32 %v7461_v21, %v6096_v19 }
 0x412   : > { %4499 = vmatpush.bf16.msra.mxu1 %v5941_v47  ;;  %v7554_v26 = vld [vmem:[%s7925_s30 + $0x530] sm:$0xf0]  ;;  %v6564_v6 = vld [vmem:[%s7925_s30 + $0x5e8] sm:$0xf]  ;;  %v7413_v28 = vld [vmem:[%s7925_s30 + $0xc8] sm:$0xf0]  ;;  %v6277_v57 = vor.u32 %v7506_v24, %v6276_v23 }
 0x413   : > { %4487 = vmatpush.bf16.msra.mxu0 %v5833_v51  ;;  %v7578_v34 = vld [vmem:[%s7925_s30 + $0x5f0] sm:$0xf0]  ;;  %v6372_v11 = vld [vmem:[%s7925_s30 + $0x468] sm:$0xf]  ;;  %v6469_v32 = vor.u32 %v7554_v26, %v6468_v25  ;;  %v6264_v35 = vld [vmem:[%s7925_s30 + $0x390] sm:$0xf]  ;;  %v5905_v36 = vor.u32 %v7413_v28, %v5904_v13 }
 0x414   : > { %4513 = vmatpush.bf16.msra.mxu2 %v6025_v53  ;;  %v7530_v30 = vld [vmem:[%s7925_s30 + $0x470] sm:$0xf0]  ;;  %v6565_v14 = vor.u32 %v7578_v34, %v6564_v6  ;;  %v7503_v3 = vld [vmem:[%s7925_s30 + $0x398] sm:$0xf0]  ;;  %v6456_v54 = vld [vmem:[%s7925_s30 + $0x510] sm:$0xf] }
 0x415   : > { %4526 = vmatpush.bf16.msra.mxu3 %v6121_v56  ;;  %v7551_v37 = vld [vmem:[%s7925_s30 + $0x518] sm:$0xf0]  ;;  %v6373_v17 = vor.u32 %v7530_v30, %v6372_v11  ;;  %v6552_v38 = vld [vmem:[%s7925_s30 + $0x5d0] sm:$0xf]  ;;  %v6252_v10 = vld [vmem:[%s7925_s30 + $0x378] sm:$0xf]  ;;  %v6265_v15 = vor.u32 %v7503_v3, %v6264_v35 }
 0x416   : > { %4500 = vmatpush.bf16.msra.mxu1 %v5929_v61  ;;  %v7575_v39 = vld [vmem:[%s7925_s30 + $0x5d8] sm:$0xf0]  ;;  %v6360_v33 = vld [vmem:[%s7925_s30 + $0x450] sm:$0xf]  ;;  %v6457_v1 = vor.u32 %v7551_v37, %v6456_v54  ;;  %v7500_v7 = vld [vmem:[%s7925_s30 + $0x380] sm:$0xf0] }
 0x417   : > { %4488 = vmatpush.bf16.msra.mxu0 %v5821_v55  ;;  %v7527_v9 = vld [vmem:[%s7925_s30 + $0x458] sm:$0xf0]  ;;  %v6444_v40 = vld [vmem:[%s7925_s30 + $0x4f8] sm:$0xf]  ;;  %v7548_v29 = vld [vmem:[%s7925_s30 + $0x500] sm:$0xf0]  ;;  %v6553_v41 = vor.u32 %v7575_v39, %v6552_v38  ;;  %v6253_v12 = vor.u32 %v7500_v7, %v6252_v10 }
 0x418   : > { %4514 = vmatpush.bf16.msra.mxu2 %v6013_v5  ;;  %v6540_v42 = vld [vmem:[%s7925_s30 + $0x5b8] sm:$0xf]  ;;  %v7572_v43 = vld [vmem:[%s7925_s30 + $0x5c0] sm:$0xf0]  ;;  %s1993_s29 = sshra.s32 %s7917_s25, 2  ;;  %s1996_s13 = sand.u32 3, %s7917_s25  ;;  %v6361_v45 = vor.u32 %v7527_v9, %v6360_v33  ;;  %v6445_v50 = vor.u32 %v7548_v29, %v6444_v40 }
 0x419   : > { %4527 = vmatpush.bf16.msra.mxu3 %v6109_v52  ;;  %v6348_v47 = vld [vmem:[%s7925_s30 + $0x438] sm:$0xf]  ;;  %v7524_v16 = vld [vmem:[%s7925_s30 + $0x440] sm:$0xf0]  ;;  %s7386_s17 = sshll.u32 %s1993_s29, 6  ;;  %v6541_v56 = vor.u32 %v7572_v43, %v6540_v42  ;;  %vm4478_vm4 = vcmask 130048  }
 0x41a   : > { %4501 = vmatpush.bf16.msra.mxu1 %v5917_v20  ;;  %v6240_v48 = vld [vmem:[%s7925_s30 + $0x360] sm:$0xf]  ;;  %v7497_v49 = vld [vmem:[%s7925_s30 + $0x368] sm:$0xf0]  ;;  %s8999_s14 = sadd.s32 %s7386_s17, %s1996_s13  ;;  %v6349_v58 = vor.u32 %v7524_v16, %v6348_v47  ;;  %v6228_v5 = vld [vmem:[%s7925_s30 + $0x348] sm:$0xf] }
 0x41b   : > { %4489 = vmatpush.bf16.msra.mxu0 %v5809_v27  ;;  %v6432_v51 = vld [vmem:[%s7925_s30 + $0x4e0] sm:$0xf]  ;;  %v7545_v53 = vld [vmem:[%s7925_s30 + $0x4e8] sm:$0xf0]  ;;  %s2000_s27 = scalar_lea.vmem [#allocation2], %s8999_s14  ;;  %v6241_v0 = vor.u32 %v7497_v49, %v6240_v48  ;;  %vm5111_vm5 = vcmask 1040384  }
 0x41c   : > { %4515 = vmatpush.bf16.msra.mxu2 %v6001_v46  ;;  %v6528_v59 = vld [vmem:[%s7925_s30 + $0x5a0] sm:$0xf]  ;;  %v7569_v61 = vld [vmem:[%s7925_s30 + $0x5a8] sm:$0xf0]  ;;  %v6433_v55 = vor.u32 %v7545_v53, %v6432_v51  ;;  %v7494_v20 = vld [vmem:[%s7925_s30 + $0x350] sm:$0xf0] }
 0x41d   : > { %4528 = vmatpush.bf16.msra.mxu3 %v6097_v62  ;;  %v9007_v60 = vld [vmem:[%s2000_s27] ss:$4 sm:$0xff]  ;;  %v6529_v19 = vor.u32 %v7569_v61, %v6528_v59  ;;  %v6229_v13 = vor.u32 %v7494_v20, %v6228_v5  ;;  %vm5113_vm6 = vcmask 1041408   ;;  %p7261_p5 = scmp.ne.s32.totalorder %s7917_s25, 2 }
 0x41e   : > { %4502 = vmatpush.bf16.msra.mxu1 %v5905_v36  ;;  %v2011_v63 = vperm.slane %v9007_v60, 2  ;;  %v2009_v2 = vperm.slane %v9007_v60, 0  ;;  %v2012_v44 = vperm.slane %v9007_v60, 3  ;;  %v2010_v31 = vperm.slane %v9007_v60, 1  ;;  %v6336_v22 = vld [vmem:[%s7925_s30 + $0x420] sm:$0xf] }
 0x41f   : > { %4534 = vmatpush.bf16.msrb.mxu0 %v6277_v57  ;;  %v7521_v4 = vld [vmem:[%s7925_s30 + $0x428] sm:$0xf0]  ;;  %v6420_v21 = vld [vmem:[%s7925_s30 + $0x4c8] sm:$0xf]  ;;  %v7542_v23 = vld [vmem:[%s7925_s30 + $0x4d0] sm:$0xf0] }
 0x420   : > { %4560 = vmatpush.bf16.msrb.mxu2 %v6469_v32  ;;  %v9017_v52 = vpack.c.bf16 %v2011_v63, %v2011_v63  ;;  %v9019_v8 = vpack.c.bf16 %v2009_v2, %v2009_v2  ;;  %v9021_v18 = vpack.c.bf16 %v2012_v44, %v2012_v44  ;;  %v9026_v24 = vpack.c.bf16 %v2010_v31, %v2010_v31  ;;  %v6516_v26 = vld [vmem:[%s7925_s30 + $0x588] sm:$0xf]  ;;  %v7566_v6 = vld [vmem:[%s7925_s30 + $0x590] sm:$0xf0]  ;;  %v6216_v46 = vld [vmem:[%s7925_s30 + $0x330] sm:$0xf] }
 0x421   : > { %4573 = vmatpush.bf16.msrb.mxu3 %v6565_v14  ;;  %v6337_v25 = vor.u32 %v7521_v4, %v6336_v22  ;;  %v6324_v27 = vld [vmem:[%s7925_s30 + $0x408] sm:$0xf]  ;;  %v7518_v34 = vld [vmem:[%s7925_s30 + $0x410] sm:$0xf0]  ;;  %v6421_v28 = vor.u32 %v7542_v23, %v6420_v21  ;;  %v6517_v62 = vor.u32 %v7566_v6, %v6516_v26  ;;  %v7491_v11 = vld [vmem:[%s7925_s30 + $0x338] sm:$0xf0] }
 0x422   : > { %4547 = vmatpush.bf16.msrb.mxu1 %v6373_v17  ;;  %4516 = vmatmul.bf16.vlgmr.msra.gmra.mxu2 %v9017_v52  ;;  %v6408_v30 = vld [vmem:[%s7925_s30 + $0x4b0] sm:$0xf]  ;;  %v7539_v57 = vld [vmem:[%s7925_s30 + $0x4b8] sm:$0xf0]  ;;  %v6325_v32 = vor.u32 %v7518_v34, %v6324_v27  ;;  %v6217_v54 = vor.u32 %v7491_v11, %v6216_v46  ;;  %v6204_v17 = vld [vmem:[%s7925_s30 + $0x318] sm:$0xf] }
 0x423   : > { %4535 = vmatpush.bf16.msrb.mxu0 %v6265_v15  ;;  %4529 = vmatmul.bf16.vlgmr.msra.gmra.mxu3 %v9021_v18  ;;  %v6504_v35 = vld [vmem:[%s7925_s30 + $0x570] sm:$0xf]  ;;  %v7563_v14 = vld [vmem:[%s7925_s30 + $0x578] sm:$0xf0]  ;;  %v6409_v37 = vor.u32 %v7539_v57, %v6408_v30  ;;  %v7488_v39 = vld [vmem:[%s7925_s30 + $0x320] sm:$0xf0] }
 0x424   : > { %4561 = vmatpush.bf16.msrb.mxu2 %v6457_v1  ;;  %4490 = vmatmul.bf16.vlgmr.msra.gmra.mxu0 %v9019_v8  ;;  %v6312_v36 = vld [vmem:[%s7925_s30 + $0x3f0] sm:$0xf]  ;;  %v7515_v3 = vld [vmem:[%s7925_s30 + $0x3f8] sm:$0xf0]  ;;  %v6505_v38 = vor.u32 %v7563_v14, %v6504_v35  ;;  %v6396_v33 = vld [vmem:[%s7925_s30 + $0x498] sm:$0xf]  ;;  %v6205_v42 = vor.u32 %v7488_v39, %v6204_v17 }
 0x425   : > { %4574 = vmatpush.bf16.msrb.mxu3 %v6553_v41  ;;  %4503 = vmatmul.bf16.vlgmr.msra.gmra.mxu1 %v9026_v24  ;;  %v7536_v9 = vld [vmem:[%s7925_s30 + $0x4a0] sm:$0xf0]  ;;  %v6313_v10 = vor.u32 %v7515_v3, %v6312_v36  ;;  %v6492_v15 = vld [vmem:[%s7925_s30 + $0x558] sm:$0xf]  ;;  %v6192_v29 = vld [vmem:[%s7925_s30 + $0x300] sm:$0xf] }
 0x426   : > { %4548 = vmatpush.bf16.msrb.mxu1 %v6361_v45  ;;  %v7560_v1 = vld [vmem:[%s7925_s30 + $0x560] sm:$0xf0]  ;;  %v6300_v7 = vld [vmem:[%s7925_s30 + $0x3d8] sm:$0xf]  ;;  %v7485_v41 = vld [vmem:[%s7925_s30 + $0x308] sm:$0xf0]  ;;  %v6397_v43 = vor.u32 %v7536_v9, %v6396_v33 }
 0x427   : > { %4536 = vmatpush.bf16.msrb.mxu0 %v6253_v12  ;;  %v7512_v40 = vld [vmem:[%s7925_s30 + $0x3e0] sm:$0xf0]  ;;  %v6384_v45 = vld [vmem:[%s7925_s30 + $0x480] sm:$0xf]  ;;  %v7533_v47 = vld [vmem:[%s7925_s30 + $0x488] sm:$0xf0]  ;;  %v6493_v48 = vor.u32 %v7560_v1, %v6492_v15  ;;  %v6193_v2 = vor.u32 %v7485_v41, %v6192_v29 }
 0x428   : > { %4562 = vmatpush.bf16.msrb.mxu2 %v6445_v50  ;;  %v6480_v16 = vld [vmem:[%s7925_s30 + $0x540] sm:$0xf]  ;;  %v7557_v49 = vld [vmem:[%s7925_s30 + $0x548] sm:$0xf0]  ;;  %v6660_v12 = vld [vmem:[%s7925_s30 + $0x6a8] sm:$0xf]  ;;  %v6301_v51 = vor.u32 %v7512_v40, %v6300_v7  ;;  %v6385_v44 = vor.u32 %v7533_v47, %v6384_v45 }
 0x429   : > { %4575 = vmatpush.bf16.msrb.mxu3 %v6541_v56  ;;  %v7602_v50 = vld [vmem:[%s7925_s30 + $0x6b0] sm:$0xf0]  ;;  %v6852_v53 = vld [vmem:[%s7925_s30 + $0x828] sm:$0xf]  ;;  %v6288_v61 = vld [vmem:[%s7925_s30 + $0x3c0] sm:$0xf]  ;;  %v6481_v22 = vor.u32 %v7557_v49, %v6480_v16 }
 0x42a   : > { %4549 = vmatpush.bf16.msrb.mxu1 %v6349_v58  ;;  %v7650_v56 = vld [vmem:[%s7925_s30 + $0x830] sm:$0xf0]  ;;  %v6948_v58 = vld [vmem:[%s7925_s30 + $0x8e8] sm:$0xf]  ;;  %v2015_v63 = vperm.slane %v9007_v60, 6  ;;  %v6661_v4 = vor.u32 %v7602_v50, %v6660_v12  ;;  %v2016_v20 = vperm.slane %v9007_v60, 7 }
 0x42b   : > { %4537 = vmatpush.bf16.msrb.mxu0 %v6241_v0  ;;  %v7674_v59 = vld [vmem:[%s7925_s30 + $0x8f0] sm:$0xf0]  ;;  %v7509_v31 = vld [vmem:[%s7925_s30 + $0x3c8] sm:$0xf0]  ;;  %v6756_v0 = vld [vmem:[%s7925_s30 + $0x768] sm:$0xf]  ;;  %v6853_v21 = vor.u32 %v7650_v56, %v6852_v53 }
 0x42c   : > { %4563 = vmatpush.bf16.msrb.mxu2 %v6433_v55  ;;  %v2013_v55 = vperm.slane %v9007_v60, 4  ;;  %v7626_v5 = vld [vmem:[%s7925_s30 + $0x770] sm:$0xf0]  ;;  %v6949_v23 = vor.u32 %v7674_v59, %v6948_v58  ;;  %v6840_v26 = vld [vmem:[%s7925_s30 + $0x810] sm:$0xf]  ;;  %v6289_v27 = vor.u32 %v7509_v31, %v6288_v61  ;;  %v9075_v34 = vpack.c.bf16 %v2015_v63, %v2015_v63 }
 0x42d   : > { %4576 = vmatpush.bf16.msrb.mxu3 %v6529_v19  ;;  %v6648_v19 = vld [vmem:[%s7925_s30 + $0x690] sm:$0xf]  ;;  %v7647_v6 = vld [vmem:[%s7925_s30 + $0x818] sm:$0xf0]  ;;  %v2014_v46 = vperm.slane %v9007_v60, 5  ;;  %v9082_v57 = vpack.c.bf16 %v2016_v20, %v2016_v20 }
 0x42e   : > { %4550 = vmatpush.bf16.msrb.mxu1 %v6337_v25  ;;  %v7599_v25 = vld [vmem:[%s7925_s30 + $0x698] sm:$0xf0]  ;;  %v9080_v11 = vpack.c.bf16 %v2013_v55, %v2013_v55  ;;  %v6841_v60 = vor.u32 %v7647_v6, %v6840_v26  ;;  %v6636_v36 = vld [vmem:[%s7925_s30 + $0x678] sm:$0xf]  ;;  %v7596_v3 = vld [vmem:[%s7925_s30 + $0x680] sm:$0xf0] }
 0x42f   : > { %4538 = vmatpush.bf16.msrb.mxu0 %v6229_v13  ;;  %v6936_v13 = vld [vmem:[%s7925_s30 + $0x8d0] sm:$0xf]  ;;  %v6649_v30 = vor.u32 %v7599_v25, %v6648_v19  ;;  %v7623_v35 = vld [vmem:[%s7925_s30 + $0x758] sm:$0xf0]  ;;  %v7644_v17 = vld [vmem:[%s7925_s30 + $0x800] sm:$0xf0]  ;;  %v6637_v9 = vor.u32 %v7596_v3, %v6636_v36 }
 0x430   : > { %4564 = vmatpush.bf16.msrb.mxu2 %v6421_v28  ;;  %v7671_v28 = vld [vmem:[%s7925_s30 + $0x8d8] sm:$0xf0]  ;;  %v7668_v39 = vld [vmem:[%s7925_s30 + $0x8c0] sm:$0xf0]  ;;  %v6624_v40 = vld [vmem:[%s7925_s30 + $0x660] sm:$0xf] }
 0x431   : > { %4577 = vmatpush.bf16.msrb.mxu3 %v6517_v62  ;;  %v6757_v62 = vor.u32 %v7626_v5, %v6756_v0  ;;  %v6937_v14 = vor.u32 %v7671_v28, %v6936_v13  ;;  %v7620_v15 = vld [vmem:[%s7925_s30 + $0x740] sm:$0xf0]  ;;  %v7593_v29 = vld [vmem:[%s7925_s30 + $0x668] sm:$0xf0]  ;;  %v6816_v41 = vld [vmem:[%s7925_s30 + $0x7e0] sm:$0xf] }
 0x432   : > { %4551 = vmatpush.bf16.msrb.mxu1 %v6325_v32  ;;  %v6744_v32 = vld [vmem:[%s7925_s30 + $0x750] sm:$0xf]  ;;  %v7665_v45 = vld [vmem:[%s7925_s30 + $0x8a8] sm:$0xf0]  ;;  %v6625_v16 = vor.u32 %v7593_v29, %v6624_v40  ;;  %v7590_v53 = vld [vmem:[%s7925_s30 + $0x650] sm:$0xf0] }
 0x433   : > { %4539 = vmatpush.bf16.msrb.mxu0 %v6217_v54  ;;  %v6828_v54 = vld [vmem:[%s7925_s30 + $0x7f8] sm:$0xf]  ;;  %v6745_v33 = vor.u32 %v7623_v35, %v6744_v32  ;;  %v7617_v49 = vld [vmem:[%s7925_s30 + $0x728] sm:$0xf0]  ;;  %v6804_v56 = vld [vmem:[%s7925_s30 + $0x7c8] sm:$0xf] }
 0x434   : > { %4565 = vmatpush.bf16.msrb.mxu2 %v6409_v37  ;;  %v9090_v37 = vpack.c.bf16 %v2014_v46, %v2014_v46  ;;  %v6829_v1 = vor.u32 %v7644_v17, %v6828_v54  ;;  %v7638_v58 = vld [vmem:[%s7925_s30 + $0x7d0] sm:$0xf0]  ;;  %v6900_v59 = vld [vmem:[%s7925_s30 + $0x888] sm:$0xf]  ;;  %v6792_v5 = vld [vmem:[%s7925_s30 + $0x7b0] sm:$0xf] }
 0x435   : > { %4578 = vmatpush.bf16.msrb.mxu3 %v6505_v38  ;;  %v6924_v38 = vld [vmem:[%s7925_s30 + $0x8b8] sm:$0xf]  ;;  %v7662_v61 = vld [vmem:[%s7925_s30 + $0x890] sm:$0xf0]  ;;  %v6805_v0 = vor.u32 %v7638_v58, %v6804_v56  ;;  %v7635_v19 = vld [vmem:[%s7925_s30 + $0x7b8] sm:$0xf0] }
 0x436   : > { %4552 = vmatpush.bf16.msrb.mxu1 %v6313_v10  ;;  %v6732_v10 = vld [vmem:[%s7925_s30 + $0x738] sm:$0xf]  ;;  %v6925_v7 = vor.u32 %v7668_v39, %v6924_v38  ;;  %v7614_v31 = vld [vmem:[%s7925_s30 + $0x710] sm:$0xf0]  ;;  %v6901_v55 = vor.u32 %v7662_v61, %v6900_v59  ;;  %v6888_v20 = vld [vmem:[%s7925_s30 + $0x870] sm:$0xf] }
 0x437   : > { %4540 = vmatpush.bf16.msrb.mxu0 %v6205_v42  ;;  %v7641_v42 = vld [vmem:[%s7925_s30 + $0x7e8] sm:$0xf0]  ;;  %v6733_v47 = vor.u32 %v7620_v15, %v6732_v10  ;;  %v6696_v26 = vld [vmem:[%s7925_s30 + $0x6f0] sm:$0xf]  ;;  %v7611_v6 = vld [vmem:[%s7925_s30 + $0x6f8] sm:$0xf0] }
 0x438   : > { %4566 = vmatpush.bf16.msrb.mxu2 %v6397_v43  ;;  %v6912_v43 = vld [vmem:[%s7925_s30 + $0x8a0] sm:$0xf]  ;;  %v6817_v12 = vor.u32 %v7641_v42, %v6816_v41  ;;  %v6588_v28 = vld [vmem:[%s7925_s30 + $0x618] sm:$0xf]  ;;  %v7584_v46 = vld [vmem:[%s7925_s30 + $0x620] sm:$0xf0] }
 0x439   : > { %4579 = vmatpush.bf16.msrb.mxu3 %v6493_v48  ;;  %v6720_v48 = vld [vmem:[%s7925_s30 + $0x720] sm:$0xf]  ;;  %v6913_v50 = vor.u32 %v7665_v45, %v6912_v43  ;;  %v6876_v32 = vld [vmem:[%s7925_s30 + $0x858] sm:$0xf]  ;;  %v7656_v35 = vld [vmem:[%s7925_s30 + $0x860] sm:$0xf0]  ;;  %v6589_v3 = vor.u32 %v7584_v46, %v6588_v28 }
 0x43a   : > { %4553 = vmatpush.bf16.msrb.mxu1 %v6301_v51  ;;  %v6612_v51 = vld [vmem:[%s7925_s30 + $0x648] sm:$0xf]  ;;  %v6721_v63 = vor.u32 %v7617_v49, %v6720_v48  ;;  %v6684_v36 = vld [vmem:[%s7925_s30 + $0x6d8] sm:$0xf]  ;;  %v7608_v54 = vld [vmem:[%s7925_s30 + $0x6e0] sm:$0xf0] }
 0x43b   : > { %4541 = vmatpush.bf16.msrb.mxu0 %v6193_v2  ;;  %v6613_v2 = vor.u32 %v7590_v53, %v6612_v51  ;;  %v6576_v17 = vld [vmem:[%s7925_s30 + $0x600] sm:$0xf]  ;;  %v7581_v38 = vld [vmem:[%s7925_s30 + $0x608] sm:$0xf0]  ;;  %v7698_v40 = vld [vmem:[%s7925_s30 + $0x9b0] sm:$0xf0]  ;;  %v6685_v29 = vor.u32 %v7608_v54, %v6684_v36 }
 0x43c   : > { %4567 = vmatpush.bf16.msrb.mxu2 %v6385_v44  ;;  %v6708_v44 = vld [vmem:[%s7925_s30 + $0x708] sm:$0xf]  ;;  %v7629_v10 = vld [vmem:[%s7925_s30 + $0x788] sm:$0xf0]  ;;  %v6864_v15 = vld [vmem:[%s7925_s30 + $0x840] sm:$0xf]  ;;  %v6577_v45 = vor.u32 %v7581_v38, %v6576_v17 }
 0x43d   : > { %4580 = vmatpush.bf16.msrb.mxu3 %v6481_v22  ;;  %v6600_v22 = vld [vmem:[%s7925_s30 + $0x630] sm:$0xf]  ;;  %v7236_v41 = vld [vmem:[%s7925_s30 + $0xb28] sm:$0xf]  ;;  %v7746_v42 = vld [vmem:[%s7925_s30 + $0xb30] sm:$0xf0] }
 0x43e   : > { %4554 = vmatpush.bf16.msrb.mxu1 %v6289_v27  ;;  %4542 = vmatmul.bf16.vlgmr.msrb.gmra.mxu0 %v9080_v11  ;;  %v6793_v27 = vor.u32 %v7635_v19, %v6792_v5  ;;  %v7722_v51 = vld [vmem:[%s7925_s30 + $0xa70] sm:$0xf0]  ;;  %v7237_v56 = vor.u32 %v7746_v42, %v7236_v41  ;;  %v7248_v58 = vld [vmem:[%s7925_s30 + $0xb40] sm:$0xf]  ;;  %v7749_v59 = vld [vmem:[%s7925_s30 + $0xb48] sm:$0xf0] }
 0x43f   : > { %4586 = vmatpush.bf16.msra.mxu0 %v6661_v4  ;;  %4568 = vmatmul.bf16.vlgmr.msrb.gmra.mxu2 %v9075_v34  ;;  %v7587_v4 = vld [vmem:[%s7925_s30 + $0x638] sm:$0xf0]  ;;  %v7224_v19 = vld [vmem:[%s7925_s30 + $0xb10] sm:$0xf]  ;;  %v7406_v28 = vld [vmem:[%s7925_s30 + $0x94] sm:$0xf] }
 0x440   : > { %4612 = vmatpush.bf16.msra.mxu2 %v6853_v21  ;;  %4581 = vmatmul.bf16.vlgmr.msrb.gmra.mxu3 %v9082_v57  ;;  %v7659_v21 = vld [vmem:[%s7925_s30 + $0x878] sm:$0xf0]  ;;  %v6601_v25 = vor.u32 %v7587_v4, %v6600_v22  ;;  %v7032_v4 = vld [vmem:[%s7925_s30 + $0x990] sm:$0xf]  ;;  %v5882_v46 = vld [vmem:[%s7925_s30 + $0x9c] sm:$0xf0] }
 0x441   : > { %4625 = vmatpush.bf16.msra.mxu3 %v6949_v23  ;;  %4555 = vmatmul.bf16.vlgmr.msrb.gmra.mxu1 %v9090_v37  ;;  %v6709_v23 = vor.u32 %v7614_v31, %v6708_v44  ;;  %v6889_v13 = vor.u32 %v7659_v21, %v6888_v20  ;;  %v7409_v31 = vld [vmem:[%s7925_s30 + $0xac] sm:$0xf]  ;;  %v7695_v5 = vld [vmem:[%s7925_s30 + $0x998] sm:$0xf0]  ;;  %v7249_v20 = vor.u32 %v7749_v59, %v7248_v58  ;;  %v7740_v36 = vld [vmem:[%s7925_s30 + $0xb00] sm:$0xf0] }
 0x442   : > { %4599 = vmatpush.bf16.msra.mxu1 %v6757_v62  ;;  %v6780_v62 = vld [vmem:[%s7925_s30 + $0x798] sm:$0xf]  ;;  %v7743_v21 = vld [vmem:[%s7925_s30 + $0xb18] sm:$0xf0]  ;;  %v7716_v54 = vld [vmem:[%s7925_s30 + $0xa40] sm:$0xf0]  ;;  %v5885_v17 = vor.u32 %v7406_v28, %v5882_v46 }
 0x443   : > { %4587 = vmatpush.bf16.msra.mxu0 %v6649_v30  ;;  %v7632_v30 = vld [vmem:[%s7925_s30 + $0x7a0] sm:$0xf0]  ;;  %v7713_v41 = vld [vmem:[%s7925_s30 + $0xa28] sm:$0xf0]  ;;  %v5834_v28 = vld [vmem:[%s7925_s30 + $0x3c] sm:$0xf0] }
 0x444   : > { %4613 = vmatpush.bf16.msra.mxu2 %v6841_v60  ;;  %v9132_v60 = vld [vmem:[%s2000_s27 + $0x20] ss:$4 sm:$0xff]  ;;  %v6781_v39 = vor.u32 %v7632_v30, %v6780_v62  ;;  %v7225_v62 = vor.u32 %v7743_v21, %v7224_v19 }
 0x445   : > { %4626 = vmatpush.bf16.msra.mxu3 %v6937_v14  ;;  %v6697_v14 = vor.u32 %v7611_v6, %v6696_v26  ;;  %v2017_v43 = vperm.slane %v9132_v60, 0  ;;  %v2019_v48 = vperm.slane %v9132_v60, 2  ;;  %v2020_v61 = vperm.slane %v9132_v60, 3  ;;  %v7731_v19 = vld [vmem:[%s7925_s30 + $0xab8] sm:$0xf0] }
 0x446   : > { %4600 = vmatpush.bf16.msra.mxu1 %v6745_v33  ;;  %v6877_v33 = vor.u32 %v7656_v35, %v6876_v32  ;;  %v7020_v32 = vld [vmem:[%s7925_s30 + $0x978] sm:$0xf]  ;;  %v7692_v35 = vld [vmem:[%s7925_s30 + $0x980] sm:$0xf0]  ;;  %v2024_v58 = vperm.slane %v9132_v60, 7 }
 0x447   : > { %4588 = vmatpush.bf16.msra.mxu0 %v6637_v9  ;;  %v6768_v9 = vld [vmem:[%s7925_s30 + $0x780] sm:$0xf]  ;;  %v9156_v44 = vpack.c.bf16 %v2017_v43, %v2017_v43  ;;  %v9168_v26 = vpack.c.bf16 %v2020_v61, %v2020_v61  ;;  %v7021_v38 = vor.u32 %v7692_v35, %v7020_v32  ;;  %v7707_v21 = vld [vmem:[%s7925_s30 + $0x9f8] sm:$0xf0]  ;;  %v7680_v32 = vld [vmem:[%s7925_s30 + $0x920] sm:$0xf0] }
 0x448   : > { %4614 = vmatpush.bf16.msra.mxu2 %v6829_v1  ;;  %v7653_v1 = vld [vmem:[%s7925_s30 + $0x848] sm:$0xf0]  ;;  %v6769_v49 = vor.u32 %v7629_v10, %v6768_v9  ;;  %v7164_v35 = vld [vmem:[%s7925_s30 + $0xa98] sm:$0xf] }
 0x449   : > { %4627 = vmatpush.bf16.msra.mxu3 %v6925_v7  ;;  %v7044_v7 = vld [vmem:[%s7925_s30 + $0x9a8] sm:$0xf] }
 0x44a   : > { %4601 = vmatpush.bf16.msra.mxu1 %v6733_v47  ;;  %v6672_v47 = vld [vmem:[%s7925_s30 + $0x6c0] sm:$0xf]  ;;  %v7045_v53 = vor.u32 %v7698_v40, %v7044_v7  ;;  %v7737_v40 = vld [vmem:[%s7925_s30 + $0xae8] sm:$0xf0] }
 0x44b   : > { %4589 = vmatpush.bf16.msra.mxu0 %v6625_v16  ;;  %v7605_v16 = vld [vmem:[%s7925_s30 + $0x6c8] sm:$0xf0]  ;;  %v7200_v7 = vld [vmem:[%s7925_s30 + $0xae0] sm:$0xf] }
 0x44c   : > { %4615 = vmatpush.bf16.msra.mxu2 %v6817_v12  ;;  %v6865_v12 = vor.u32 %v7653_v1, %v6864_v15  ;;  %v7008_v15 = vld [vmem:[%s7925_s30 + $0x960] sm:$0xf]  ;;  %v7689_v1 = vld [vmem:[%s7925_s30 + $0x968] sm:$0xf0] }
 0x44d   : > { %4628 = vmatpush.bf16.msra.mxu3 %v6913_v50  ;;  %v7140_v50 = vld [vmem:[%s7925_s30 + $0xa68] sm:$0xf]  ;;  %v7009_v43 = vor.u32 %v7689_v1, %v7008_v15  ;;  %v7152_v1 = vld [vmem:[%s7925_s30 + $0xa80] sm:$0xf] }
 0x44e   : > { %4602 = vmatpush.bf16.msra.mxu1 %v6721_v63  ;;  %v2018_v63 = vperm.slane %v9132_v60, 1  ;;  %v7141_v22 = vor.u32 %v7722_v51, %v7140_v50  ;;  %v7188_v50 = vld [vmem:[%s7925_s30 + $0xac8] sm:$0xf]  ;;  %v7734_v51 = vld [vmem:[%s7925_s30 + $0xad0] sm:$0xf0] }
 0x44f   : > { %4590 = vmatpush.bf16.msra.mxu0 %v6613_v2  ;;  %v6673_v2 = vor.u32 %v7605_v16, %v6672_v47  ;;  %v5858_v47 = vld [vmem:[%s7925_s30 + $0x6c] sm:$0xf0]  ;;  %v7201_v16 = vor.u32 %v7737_v40, %v7200_v7  ;;  %v7725_v7 = vld [vmem:[%s7925_s30 + $0xa88] sm:$0xf0] }
 0x450   : > { %4616 = vmatpush.bf16.msra.mxu2 %v6805_v0  ;;  %v5894_v0 = vld [vmem:[%s7925_s30 + $0xb4] sm:$0xf0]  ;;  %v9170_v6 = vpack.c.bf16 %v2018_v63, %v2018_v63  ;;  %v7397_v63 = vld [vmem:[%s7925_s30 + $0x4c] sm:$0xf] }
 0x451   : > { %4629 = vmatpush.bf16.msra.mxu3 %v6901_v55  ;;  %v9160_v55 = vpack.c.bf16 %v2019_v48, %v2019_v48  ;;  %v7433_v40 = vld [vmem:[%s7925_s30 + $0x16c] sm:$0xf] }
 0x452   : > { %4603 = vmatpush.bf16.msra.mxu1 %v6709_v23  ;;  %v7128_v23 = vld [vmem:[%s7925_s30 + $0xa50] sm:$0xf] }
 0x453   : > { %4591 = vmatpush.bf16.msra.mxu0 %v6601_v25  ;;  %v7719_v25 = vld [vmem:[%s7925_s30 + $0xa58] sm:$0xf0] }
 0x454   : > { %4617 = vmatpush.bf16.msra.mxu2 %v6793_v27  ;;  %v5897_v27 = vor.u32 %v7409_v31, %v5894_v0  ;;  %v7129_v30 = vor.u32 %v7719_v25, %v7128_v23  ;;  %v7189_v31 = vor.u32 %v7734_v51, %v7188_v50  ;;  %v9209_v23 = vpack.c.bf16 %v2024_v58, %v2024_v58  ;;  %v6086_v50 = vld [vmem:[%s7925_s30 + $0x234] sm:$0xf0]  ;;  %v5810_v58 = vld [vmem:[%s7925_s30 + $0xc] sm:$0xf0] }
 0x455   : > { %4630 = vmatpush.bf16.msra.mxu3 %v6889_v13  ;;  %v7033_v13 = vor.u32 %v7695_v5, %v7032_v4  ;;  %v7683_v4 = vld [vmem:[%s7925_s30 + $0x938] sm:$0xf0]  ;;  %v7176_v5 = vld [vmem:[%s7925_s30 + $0xab0] sm:$0xf]  ;;  %v7153_v51 = vor.u32 %v7725_v7, %v7152_v1  ;;  %v7424_v1 = vld [vmem:[%s7925_s30 + $0x124] sm:$0xf] }
 0x456   : > { %4604 = vmatpush.bf16.msra.mxu1 %v6697_v14  ;;  %v7212_v14 = vld [vmem:[%s7925_s30 + $0xaf8] sm:$0xf]  ;;  %v7177_v46 = vor.u32 %v7731_v19, %v7176_v5  ;;  %v5978_v5 = vld [vmem:[%s7925_s30 + $0x15c] sm:$0xf0]  ;;  %v7478_v19 = vld [vmem:[%s7925_s30 + $0x2d4] sm:$0xf] }
 0x457   : > { %4592 = vmatpush.bf16.msra.mxu0 %v6589_v3  ;;  %v7116_v3 = vld [vmem:[%s7925_s30 + $0xa38] sm:$0xf]  ;;  %v7213_v9 = vor.u32 %v7740_v36, %v7212_v14  ;;  %v7728_v14 = vld [vmem:[%s7925_s30 + $0xaa0] sm:$0xf0] }
 0x458   : > { %4618 = vmatpush.bf16.msra.mxu2 %v6781_v39  ;;  %v7403_v39 = vld [vmem:[%s7925_s30 + $0x7c] sm:$0xf]  ;;  %v7117_v10 = vor.u32 %v7716_v54, %v7116_v3  ;;  %v7068_v36 = vld [vmem:[%s7925_s30 + $0x9d8] sm:$0xf]  ;;  %v7704_v3 = vld [vmem:[%s7925_s30 + $0x9e0] sm:$0xf0] }
 0x459   : > { %4631 = vmatpush.bf16.msra.mxu3 %v6877_v33  ;;  %v5870_v33 = vld [vmem:[%s7925_s30 + $0x84] sm:$0xf0]  ;;  %v7391_v54 = vld [vmem:[%s7925_s30 + $0x1c] sm:$0xf]  ;;  %v7069_v15 = vor.u32 %v7704_v3, %v7068_v36 }
 0x45a   : > { %4605 = vmatpush.bf16.msra.mxu1 %v6685_v29  ;;  %v7104_v29 = vld [vmem:[%s7925_s30 + $0xa20] sm:$0xf]  ;;  %v5873_v42 = vor.u32 %v7403_v39, %v5870_v33  ;;  %v5822_v39 = vld [vmem:[%s7925_s30 + $0x24] sm:$0xf0]  ;;  %v7475_v3 = vld [vmem:[%s7925_s30 + $0x2bc] sm:$0xf] }
 0x45b   : > { %4593 = vmatpush.bf16.msra.mxu0 %v6577_v45  ;;  %v7400_v45 = vld [vmem:[%s7925_s30 + $0x64] sm:$0xf]  ;;  %v7105_v48 = vor.u32 %v7713_v41, %v7104_v29  ;;  %v6960_v33 = vld [vmem:[%s7925_s30 + $0x900] sm:$0xf]  ;;  %v5990_v29 = vld [vmem:[%s7925_s30 + $0x174] sm:$0xf0] }
 0x45c   : > { %4619 = vmatpush.bf16.msra.mxu2 %v6769_v49  ;;  %v6996_v49 = vld [vmem:[%s7925_s30 + $0x948] sm:$0xf]  ;;  %v5861_v59 = vor.u32 %v7400_v45, %v5858_v47  ;;  %v7481_v41 = vld [vmem:[%s7925_s30 + $0x2ec] sm:$0xf]  ;;  %v2021_v47 = vperm.slane %v9132_v60, 4 }
 0x45d   : > { %4632 = vmatpush.bf16.msra.mxu3 %v6865_v12  ;;  %v7686_v12 = vld [vmem:[%s7925_s30 + $0x950] sm:$0xf0]  ;;  %v7701_v45 = vld [vmem:[%s7925_s30 + $0x9c8] sm:$0xf0]  ;;  %v5966_v36 = vld [vmem:[%s7925_s30 + $0x144] sm:$0xf0] }
 0x45e   : > { %4606 = vmatpush.bf16.msra.mxu1 %v6673_v2  ;;  %4594 = vmatmul.bf16.vlgmr.msra.gmra.mxu0 %v9156_v44  ;;  %v6997_v61 = vor.u32 %v7686_v12, %v6996_v49  ;;  %v5846_v2 = vld [vmem:[%s7925_s30 + $0x54] sm:$0xf0]  ;;  %v2023_v49 = vperm.slane %v9132_v60, 6  ;;  %v7457_v12 = vld [vmem:[%s7925_s30 + $0x22c] sm:$0xf] }
 0x45f   : > { %4638 = vmatpush.bf16.msrb.mxu0 %v7045_v53  ;;  %4620 = vmatmul.bf16.vlgmr.msra.gmra.mxu2 %v9160_v55  ;;  %v7092_v53 = vld [vmem:[%s7925_s30 + $0xa08] sm:$0xf]  ;;  %v5849_v25 = vor.u32 %v7397_v63, %v5846_v2  ;;  %v7505_v2 = vld [vmem:[%s7925_s30 + $0x3ac] sm:$0xf] }
 0x460   : > { %4664 = vmatpush.bf16.msrb.mxu2 %v7237_v56  ;;  %4633 = vmatmul.bf16.vlgmr.msra.gmra.mxu3 %v9168_v26  ;;  %v7710_v56 = vld [vmem:[%s7925_s30 + $0xa10] sm:$0xf0] }
 0x461   : > { %4684 = vmatpush.bf16.msrb.mxu3 %v7249_v20  ;;  %4607 = vmatmul.bf16.vlgmr.msra.gmra.mxu1 %v9170_v6  ;;  %v7093_v0 = vor.u32 %v7710_v56, %v7092_v53  ;;  %v7080_v20 = vld [vmem:[%s7925_s30 + $0x9f0] sm:$0xf]  ;;  %v5993_v53 = vor.u32 %v7433_v40, %v5990_v29  ;;  %v7388_v56 = vld [vmem:[%s7925_s30 + $0x4] sm:$0xf] }
 0x462   : > { %4651 = vmatpush.bf16.msrb.mxu1 %v7141_v22  ;;  %v6984_v22 = vld [vmem:[%s7925_s30 + $0x930] sm:$0xf]  ;;  %v7472_v29 = vld [vmem:[%s7925_s30 + $0x2a4] sm:$0xf] }
 0x463   : > { %4639 = vmatpush.bf16.msrb.mxu0 %v7033_v13  ;;  %v7394_v13 = vld [vmem:[%s7925_s30 + $0x34] sm:$0xf]  ;;  %v5954_v40 = vld [vmem:[%s7925_s30 + $0x12c] sm:$0xf0] }
 0x464   : > { %4665 = vmatpush.bf16.msrb.mxu2 %v7225_v62  ;;  %v7081_v62 = vor.u32 %v7707_v21, %v7080_v20  ;;  %v6170_v20 = vld [vmem:[%s7925_s30 + $0x2dc] sm:$0xf0]  ;;  %v9248_v21 = vpack.c.bf16 %v2023_v49, %v2023_v49  ;;  %v6242_v49 = vld [vmem:[%s7925_s30 + $0x36c] sm:$0xf0] }
 0x465   : > { %4690 = vmatpush.bf16.msra.mxu3 %v5897_v27  ;;  %v6985_v27 = vor.u32 %v7683_v4, %v6984_v22  ;;  %v9243_v22 = vpack.c.bf16 %v2021_v47, %v2021_v47  ;;  %v6089_v4 = vor.u32 %v7457_v12, %v6086_v50  ;;  %v5957_v47 = vor.u32 %v7424_v1, %v5954_v40  ;;  %v7421_v12 = vld [vmem:[%s7925_s30 + $0x10c] sm:$0xf]  ;;  %v7412_v1 = vld [vmem:[%s7925_s30 + $0xc4] sm:$0xf] }
 0x466   : > { %4652 = vmatpush.bf16.msrb.mxu1 %v7129_v30  ;;  %v6972_v30 = vld [vmem:[%s7925_s30 + $0x918] sm:$0xf] }
 0x467   : > { %4640 = vmatpush.bf16.msrb.mxu0 %v7021_v38  ;;  %v6973_v38 = vor.u32 %v7680_v32, %v6972_v30  ;;  %v7502_v30 = vld [vmem:[%s7925_s30 + $0x394] sm:$0xf]  ;;  %v6266_v32 = vld [vmem:[%s7925_s30 + $0x39c] sm:$0xf0] }
 0x468   : > { %4666 = vmatpush.bf16.msrb.mxu2 %v7213_v9  ;;  %v7677_v9 = vld [vmem:[%s7925_s30 + $0x908] sm:$0xf0] }
 0x469   : > { %4691 = vmatpush.bf16.msra.mxu3 %v5885_v17  ;;  %v5837_v17 = vor.u32 %v7394_v13, %v5834_v28 }
 0x46a   : > { %4653 = vmatpush.bf16.msrb.mxu1 %v7117_v10  ;;  %v7165_v10 = vor.u32 %v7728_v14, %v7164_v35  ;;  %v7427_v35 = vld [vmem:[%s7925_s30 + $0x13c] sm:$0xf] }
 0x46b   : > { %4641 = vmatpush.bf16.msrb.mxu0 %v7009_v43  ;;  %v7056_v43 = vld [vmem:[%s7925_s30 + $0x9c0] sm:$0xf] }
 0x46c   : > { %4667 = vmatpush.bf16.msrb.mxu2 %v7201_v16  ;;  %v5825_v16 = vor.u32 %v7391_v54, %v5822_v39  ;;  %v7057_v63 = vor.u32 %v7701_v45, %v7056_v43  ;;  %v6158_v54 = vld [vmem:[%s7925_s30 + $0x2c4] sm:$0xf0]  ;;  %v6269_v39 = vor.u32 %v7502_v30, %v6266_v32  ;;  %v6050_v43 = vld [vmem:[%s7925_s30 + $0x1ec] sm:$0xf0]  ;;  %v7490_v30 = vld [vmem:[%s7925_s30 + $0x334] sm:$0xf] }
 0x46d   : > { %4692 = vmatpush.bf16.msra.mxu3 %v5873_v42  ;;  %v6182_v42 = vld [vmem:[%s7925_s30 + $0x2f4] sm:$0xf0]  ;;  %v6218_v32 = vld [vmem:[%s7925_s30 + $0x33c] sm:$0xf0] }
 0x46e   : > { %4654 = vmatpush.bf16.msrb.mxu1 %v7105_v48  ;;  %v6961_v48 = vor.u32 %v7677_v9, %v6960_v33  ;;  %v5969_v33 = vor.u32 %v7427_v35, %v5966_v36  ;;  %v6161_v9 = vor.u32 %v7475_v3, %v6158_v54  ;;  %v7415_v35 = vld [vmem:[%s7925_s30 + $0xdc] sm:$0xf]  ;;  %v5918_v36 = vld [vmem:[%s7925_s30 + $0xe4] sm:$0xf0] }
 0x46f   : > { %4642 = vmatpush.bf16.msrb.mxu0 %v6997_v61  ;;  %v6185_v61 = vor.u32 %v7481_v41, %v6182_v42  ;;  %v6146_v41 = vld [vmem:[%s7925_s30 + $0x2ac] sm:$0xf0]  ;;  %v7448_v42 = vld [vmem:[%s7925_s30 + $0x1e4] sm:$0xf]  ;;  %v7463_v3 = vld [vmem:[%s7925_s30 + $0x25c] sm:$0xf] }
 0x470   : > { %4668 = vmatpush.bf16.msrb.mxu2 %v7189_v31  ;;  %7258 = vmatmul.msk.bf16.vlgmr.msrb.gmra.mxu3 %vm4478_vm4, %v9209_v23  ;;  %v6278_v31 = vld [vmem:[%s7925_s30 + $0x3b4] sm:$0xf0]  ;;  %v6053_v50 = vor.u32 %v7448_v42, %v6050_v43  ;;  %v6110_v54 = vld [vmem:[%s7925_s30 + $0x264] sm:$0xf0]  ;;  %v7529_v42 = vld [vmem:[%s7925_s30 + $0x46c] sm:$0xf] }
 0x471   : > { %4693 = vmatpush.bf16.msra.mxu3 %v5861_v59  ;;  %v2022_v59 = vperm.slane %v9132_v60, 5  ;;  %v5813_v60 = vor.u32 %v7388_v56, %v5810_v58  ;;  %v6281_v13 = vor.u32 %v7505_v2, %v6278_v31  ;;  %v6134_v56 = vld [vmem:[%s7925_s30 + $0x294] sm:$0xf0]  ;;  %v7445_v58 = vld [vmem:[%s7925_s30 + $0x1cc] sm:$0xf] }
 0x472   : > { %4655 = vmatpush.bf16.msrb.mxu1 %v7093_v0  ;;  %v7430_v0 = vld [vmem:[%s7925_s30 + $0x154] sm:$0xf]  ;;  %v7493_v31 = vld [vmem:[%s7925_s30 + $0x34c] sm:$0xf]  ;;  %v6374_v43 = vld [vmem:[%s7925_s30 + $0x474] sm:$0xf0] }
 0x473   : > { %4643 = vmatpush.bf16.msrb.mxu0 %v6985_v27  ;;  %v6074_v27 = vld [vmem:[%s7925_s30 + $0x21c] sm:$0xf0]  ;;  %v9252_v28 = vpack.c.bf16 %v2022_v59, %v2022_v59  ;;  %v6038_v59 = vld [vmem:[%s7925_s30 + $0x1d4] sm:$0xf0] }
 0x474   : > { %4669 = vmatpush.bf16.msrb.mxu2 %v7177_v46  ;;  %v5981_v46 = vor.u32 %v7430_v0, %v5978_v5  ;;  %v6230_v0 = vld [vmem:[%s7925_s30 + $0x354] sm:$0xf0]  ;;  %v6041_v5 = vor.u32 %v7445_v58, %v6038_v59  ;;  %v6377_v59 = vor.u32 %v7529_v42, %v6374_v43  ;;  %v7544_v43 = vld [vmem:[%s7925_s30 + $0x4e4] sm:$0xf] }
 0x475   : > { %4694 = vmatpush.bf16.msra.mxu3 %v5849_v25  ;;  %v7454_v25 = vld [vmem:[%s7925_s30 + $0x214] sm:$0xf]  ;;  %v6470_v58 = vld [vmem:[%s7925_s30 + $0x534] sm:$0xf0] }
 0x476   : > { %4656 = vmatpush.bf16.msrb.mxu1 %v7081_v62  ;;  %v6173_v62 = vor.u32 %v7478_v19, %v6170_v20  ;;  %v6077_v14 = vor.u32 %v7454_v25, %v6074_v27  ;;  %v5930_v19 = vld [vmem:[%s7925_s30 + $0xfc] sm:$0xf0]  ;;  %v7466_v20 = vld [vmem:[%s7925_s30 + $0x274] sm:$0xf] }
 0x477   : > { %4644 = vmatpush.bf16.msrb.mxu0 %v6973_v38  ;;  %v6062_v38 = vld [vmem:[%s7925_s30 + $0x204] sm:$0xf0]  ;;  %v7442_v25 = vld [vmem:[%s7925_s30 + $0x1b4] sm:$0xf]  ;;  %v6026_v27 = vld [vmem:[%s7925_s30 + $0x1bc] sm:$0xf0] }
 0x478   : > { %4670 = vmatpush.bf16.msrb.mxu2 %v7165_v10  ;;  %v7499_v10 = vld [vmem:[%s7925_s30 + $0x37c] sm:$0xf] }
 0x479   : > { %4695 = vmatpush.bf16.msra.mxu3 %v5837_v17  ;;  %v7451_v17 = vld [vmem:[%s7925_s30 + $0x1fc] sm:$0xf] }
 0x47a   : > { %4657 = vmatpush.bf16.msrb.mxu1 %v7069_v15  ;;  %v6254_v15 = vld [vmem:[%s7925_s30 + $0x384] sm:$0xf0]  ;;  %v6065_v7 = vor.u32 %v7451_v17, %v6062_v38  ;;  %v7439_v17 = vld [vmem:[%s7925_s30 + $0x19c] sm:$0xf] }
 0x47b   : > { %4645 = vmatpush.bf16.msrb.mxu0 %v6961_v48  ;;  %v6257_v45 = vor.u32 %v7499_v10, %v6254_v15  ;;  %v7496_v48 = vld [vmem:[%s7925_s30 + $0x364] sm:$0xf]  ;;  %v6014_v38 = vld [vmem:[%s7925_s30 + $0x1a4] sm:$0xf0]  ;;  %v6113_v10 = vor.u32 %v7463_v3, %v6110_v54 }
 0x47c   : > { %4671 = vmatpush.bf16.msrb.mxu2 %v7153_v51  ;;  %v5942_v51 = vld [vmem:[%s7925_s30 + $0x114] sm:$0xf0]  ;;  %v6206_v15 = vld [vmem:[%s7925_s30 + $0x324] sm:$0xf0]  ;;  %v6017_v40 = vor.u32 %v7439_v17, %v6014_v38  ;;  %v7547_v38 = vld [vmem:[%s7925_s30 + $0x4fc] sm:$0xf] }
 0x47d   : > { %4696 = vmatpush.bf16.msra.mxu3 %v5825_v16  ;;  %v6149_v16 = vor.u32 %v7472_v29, %v6146_v41  ;;  %v7460_v29 = vld [vmem:[%s7925_s30 + $0x244] sm:$0xf]  ;;  %v6098_v41 = vld [vmem:[%s7925_s30 + $0x24c] sm:$0xf0]  ;;  %v6542_v3 = vld [vmem:[%s7925_s30 + $0x5c4] sm:$0xf0] }
 0x47e   : > { %4658 = vmatpush.bf16.msrb.mxu1 %v7057_v63  ;;  %4646 = vmatmul.bf16.vlgmr.msrb.gmra.mxu0 %v9243_v22  ;;  %v5945_v63 = vor.u32 %v7421_v12, %v5942_v51  ;;  %v7484_v12 = vld [vmem:[%s7925_s30 + $0x304] sm:$0xf]  ;;  %v6101_v51 = vor.u32 %v7460_v29, %v6098_v41  ;;  %v6530_v29 = vld [vmem:[%s7925_s30 + $0x5ac] sm:$0xf0] }
 0x47f   : > { %4703 = vmatpush.bf16.msra.mxu0 %v5993_v53  ;;  %4672 = vmatmul.bf16.vlgmr.msrb.gmra.mxu2 %v9248_v21  ;;  %v7469_v53 = vld [vmem:[%s7925_s30 + $0x28c] sm:$0xf] }
 0x480   : > { %4729 = vmatpush.bf16.msra.mxu2 %v6185_v61  ;;  %v6245_v61 = vor.u32 %v7496_v48, %v6242_v49  ;;  %v6137_v2 = vor.u32 %v7469_v53, %v6134_v56  ;;  %v7436_v48 = vld [vmem:[%s7925_s30 + $0x184] sm:$0xf]  ;;  %v6002_v49 = vld [vmem:[%s7925_s30 + $0x18c] sm:$0xf0]  ;;  %v7553_v56 = vld [vmem:[%s7925_s30 + $0x52c] sm:$0xf] }
 0x481   : > { %4697 = vmatpush.bf16.msra.mxu3 %v5813_v60  ;;  %4659 = vmatmul.bf16.vlgmr.msrb.gmra.mxu1 %v9252_v28  ;;  %v6122_v60 = vld [vmem:[%s7925_s30 + $0x27c] sm:$0xf0]  ;;  %v6194_v53 = vld [vmem:[%s7925_s30 + $0x30c] sm:$0xf0] }
 0x482   : > { %4716 = vmatpush.bf16.msra.mxu1 %v6089_v4  ;;  %v7418_v4 = vld [vmem:[%s7925_s30 + $0xf4] sm:$0xf] }
 0x483   : > { %4704 = vmatpush.bf16.msra.mxu0 %v5981_v46  ;;  %v5933_v46 = vor.u32 %v7418_v4, %v5930_v19  ;;  %v6362_v4 = vld [vmem:[%s7925_s30 + $0x45c] sm:$0xf0] }
 0x484   : > { %4730 = vmatpush.bf16.msra.mxu2 %v6173_v62  ;;  %4698 = vmatmul.bf16.vlgmr.msra.gmra.mxu3 %v9019_v8  ;;  %v6125_v62 = vor.u32 %v7466_v20, %v6122_v60  ;;  %v6554_v19 = vld [vmem:[%s7925_s30 + $0x5dc] sm:$0xf0]  ;;  %v6197_v20 = vor.u32 %v7484_v12, %v6194_v53  ;;  %v6473_v60 = vor.u32 %v7553_v56, %v6470_v58  ;;  %v7517_v12 = vld [vmem:[%s7925_s30 + $0x40c] sm:$0xf]  ;;  %v6518_v53 = vld [vmem:[%s7925_s30 + $0x594] sm:$0xf0] }
 0x485   : > { %4742 = vmatpush.bf16.msrb.mxu3 %v6281_v13  ;;  %v6233_v13 = vor.u32 %v7493_v31, %v6230_v0  ;;  %v7526_v31 = vld [vmem:[%s7925_s30 + $0x454] sm:$0xf]  ;;  %v6005_v0 = vor.u32 %v7436_v48, %v6002_v49  ;;  %v7592_v48 = vld [vmem:[%s7925_s30 + $0x664] sm:$0xf]  ;;  %v6626_v49 = vld [vmem:[%s7925_s30 + $0x66c] sm:$0xf0] }
 0x486   : > { %4717 = vmatpush.bf16.msra.mxu1 %v6077_v14  ;;  %v6029_v14 = vor.u32 %v7442_v25, %v6026_v27  ;;  %v7550_v27 = vld [vmem:[%s7925_s30 + $0x514] sm:$0xf]  ;;  %v6629_v58 = vor.u32 %v7592_v48, %v6626_v49  ;;  %v7673_v48 = vld [vmem:[%s7925_s30 + $0x8ec] sm:$0xf]  ;;  %v6950_v49 = vld [vmem:[%s7925_s30 + $0x8f4] sm:$0xf0] }
 0x487   : > { %4705 = vmatpush.bf16.msra.mxu0 %v5969_v33  ;;  %v7487_v33 = vld [vmem:[%s7925_s30 + $0x31c] sm:$0xf] }
 0x488   : > { %4731 = vmatpush.bf16.msra.mxu2 %v6161_v9  ;;  %v5921_v9 = vor.u32 %v7415_v35, %v5918_v36  ;;  %v7523_v35 = vld [vmem:[%s7925_s30 + $0x43c] sm:$0xf] }
 0x489   : > { %4743 = vmatpush.bf16.msrb.mxu3 %v6269_v39  ;;  %v6221_v39 = vor.u32 %v7490_v30, %v6218_v32  ;;  %v7598_v30 = vld [vmem:[%s7925_s30 + $0x694] sm:$0xf]  ;;  %v6650_v32 = vld [vmem:[%s7925_s30 + $0x69c] sm:$0xf0]  ;;  %v7571_v36 = vld [vmem:[%s7925_s30 + $0x5bc] sm:$0xf] }
 0x48a   : > { %4718 = vmatpush.bf16.msra.mxu1 %v6065_v7  ;;  %v5906_v7 = vld [vmem:[%s7925_s30 + $0xcc] sm:$0xf0]  ;;  %v6653_v17 = vor.u32 %v7598_v30, %v6650_v32  ;;  %v7586_v30 = vld [vmem:[%s7925_s30 + $0x634] sm:$0xf]  ;;  %v6602_v32 = vld [vmem:[%s7925_s30 + $0x63c] sm:$0xf0] }
 0x48b   : > { %4706 = vmatpush.bf16.msra.mxu0 %v5957_v47  ;;  %v6566_v47 = vld [vmem:[%s7925_s30 + $0x5f4] sm:$0xf0] }
 0x48c   : > { %4732 = vmatpush.bf16.msra.mxu2 %v6149_v16  ;;  %v6209_v16 = vor.u32 %v7487_v33, %v6206_v15  ;;  %v6638_v15 = vld [vmem:[%s7925_s30 + $0x684] sm:$0xf0] }
 0x48d   : > { %4744 = vmatpush.bf16.msrb.mxu3 %v6257_v45  ;;  %v7577_v45 = vld [vmem:[%s7925_s30 + $0x5ec] sm:$0xf] }
 0x48e   : > { %4719 = vmatpush.bf16.msra.mxu1 %v6053_v50  ;;  %v5909_v50 = vor.u32 %v7412_v1, %v5906_v7  ;;  %v7520_v1 = vld [vmem:[%s7925_s30 + $0x424] sm:$0xf]  ;;  %v6338_v7 = vld [vmem:[%s7925_s30 + $0x42c] sm:$0xf0] }
 0x48f   : > { %4707 = vmatpush.bf16.msra.mxu0 %v5945_v63  ;;  %v7601_v63 = vld [vmem:[%s7925_s30 + $0x6ac] sm:$0xf] }
 0x490   : > { %4733 = vmatpush.bf16.msra.mxu2 %v6137_v2  ;;  %v6662_v2 = vld [vmem:[%s7925_s30 + $0x6b4] sm:$0xf0] }
 0x491   : > { %4745 = vmatpush.bf16.msrb.mxu3 %v6245_v61  ;;  %v6569_v61 = vor.u32 %v7577_v45, %v6566_v47  ;;  %v6665_v25 = vor.u32 %v7601_v63, %v6662_v2  ;;  %v6434_v45 = vld [vmem:[%s7925_s30 + $0x4ec] sm:$0xf0]  ;;  %v6341_v47 = vor.u32 %v7520_v1, %v6338_v7  ;;  %v6590_v7 = vld [vmem:[%s7925_s30 + $0x624] sm:$0xf0] }
 0x492   : > { %4720 = vmatpush.bf16.msra.mxu1 %v6041_v5  ;;  %v7574_v5 = vld [vmem:[%s7925_s30 + $0x5d4] sm:$0xf]  ;;  %v6437_v56 = vor.u32 %v7544_v43, %v6434_v45  ;;  %v6482_v43 = vld [vmem:[%s7925_s30 + $0x54c] sm:$0xf0]  ;;  %v7625_v45 = vld [vmem:[%s7925_s30 + $0x76c] sm:$0xf] }
 0x493   : > { %4708 = vmatpush.bf16.msra.mxu0 %v5933_v46  ;;  %v6365_v46 = vor.u32 %v7526_v31, %v6362_v4  ;;  %v7589_v31 = vld [vmem:[%s7925_s30 + $0x64c] sm:$0xf]  ;;  %v7514_v4 = vld [vmem:[%s7925_s30 + $0x3f4] sm:$0xf] }
 0x494   : > { %4734 = vmatpush.bf16.msra.mxu2 %v6125_v62  ;;  %v6557_v62 = vor.u32 %v7574_v5, %v6554_v19  ;;  %v6314_v5 = vld [vmem:[%s7925_s30 + $0x3fc] sm:$0xf0]  ;;  %v7562_v19 = vld [vmem:[%s7925_s30 + $0x574] sm:$0xf] }
 0x495   : > { %4746 = vmatpush.bf16.msrb.mxu3 %v6233_v13  ;;  %v6458_v13 = vld [vmem:[%s7925_s30 + $0x51c] sm:$0xf0] }
 0x496   : > { %4721 = vmatpush.bf16.msra.mxu1 %v6029_v14  ;;  %v6350_v14 = vld [vmem:[%s7925_s30 + $0x444] sm:$0xf0]  ;;  %v6461_v54 = vor.u32 %v7550_v27, %v6458_v13  ;;  %v7538_v27 = vld [vmem:[%s7925_s30 + $0x4b4] sm:$0xf]  ;;  %v6410_v13 = vld [vmem:[%s7925_s30 + $0x4bc] sm:$0xf0] }
 0x497   : > { %4709 = vmatpush.bf16.msra.mxu0 %v5921_v9  ;;  %v6353_v33 = vor.u32 %v7523_v35, %v6350_v14  ;;  %v6545_v9 = vor.u32 %v7571_v36, %v6542_v3  ;;  %v7511_v35 = vld [vmem:[%s7925_s30 + $0x3dc] sm:$0xf]  ;;  %v6302_v14 = vld [vmem:[%s7925_s30 + $0x3e4] sm:$0xf0] }
 0x498   : > { %4735 = vmatpush.bf16.msra.mxu2 %v6113_v10  ;;  %v7595_v10 = vld [vmem:[%s7925_s30 + $0x67c] sm:$0xf]  ;;  %v6494_v3 = vld [vmem:[%s7925_s30 + $0x564] sm:$0xf0] }
 0x499   : > { %4747 = vmatpush.bf16.msrb.mxu3 %v6221_v39  ;;  %v6446_v39 = vld [vmem:[%s7925_s30 + $0x504] sm:$0xf0]  ;;  %v6641_v42 = vor.u32 %v7595_v10, %v6638_v15  ;;  %v7559_v36 = vld [vmem:[%s7925_s30 + $0x55c] sm:$0xf]  ;;  %v6305_v15 = vor.u32 %v7511_v35, %v6302_v14 }
 0x49a   : > { %4722 = vmatpush.bf16.msra.mxu1 %v6017_v40  ;;  %v7568_v40 = vld [vmem:[%s7925_s30 + $0x5a4] sm:$0xf]  ;;  %v6449_v41 = vor.u32 %v7547_v38, %v6446_v39  ;;  %v6605_v38 = vor.u32 %v7586_v30, %v6602_v32  ;;  %v7535_v39 = vld [vmem:[%s7925_s30 + $0x49c] sm:$0xf]  ;;  %v6497_v1 = vor.u32 %v7559_v36, %v6494_v3  ;;  %v6938_v30 = vld [vmem:[%s7925_s30 + $0x8dc] sm:$0xf0] }
 0x49b   : > { %4710 = vmatpush.bf16.msra.mxu0 %v5909_v50  ;;  %v6326_v50 = vld [vmem:[%s7925_s30 + $0x414] sm:$0xf0]  ;;  %v7646_v3 = vld [vmem:[%s7925_s30 + $0x814] sm:$0xf] }
 0x49c   : > { %4736 = vmatpush.bf16.msra.mxu2 %v6101_v51  ;;  %v7565_v51 = vld [vmem:[%s7925_s30 + $0x58c] sm:$0xf]  ;;  %v6329_v63 = vor.u32 %v7517_v12, %v6326_v50 }
 0x49d   : > { %4748 = vmatpush.bf16.msrb.mxu3 %v6209_v16  ;;  %v6533_v16 = vor.u32 %v7568_v40, %v6530_v29  ;;  %v6521_v2 = vor.u32 %v7565_v51, %v6518_v53  ;;  %v7508_v40 = vld [vmem:[%s7925_s30 + $0x3c4] sm:$0xf]  ;;  %v6290_v29 = vld [vmem:[%s7925_s30 + $0x3cc] sm:$0xf0] }
 0x49e   : > { %4723 = vmatpush.bf16.msra.mxu1 %v6005_v0  ;;  %4711 = vmatmul.bf16.vlgmr.msra.gmra.mxu0 %v9026_v24  ;;  %v6614_v0 = vld [vmem:[%s7925_s30 + $0x654] sm:$0xf0]  ;;  %v7532_v51 = vld [vmem:[%s7925_s30 + $0x484] sm:$0xf]  ;;  %v6386_v53 = vld [vmem:[%s7925_s30 + $0x48c] sm:$0xf0] }
 0x49f   : > { %4755 = vmatpush.bf16.msrb.mxu0 %v6377_v59  ;;  %4737 = vmatmul.bf16.vlgmr.msra.gmra.mxu2 %v9021_v18  ;;  %v7541_v59 = vld [vmem:[%s7925_s30 + $0x4cc] sm:$0xf] }
 0x4a0   : > { %4781 = vmatpush.bf16.msrb.mxu2 %v6569_v61  ;;  %v6422_v61 = vld [vmem:[%s7925_s30 + $0x4d4] sm:$0xf0] }
 0x4a1   : > { %4749 = vmatpush.bf16.msrb.mxu3 %v6197_v20  ;;  %4724 = vmatmul.bf16.vlgmr.msra.gmra.mxu1 %v9017_v52  ;;  %v6506_v20 = vld [vmem:[%s7925_s30 + $0x57c] sm:$0xf0] }
 0x4a2   : > { %4768 = vmatpush.bf16.msrb.mxu1 %v6473_v60  ;;  %v6425_v60 = vor.u32 %v7541_v59, %v6422_v61  ;;  %v4504_v10 = vpop.f32.mrf.mxu1  ;;  %v6293_v61 = vor.u32 %v7508_v40, %v6290_v29 }
 0x4a3   : > { %4756 = vmatpush.bf16.msrb.mxu0 %v6365_v46  ;;  %v6317_v46 = vor.u32 %v7514_v4, %v6314_v5  ;;  %v6953_v5 = vor.u32 %v7673_v48, %v6950_v49  ;;  %v7022_v48 = vld [vmem:[%s7925_s30 + $0x984] sm:$0xf0]  ;;  %v7616_v49 = vld [vmem:[%s7925_s30 + $0x724] sm:$0xf] }
 0x4a4   : > { %4782 = vmatpush.bf16.msrb.mxu2 %v6557_v62  ;;  %4750 = vmatmul.bf16.vlgmr.msrb.gmra.mxu3 %v9080_v11  ;;  %v6509_v62 = vor.u32 %v7562_v19, %v6506_v20  ;;  %v7697_v19 = vld [vmem:[%s7925_s30 + $0x9ac] sm:$0xf]  ;;  %v7046_v20 = vld [vmem:[%s7925_s30 + $0x9b4] sm:$0xf0] }
 0x4a5   : > { %4794 = vmatpush.bf16.msra.mxu3 %v6665_v25  ;;  %v6617_v25 = vor.u32 %v7589_v31, %v6614_v0  ;;  %v4517_v12 = vpop.f32.mrf.mxu2  ;;  %v7649_v31 = vld [vmem:[%s7925_s30 + $0x82c] sm:$0xf]  ;;  %v6854_v0 = vld [vmem:[%s7925_s30 + $0x834] sm:$0xf0]  ;;  %v7049_v36 = vor.u32 %v7697_v19, %v7046_v20 }
 0x4a6   : > { %4769 = vmatpush.bf16.msrb.mxu1 %v6461_v54  ;;  %v4491_v54 = vpop.f32.mrf.mxu0  ;;  %v4530_v59 = vpop.f32.mrf.mxu3  ;;  %v6857_v35 = vor.u32 %v7649_v31, %v6854_v0  ;;  %v7010_v31 = vld [vmem:[%s7925_s30 + $0x96c] sm:$0xf0]  ;;  %v7613_v0 = vld [vmem:[%s7925_s30 + $0x70c] sm:$0xf]  ;;  %v6902_v20 = vld [vmem:[%s7925_s30 + $0x894] sm:$0xf0] }
 0x4a7   : > { %4757 = vmatpush.bf16.msrb.mxu0 %v6353_v33  ;;  %v6398_v33 = vld [vmem:[%s7925_s30 + $0x4a4] sm:$0xf0]  ;;  %v7661_v19 = vld [vmem:[%s7925_s30 + $0x88c] sm:$0xf] }
 0x4a8   : > { %4783 = vmatpush.bf16.msrb.mxu2 %v6545_v9  ;;  %v7583_v9 = vld [vmem:[%s7925_s30 + $0x61c] sm:$0xf] }
 0x4a9   : > { %4795 = vmatpush.bf16.msra.mxu3 %v6653_v17  ;;  %v6413_v17 = vor.u32 %v7538_v27, %v6410_v13  ;;  %v6593_v50 = vor.u32 %v7583_v9, %v6590_v7  ;;  %v6389_v13 = vor.u32 %v7532_v51, %v6386_v53  ;;  %v7619_v9 = vld [vmem:[%s7925_s30 + $0x73c] sm:$0xf]  ;;  %v6914_v51 = vld [vmem:[%s7925_s30 + $0x8ac] sm:$0xf0] }
 0x4aa   : > { %4770 = vmatpush.bf16.msrb.mxu1 %v6449_v41  ;;  %v4505_v41 = vadd.f32 %v4504_v10, %v4491_v54  ;;  %v4506_v14 = vpop.f32.mrf.mxu1  ;;  %v6842_v54 = vld [vmem:[%s7925_s30 + $0x81c] sm:$0xf0]  ;;  %v6734_v10 = vld [vmem:[%s7925_s30 + $0x744] sm:$0xf0] }
 0x4ab   : > { %4758 = vmatpush.bf16.msrb.mxu0 %v6341_v47  ;;  %v6401_v47 = vor.u32 %v7535_v39, %v6398_v33  ;;  %v7694_v39 = vld [vmem:[%s7925_s30 + $0x994] sm:$0xf]  ;;  %v7034_v33 = vld [vmem:[%s7925_s30 + $0x99c] sm:$0xf0]  ;;  %v6845_v40 = vor.u32 %v7646_v3, %v6842_v54  ;;  %v7685_v14 = vld [vmem:[%s7925_s30 + $0x94c] sm:$0xf] }
 0x4ac   : > { %4784 = vmatpush.bf16.msrb.mxu2 %v6533_v16  ;;  %v6758_v16 = vld [vmem:[%s7925_s30 + $0x774] sm:$0xf0]  ;;  %v7610_v3 = vld [vmem:[%s7925_s30 + $0x6f4] sm:$0xf] }
 0x4ad   : > { %4796 = vmatpush.bf16.msra.mxu3 %v6641_v42  ;;  %v7556_v42 = vld [vmem:[%s7925_s30 + $0x544] sm:$0xf]  ;;  %v6761_v4 = vor.u32 %v7625_v45, %v6758_v16  ;;  %v4519_v7 = vpop.f32.mrf.mxu2  ;;  %v6737_v45 = vor.u32 %v7619_v9, %v6734_v10  ;;  %v7691_v16 = vld [vmem:[%s7925_s30 + $0x97c] sm:$0xf] }
 0x4ae   : > { %4771 = vmatpush.bf16.msrb.mxu1 %v6437_v56  ;;  %v7580_v56 = vld [vmem:[%s7925_s30 + $0x604] sm:$0xf]  ;;  %v4493_v27 = vpop.f32.mrf.mxu0  ;;  %v4532_v29 = vpop.f32.mrf.mxu3 }
 0x4af   : > { %4759 = vmatpush.bf16.msrb.mxu0 %v6329_v63  ;;  %v6485_v63 = vor.u32 %v7556_v42, %v6482_v43  ;;  %v7643_v42 = vld [vmem:[%s7925_s30 + $0x7fc] sm:$0xf]  ;;  %v6830_v43 = vld [vmem:[%s7925_s30 + $0x804] sm:$0xf0] }
 0x4b0   : > { %4785 = vmatpush.bf16.msrb.mxu2 %v6521_v2  ;;  %v6578_v2 = vld [vmem:[%s7925_s30 + $0x60c] sm:$0xf0]  ;;  %v6833_v53 = vor.u32 %v7643_v42, %v6830_v43  ;;  %v6986_v42 = vld [vmem:[%s7925_s30 + $0x93c] sm:$0xf0]  ;;  %v7607_v43 = vld [vmem:[%s7925_s30 + $0x6dc] sm:$0xf] }
 0x4b1   : > { %4797 = vmatpush.bf16.msra.mxu3 %v6629_v58  ;;  %v4518_v58 = vadd.f32 %v4517_v12, %v4505_v41  ;;  %v6581_v32 = vor.u32 %v7580_v56, %v6578_v2  ;;  %v7037_v41 = vor.u32 %v7694_v39, %v7034_v33  ;;  %v6722_v12 = vld [vmem:[%s7925_s30 + $0x72c] sm:$0xf0]  ;;  %v7025_v56 = vor.u32 %v7691_v16, %v7022_v48  ;;  %v7688_v2 = vld [vmem:[%s7925_s30 + $0x964] sm:$0xf]  ;;  %v7655_v16 = vld [vmem:[%s7925_s30 + $0x85c] sm:$0xf] }
 0x4b2   : > { %4772 = vmatpush.bf16.msrb.mxu1 %v6425_v60  ;;  %v7622_v60 = vld [vmem:[%s7925_s30 + $0x754] sm:$0xf]  ;;  %v6878_v48 = vld [vmem:[%s7925_s30 + $0x864] sm:$0xf0] }
 0x4b3   : > { %4760 = vmatpush.bf16.msrb.mxu0 %v6317_v46  ;;  %v6746_v46 = vld [vmem:[%s7925_s30 + $0x75c] sm:$0xf0] }
 0x4b4   : > { %4786 = vmatpush.bf16.msrb.mxu2 %v6509_v62  ;;  %v7670_v62 = vld [vmem:[%s7925_s30 + $0x8d4] sm:$0xf] }
 0x4b5   : > { %4798 = vmatpush.bf16.msra.mxu3 %v6617_v25  ;;  %v9385_v25 = vadd.f32 %v4530_v59, %v4518_v58  ;;  %v7640_v58 = vld [vmem:[%s7925_s30 + $0x7e4] sm:$0xf]  ;;  %v6818_v59 = vld [vmem:[%s7925_s30 + $0x7ec] sm:$0xf0] }
 0x4b6   : > { %4773 = vmatpush.bf16.msrb.mxu1 %v6413_v17  ;;  %v6749_v17 = vor.u32 %v7622_v60, %v6746_v46  ;;  %v6821_v60 = vor.u32 %v7640_v58, %v6818_v59  ;;  %v7637_v46 = vld [vmem:[%s7925_s30 + $0x7cc] sm:$0xf]  ;;  %v6881_v59 = vor.u32 %v7655_v16, %v6878_v48  ;;  %v5888_v48 = vld [vmem:[%s7925_s30 + $0x98] sm:$0xf] }
 0x4b7   : > { %4761 = vmatpush.bf16.msrb.mxu0 %v6305_v15  ;;  %v7667_v15 = vld [vmem:[%s7925_s30 + $0x8bc] sm:$0xf] }
 0x4b8   : > { %4787 = vmatpush.bf16.msrb.mxu2 %v6497_v1  ;;  %v6926_v1 = vld [vmem:[%s7925_s30 + $0x8c4] sm:$0xf0] }
 0x4b9   : > { %4799 = vmatpush.bf16.msra.mxu3 %v6605_v38  ;;  %v6941_v38 = vor.u32 %v7670_v62, %v6938_v30  ;;  %v6806_v62 = vld [vmem:[%s7925_s30 + $0x7d4] sm:$0xf0] }
 0x4ba   : > { %4774 = vmatpush.bf16.msrb.mxu1 %v6401_v47  ;;  %v6929_v47 = vor.u32 %v7667_v15, %v6926_v1  ;;  %v6809_v39 = vor.u32 %v7637_v46, %v6806_v62  ;;  %v7634_v15 = vld [vmem:[%s7925_s30 + $0x7b4] sm:$0xf]  ;;  %v6794_v1 = vld [vmem:[%s7925_s30 + $0x7bc] sm:$0xf0]  ;;  %v7628_v62 = vld [vmem:[%s7925_s30 + $0x784] sm:$0xf] }
 0x4bb   : > { %4762 = vmatpush.bf16.msrb.mxu0 %v6293_v61  ;;  %v6725_v61 = vor.u32 %v7616_v49, %v6722_v12  ;;  %v6797_v12 = vor.u32 %v7634_v15, %v6794_v1  ;;  %v7130_v15 = vld [vmem:[%s7925_s30 + $0xa5c] sm:$0xf0]  ;;  %v5996_v1 = vld [vmem:[%s7925_s30 + $0x170] sm:$0xf] }
 0x4bc   : > { %4788 = vmatpush.bf16.msrb.mxu2 %v6485_v63 }
 0x4bd   : > { %4800 = vmatpush.bf16.msra.mxu3 %v6593_v50  ;;  %v7664_v50 = vld [vmem:[%s7925_s30 + $0x8a4] sm:$0xf] }
 0x4be   : > { %4775 = vmatpush.bf16.msrb.mxu1 %v6389_v13  ;;  %4763 = vmatmul.bf16.vlgmr.msrb.gmra.mxu0 %v9090_v37  ;;  %v6917_v63 = vor.u32 %v7664_v50, %v6914_v51  ;;  %v7013_v13 = vor.u32 %v7688_v2, %v7010_v31  ;;  %v7631_v51 = vld [vmem:[%s7925_s30 + $0x79c] sm:$0xf]  ;;  %v6674_v2 = vld [vmem:[%s7925_s30 + $0x6cc] sm:$0xf0] }
 0x4bf   : > { %4807 = vmatpush.bf16.msra.mxu0 %v6761_v4  ;;  %4789 = vmatmul.bf16.vlgmr.msrb.gmra.mxu2 %v9082_v57  ;;  %v4543_v4 = vpop.f32.mrf.mxu0 }
 0x4c0   : > { %4833 = vmatpush.bf16.msra.mxu2 %v6953_v5  ;;  %v6710_v5 = vld [vmem:[%s7925_s30 + $0x714] sm:$0xf0]  ;;  %v4544_v27 = vadd.f32 %v4543_v4, %v9385_v25  ;;  %v6890_v25 = vld [vmem:[%s7925_s30 + $0x87c] sm:$0xf0]  ;;  %v6866_v4 = vld [vmem:[%s7925_s30 + $0x84c] sm:$0xf0] }
 0x4c1   : > { %4801 = vmatpush.bf16.msra.mxu3 %v6581_v32  ;;  %4776 = vmatmul.bf16.vlgmr.msrb.gmra.mxu1 %v9075_v34  ;;  %v6713_v30 = vor.u32 %v7613_v0, %v6710_v5  ;;  %v6905_v32 = vor.u32 %v7661_v19, %v6902_v20  ;;  %v7652_v0 = vld [vmem:[%s7925_s30 + $0x844] sm:$0xf]  ;;  %v7721_v5 = vld [vmem:[%s7925_s30 + $0xa6c] sm:$0xf]  ;;  %v7142_v20 = vld [vmem:[%s7925_s30 + $0xa74] sm:$0xf0] }
 0x4c2   : > { %4820 = vmatpush.bf16.msra.mxu1 %v6857_v35  ;;  %v4556_v35 = vpop.f32.mrf.mxu1  ;;  %v4569_v33 = vpop.f32.mrf.mxu2 }
 0x4c3   : > { %4808 = vmatpush.bf16.msra.mxu0 %v6749_v17  ;;  %v4557_v54 = vadd.f32 %v4556_v35, %v4544_v27  ;;  %v6698_v17 = vld [vmem:[%s7925_s30 + $0x6fc] sm:$0xf0]  ;;  %v4582_v29 = vpop.f32.mrf.mxu3  ;;  %v7250_v27 = vld [vmem:[%s7925_s30 + $0xb4c] sm:$0xf0]  ;;  %v6869_v35 = vor.u32 %v7652_v0, %v6866_v4  ;;  %v7405_v0 = vld [vmem:[%s7925_s30 + $0x88] sm:$0xf0] }
 0x4c4   : > { %4834 = vmatpush.bf16.msra.mxu2 %v6941_v38  ;;  %4802 = vmatmul.bf16.vlgmr.msra.gmra.mxu3 %v9156_v44  ;;  %v7658_v38 = vld [vmem:[%s7925_s30 + $0x874] sm:$0xf]  ;;  %v6701_v7 = vor.u32 %v7610_v3, %v6698_v17  ;;  %v7145_v3 = vor.u32 %v7721_v5, %v7142_v20  ;;  %v7745_v17 = vld [vmem:[%s7925_s30 + $0xb2c] sm:$0xf]  ;;  %v7712_v4 = vld [vmem:[%s7925_s30 + $0xa24] sm:$0xf] }
 0x4c5   : > { %4846 = vmatpush.bf16.msrb.mxu3 %v7049_v36  ;;  %v6998_v36 = vld [vmem:[%s7925_s30 + $0x954] sm:$0xf0]  ;;  %v4570_v9 = vadd.f32 %v4569_v33, %v4557_v54  ;;  %v6962_v54 = vld [vmem:[%s7925_s30 + $0x90c] sm:$0xf0]  ;;  %v7429_v20 = vld [vmem:[%s7925_s30 + $0x148] sm:$0xf0] }
 0x4c6   : > { %4821 = vmatpush.bf16.msra.mxu1 %v6845_v40  ;;  %v7001_v10 = vor.u32 %v7685_v14, %v6998_v36  ;;  %v6893_v40 = vor.u32 %v7658_v38, %v6890_v25  ;;  %v7676_v14 = vld [vmem:[%s7925_s30 + $0x904] sm:$0xf]  ;;  %v7238_v38 = vld [vmem:[%s7925_s30 + $0xb34] sm:$0xf0]  ;;  %v5900_v33 = vld [vmem:[%s7925_s30 + $0xb0] sm:$0xf] }
 0x4c7   : > { %4809 = vmatpush.bf16.msra.mxu0 %v6737_v45  ;;  %v9432_v45 = vadd.f32 %v4582_v29, %v4570_v9  ;;  %v4545_v49 = vpop.f32.mrf.mxu0  ;;  %v7411_v9 = vld [vmem:[%s7925_s30 + $0xb8] sm:$0xf0]  ;;  %v7241_v29 = vor.u32 %v7745_v17, %v7238_v38  ;;  %v7106_v5 = vld [vmem:[%s7925_s30 + $0xa2c] sm:$0xf0]  ;;  %v5960_v17 = vld [vmem:[%s7925_s30 + $0x128] sm:$0xf] }
 0x4c8   : > { %4835 = vmatpush.bf16.msra.mxu2 %v6929_v47  ;;  %v6686_v47 = vld [vmem:[%s7925_s30 + $0x6e4] sm:$0xf0]  ;;  %v7408_v49 = vld [vmem:[%s7925_s30 + $0xa0] sm:$0xf0]  ;;  %v7426_v38 = vld [vmem:[%s7925_s30 + $0x130] sm:$0xf0] }
 0x4c9   : > { %4847 = vmatpush.bf16.msrb.mxu3 %v7037_v41  ;;  %v7682_v41 = vld [vmem:[%s7925_s30 + $0x934] sm:$0xf]  ;;  %v6689_v58 = vor.u32 %v7607_v43, %v6686_v47  ;;  %v7226_v43 = vld [vmem:[%s7925_s30 + $0xb1c] sm:$0xf0] }
 0x4ca   : > { %4822 = vmatpush.bf16.msra.mxu1 %v6833_v53  ;;  %v6989_v50 = vor.u32 %v7682_v41, %v6986_v42  ;;  %v6782_v53 = vld [vmem:[%s7925_s30 + $0x7a4] sm:$0xf0]  ;;  %v4558_v31 = vpop.f32.mrf.mxu1  ;;  %v5901_v41 = vor.u32 %v7411_v9, %v5900_v33  ;;  %v7742_v42 = vld [vmem:[%s7925_s30 + $0xb14] sm:$0xf]  ;;  %v7733_v9 = vld [vmem:[%s7925_s30 + $0xacc] sm:$0xf] }
 0x4cb   : > { %4810 = vmatpush.bf16.msra.mxu0 %v6725_v61  ;;  %v6974_v61 = vld [vmem:[%s7925_s30 + $0x924] sm:$0xf0]  ;;  %v6785_v19 = vor.u32 %v7631_v51, %v6782_v53  ;;  %v4584_v36 = vpop.f32.mrf.mxu3  ;;  %v5984_v51 = vld [vmem:[%s7925_s30 + $0x158] sm:$0xf]  ;;  %v7432_v53 = vld [vmem:[%s7925_s30 + $0x160] sm:$0xf0] }
 0x4cc   : > { %4836 = vmatpush.bf16.msra.mxu2 %v6917_v63  ;;  %v7604_v63 = vld [vmem:[%s7925_s30 + $0x6c4] sm:$0xf]  ;;  %v5876_v31 = vld [vmem:[%s7925_s30 + $0x80] sm:$0xf]  ;;  %v7402_v36 = vld [vmem:[%s7925_s30 + $0x70] sm:$0xf0] }
 0x4cd   : > { %4848 = vmatpush.bf16.msrb.mxu3 %v7025_v56  ;;  %v7679_v56 = vld [vmem:[%s7925_s30 + $0x91c] sm:$0xf] }
 0x4ce   : > { %4823 = vmatpush.bf16.msra.mxu1 %v6821_v60  ;;  %v7748_v60 = vld [vmem:[%s7925_s30 + $0xb44] sm:$0xf]  ;;  %v6977_v46 = vor.u32 %v7679_v56, %v6974_v61  ;;  %v7229_v56 = vor.u32 %v7742_v42, %v7226_v43  ;;  %v7214_v61 = vld [vmem:[%s7925_s30 + $0xb04] sm:$0xf0]  ;;  %v5948_v42 = vld [vmem:[%s7925_s30 + $0x110] sm:$0xf] }
 0x4cf   : > { %4811 = vmatpush.bf16.msra.mxu0 %v6713_v30  ;;  %v6770_v30 = vld [vmem:[%s7925_s30 + $0x78c] sm:$0xf0]  ;;  %v7253_v25 = vor.u32 %v7748_v60, %v7250_v27  ;;  %v7423_v43 = vld [vmem:[%s7925_s30 + $0x118] sm:$0xf0] }
 0x4d0   : > { %4837 = vmatpush.bf16.msra.mxu2 %v6905_v32  ;;  %v6677_v32 = vor.u32 %v7604_v63, %v6674_v2  ;;  %v5985_v2 = vor.u32 %v7432_v53, %v5984_v51 }
 0x4d1   : > { %4849 = vmatpush.bf16.msrb.mxu3 %v7013_v13  ;;  %v4571_v13 = vpop.f32.mrf.mxu2 }
 0x4d2   : > { %4824 = vmatpush.bf16.msra.mxu1 %v6809_v39  ;;  %v6773_v39 = vor.u32 %v7628_v62, %v6770_v30  ;;  %v5877_v13 = vor.u32 %v7405_v0, %v5876_v31  ;;  %v7202_v62 = vld [vmem:[%s7925_s30 + $0xaec] sm:$0xf0]  ;;  %v7070_v31 = vld [vmem:[%s7925_s30 + $0x9e4] sm:$0xf0]  ;;  %v5936_v0 = vld [vmem:[%s7925_s30 + $0xf8] sm:$0xf] }
 0x4d3   : > { %4812 = vmatpush.bf16.msra.mxu0 %v6701_v7  ;;  %v7435_v7 = vld [vmem:[%s7925_s30 + $0x178] sm:$0xf0] }
 0x4d4   : > { %4838 = vmatpush.bf16.msra.mxu2 %v6893_v40  ;;  %v6965_v40 = vor.u32 %v7676_v14, %v6962_v54  ;;  %v5997_v16 = vor.u32 %v7435_v7, %v5996_v1  ;;  %v5864_v14 = vld [vmem:[%s7925_s30 + $0x68] sm:$0xf]  ;;  %v7094_v54 = vld [vmem:[%s7925_s30 + $0xa14] sm:$0xf0]  ;;  %v5961_v1 = vor.u32 %v7426_v38, %v5960_v17  ;;  %v5852_v7 = vld [vmem:[%s7925_s30 + $0x50] sm:$0xf] }
 0x4d5   : > { %4850 = vmatpush.bf16.msrb.mxu3 %v7001_v10  ;;  %v7718_v10 = vld [vmem:[%s7925_s30 + $0xa54] sm:$0xf]  ;;  %v5865_v33 = vor.u32 %v7402_v36, %v5864_v14  ;;  %v5924_v14 = vld [vmem:[%s7925_s30 + $0xe0] sm:$0xf]  ;;  %v7417_v36 = vld [vmem:[%s7925_s30 + $0xe8] sm:$0xf0] }
 0x4d6   : > { %4825 = vmatpush.bf16.msra.mxu1 %v6797_v12  ;;  %v7133_v47 = vor.u32 %v7718_v10, %v7130_v15  ;;  %v7715_v12 = vld [vmem:[%s7925_s30 + $0xa3c] sm:$0xf]  ;;  %v7190_v10 = vld [vmem:[%s7925_s30 + $0xad4] sm:$0xf0] }
 0x4d7   : > { %4813 = vmatpush.bf16.msra.mxu0 %v6689_v58  ;;  %v5889_v58 = vor.u32 %v7408_v49, %v5888_v48  ;;  %v7459_v17 = vld [vmem:[%s7925_s30 + $0x238] sm:$0xf0] }
 0x4d8   : > { %4839 = vmatpush.bf16.msra.mxu2 %v6881_v59  ;;  %v7739_v59 = vld [vmem:[%s7925_s30 + $0xafc] sm:$0xf] }
 0x4d9   : > { %4851 = vmatpush.bf16.msrb.mxu3 %v6989_v50  ;;  %v7118_v50 = vld [vmem:[%s7925_s30 + $0xa44] sm:$0xf0]  ;;  %v7217_v60 = vor.u32 %v7739_v59, %v7214_v61  ;;  %v5840_v59 = vld [vmem:[%s7925_s30 + $0x38] sm:$0xf]  ;;  %v7396_v61 = vld [vmem:[%s7925_s30 + $0x40] sm:$0xf0] }
 0x4da   : > { %4826 = vmatpush.bf16.msra.mxu1 %v6785_v19  ;;  %v7121_v63 = vor.u32 %v7715_v12, %v7118_v50  ;;  %v5972_v19 = vld [vmem:[%s7925_s30 + $0x140] sm:$0xf]  ;;  %v7730_v12 = vld [vmem:[%s7925_s30 + $0xab4] sm:$0xf] }
 0x4db   : > { %4814 = vmatpush.bf16.msra.mxu0 %v6677_v32  ;;  %v4595_v27 = vpop.f32.mrf.mxu0  ;;  %v7109_v32 = vor.u32 %v7712_v4, %v7106_v5  ;;  %v7178_v50 = vld [vmem:[%s7925_s30 + $0xabc] sm:$0xf0]  ;;  %v7420_v4 = vld [vmem:[%s7925_s30 + $0x100] sm:$0xf0] }
 0x4dc   : > { %4840 = vmatpush.bf16.msra.mxu2 %v6869_v35  ;;  %v4596_v30 = vadd.f32 %v4595_v27, %v9432_v45  ;;  %v5973_v35 = vor.u32 %v7429_v20, %v5972_v19  ;;  %v7181_v5 = vor.u32 %v7730_v12, %v7178_v50  ;;  %v5841_v20 = vor.u32 %v7396_v61, %v5840_v59  ;;  %v7166_v27 = vld [vmem:[%s7925_s30 + $0xaa4] sm:$0xf0]  ;;  %v7456_v12 = vld [vmem:[%s7925_s30 + $0x220] sm:$0xf0]  ;;  %v6380_v50 = vld [vmem:[%s7925_s30 + $0x470] sm:$0xf] }
 0x4dd   : > { %4852 = vmatpush.bf16.msrb.mxu3 %v6977_v46  ;;  %v7736_v46 = vld [vmem:[%s7925_s30 + $0xae4] sm:$0xf] }
 0x4de   : > { %4827 = vmatpush.bf16.msra.mxu1 %v6773_v39  ;;  %4815 = vmatmul.bf16.vlgmr.msra.gmra.mxu0 %v9170_v6  ;;  %v7205_v39 = vor.u32 %v7736_v46, %v7202_v62  ;;  %v5937_v46 = vor.u32 %v7420_v4, %v5936_v0  ;;  %v5828_v62 = vld [vmem:[%s7925_s30 + $0x20] sm:$0xf]  ;;  %v7480_v61 = vld [vmem:[%s7925_s30 + $0x2e0] sm:$0xf0] }
 0x4df   : > { %4859 = vmatpush.bf16.msrb.mxu0 %v7145_v3  ;;  %4841 = vmatmul.bf16.vlgmr.msra.gmra.mxu2 %v9168_v26  ;;  %v7709_v3 = vld [vmem:[%s7925_s30 + $0xa0c] sm:$0xf] }
 0x4e0   : > { %4892 = vmatpush.bf16.msrb.mxu2 %v7253_v25  ;;  %v4608_v25 = vpop.f32.mrf.mxu1  ;;  %v7097_v15 = vor.u32 %v7709_v3, %v7094_v54  ;;  %v6092_v54 = vld [vmem:[%s7925_s30 + $0x230] sm:$0xf] }
 0x4e1   : > { %4853 = vmatpush.bf16.msrb.mxu3 %v6965_v40  ;;  %4828 = vmatmul.bf16.vlgmr.msra.gmra.mxu1 %v9160_v55  ;;  %v4609_v45 = vadd.f32 %v4608_v25, %v4596_v30  ;;  %v7399_v40 = vld [vmem:[%s7925_s30 + $0x58] sm:$0xf0]  ;;  %v7393_v30 = vld [vmem:[%s7925_s30 + $0x28] sm:$0xf0] }
 0x4e2   : > { %4872 = vmatpush.bf16.msrb.mxu1 %v7241_v29  ;;  %v7706_v29 = vld [vmem:[%s7925_s30 + $0x9f4] sm:$0xf]  ;;  %v5853_v49 = vor.u32 %v7399_v40, %v5852_v7  ;;  %v5829_v25 = vor.u32 %v7393_v30, %v5828_v62  ;;  %v6093_v40 = vor.u32 %v7459_v17, %v6092_v54  ;;  %v7477_v30 = vld [vmem:[%s7925_s30 + $0x2c8] sm:$0xf0]  ;;  %v6356_v17 = vld [vmem:[%s7925_s30 + $0x440] sm:$0xf] }
 0x4e3   : > { %4860 = vmatpush.bf16.msrb.mxu0 %v7133_v47  ;;  %v4621_v47 = vpop.f32.mrf.mxu2  ;;  %v4597_v51 = vpop.f32.mrf.mxu0  ;;  %v7450_v54 = vld [vmem:[%s7925_s30 + $0x1f0] sm:$0xf0] }
 0x4e4   : > { %4898 = vmatpush.bf16.msra.mxu2 %v5901_v41  ;;  %4854 = vmatmul.bf16.vlgmr.msrb.gmra.mxu3 %v9243_v22  ;;  %v7082_v41 = vld [vmem:[%s7925_s30 + $0x9fc] sm:$0xf0]  ;;  %v4622_v48 = vadd.f32 %v4621_v47, %v4609_v45  ;;  %v4634_v53 = vpop.f32.mrf.mxu3  ;;  %v7154_v45 = vld [vmem:[%s7925_s30 + $0xa8c] sm:$0xf0]  ;;  %v5912_v47 = vld [vmem:[%s7925_s30 + $0xc8] sm:$0xf] }
 0x4e5   : > { %4911 = vmatpush.bf16.msra.mxu3 %v5997_v16  ;;  %v7193_v16 = vor.u32 %v7733_v9, %v7190_v10  ;;  %v5925_v9 = vor.u32 %v7417_v36, %v5924_v14  ;;  %v5816_v10 = vld [vmem:[%s7925_s30 + $0x8] sm:$0xf]  ;;  %v7531_v51 = vld [vmem:[%s7925_s30 + $0x478] sm:$0xf0] }
 0x4e6   : > { %4873 = vmatpush.bf16.msrb.mxu1 %v7229_v56  ;;  %v7085_v56 = vor.u32 %v7706_v29, %v7082_v41  ;;  %v7483_v29 = vld [vmem:[%s7925_s30 + $0x2f8] sm:$0xf0]  ;;  %v6284_v41 = vld [vmem:[%s7925_s30 + $0x3b0] sm:$0xf]  ;;  %v6381_v4 = vor.u32 %v7531_v51, %v6380_v50 }
 0x4e7   : > { %4861 = vmatpush.bf16.msrb.mxu0 %v7121_v63  ;;  %v7703_v63 = vld [vmem:[%s7925_s30 + $0x9dc] sm:$0xf]  ;;  %v6236_v50 = vld [vmem:[%s7925_s30 + $0x350] sm:$0xf] }
 0x4e8   : > { %4899 = vmatpush.bf16.msra.mxu2 %v5889_v58  ;;  %v5949_v58 = vor.u32 %v7423_v43, %v5948_v42  ;;  %v4610_v19 = vpop.f32.mrf.mxu1  ;;  %v7507_v42 = vld [vmem:[%s7925_s30 + $0x3b8] sm:$0xf0] }
 0x4e9   : > { %4912 = vmatpush.bf16.msra.mxu3 %v5985_v2  ;;  %v9503_v2 = vadd.f32 %v4634_v53, %v4622_v48  ;;  %v6080_v48 = vld [vmem:[%s7925_s30 + $0x218] sm:$0xf]  ;;  %v7453_v19 = vld [vmem:[%s7925_s30 + $0x208] sm:$0xf0] }
 0x4ea   : > { %4874 = vmatpush.bf16.msrb.mxu1 %v7217_v60  ;;  %v7727_v60 = vld [vmem:[%s7925_s30 + $0xa9c] sm:$0xf]  ;;  %v6081_v0 = vor.u32 %v7456_v12, %v6080_v48 }
 0x4eb   : > { %4862 = vmatpush.bf16.msrb.mxu0 %v7109_v32  ;;  %v7700_v32 = vld [vmem:[%s7925_s30 + $0x9c4] sm:$0xf]  ;;  %v7169_v3 = vor.u32 %v7727_v60, %v7166_v27  ;;  %v4623_v38 = vpop.f32.mrf.mxu2  ;;  %v7471_v12 = vld [vmem:[%s7925_s30 + $0x298] sm:$0xf0] }
 0x4ec   : > { %4900 = vmatpush.bf16.msra.mxu2 %v5877_v13  ;;  %v7073_v13 = vor.u32 %v7703_v63, %v7070_v31  ;;  %v4636_v7 = vpop.f32.mrf.mxu3  ;;  %v6272_v63 = vld [vmem:[%s7925_s30 + $0x398] sm:$0xf]  ;;  %v7504_v31 = vld [vmem:[%s7925_s30 + $0x3a0] sm:$0xf0]  ;;  %v7525_v38 = vld [vmem:[%s7925_s30 + $0x448] sm:$0xf0] }
 0x4ed   : > { %4913 = vmatpush.bf16.msra.mxu3 %v5973_v35  ;;  %v7058_v35 = vld [vmem:[%s7925_s30 + $0x9cc] sm:$0xf0]  ;;  %v7528_v60 = vld [vmem:[%s7925_s30 + $0x460] sm:$0xf0] }
 0x4ee   : > { %4875 = vmatpush.bf16.msrb.mxu1 %v7205_v39  ;;  %v7724_v39 = vld [vmem:[%s7925_s30 + $0xa84] sm:$0xf]  ;;  %v6044_v7 = vld [vmem:[%s7925_s30 + $0x1d0] sm:$0xf] }
 0x4ef   : > { %4863 = vmatpush.bf16.msrb.mxu0 %v7097_v15  ;;  %7259 = vmatmul.msk.bf16.vlgmr.msrb.gmra.mxu2 %vm4478_vm4, %v9209_v23  ;;  %v7390_v15 = vld [vmem:[%s7925_s30 + $0x10] sm:$0xf0]  ;;  %v7157_v43 = vor.u32 %v7724_v39, %v7154_v45  ;;  %v6152_v45 = vld [vmem:[%s7925_s30 + $0x2a8] sm:$0xf] }
 0x4f0   : > { %4901 = vmatpush.bf16.msra.mxu2 %v5865_v33  ;;  %v7061_v33 = vor.u32 %v7700_v32, %v7058_v35  ;;  %v6260_v32 = vld [vmem:[%s7925_s30 + $0x380] sm:$0xf]  ;;  %v7501_v35 = vld [vmem:[%s7925_s30 + $0x388] sm:$0xf0] }
 0x4f1   : > { %4914 = vmatpush.bf16.msra.mxu3 %v5961_v1  ;;  %v6188_v1 = vld [vmem:[%s7925_s30 + $0x2f0] sm:$0xf]  ;;  %v6261_v39 = vor.u32 %v7501_v35, %v6260_v32  ;;  %v7441_v32 = vld [vmem:[%s7925_s30 + $0x1a8] sm:$0xf0]  ;;  %v6320_v35 = vld [vmem:[%s7925_s30 + $0x3f8] sm:$0xf] }
 0x4f2   : > { %4876 = vmatpush.bf16.msrb.mxu1 %v7193_v16  ;;  %v7414_v16 = vld [vmem:[%s7925_s30 + $0xd0] sm:$0xf0]  ;;  %v6189_v53 = vor.u32 %v7483_v29, %v6188_v1  ;;  %v7447_v29 = vld [vmem:[%s7925_s30 + $0x1d8] sm:$0xf0] }
 0x4f3   : > { %4864 = vmatpush.bf16.msrb.mxu0 %v7085_v56  ;;  %v6285_v56 = vor.u32 %v7507_v42, %v6284_v41  ;;  %v5913_v59 = vor.u32 %v7414_v16, %v5912_v47  ;;  %v6344_v41 = vld [vmem:[%s7925_s30 + $0x428] sm:$0xf]  ;;  %v7522_v42 = vld [vmem:[%s7925_s30 + $0x430] sm:$0xf0]  ;;  %v6140_v16 = vld [vmem:[%s7925_s30 + $0x290] sm:$0xf]  ;;  %v6045_v51 = vor.u32 %v7447_v29, %v6044_v7 }
 0x4f4   : > { %4902 = vmatpush.bf16.msra.mxu2 %v5853_v49  ;;  %v5817_v49 = vor.u32 %v7390_v15, %v5816_v10  ;;  %v9544_v62 = vpop.f32.mrf.mxu3  ;;  %v7498_v10 = vld [vmem:[%s7925_s30 + $0x370] sm:$0xf0]  ;;  %v6476_v7 = vld [vmem:[%s7925_s30 + $0x530] sm:$0xf] }
 0x4f5   : > { %4915 = vmatpush.bf16.msra.mxu3 %v5949_v58  ;;  %v6176_v58 = vld [vmem:[%s7925_s30 + $0x2d8] sm:$0xf] }
 0x4f6   : > { %4877 = vmatpush.bf16.msrb.mxu1 %v7181_v5  ;;  %v6068_v5 = vld [vmem:[%s7925_s30 + $0x200] sm:$0xf]  ;;  %v6177_v27 = vor.u32 %v7480_v61, %v6176_v58  ;;  %v7444_v58 = vld [vmem:[%s7925_s30 + $0x1c0] sm:$0xf0]  ;;  %v7519_v61 = vld [vmem:[%s7925_s30 + $0x418] sm:$0xf0] }
 0x4f7   : > { %4865 = vmatpush.bf16.msrb.mxu0 %v7073_v13  ;;  %v6273_v13 = vor.u32 %v7504_v31, %v6272_v63  ;;  %v6069_v14 = vor.u32 %v7453_v19, %v6068_v5  ;;  %v6141_v63 = vor.u32 %v7471_v12, %v6140_v16  ;;  %v7468_v5 = vld [vmem:[%s7925_s30 + $0x280] sm:$0xf0]  ;;  %v6224_v19 = vld [vmem:[%s7925_s30 + $0x338] sm:$0xf]  ;;  %v6572_v16 = vld [vmem:[%s7925_s30 + $0x5f0] sm:$0xf] }
 0x4f8   : > { %4903 = vmatpush.bf16.msra.mxu2 %v5841_v20  ;;  %v6368_v20 = vld [vmem:[%s7925_s30 + $0x458] sm:$0xf] }
 0x4f9   : > { %4916 = vmatpush.bf16.msra.mxu3 %v5937_v46  ;;  %v6164_v46 = vld [vmem:[%s7925_s30 + $0x2c0] sm:$0xf]  ;;  %v6369_v36 = vor.u32 %v7528_v60, %v6368_v20  ;;  %v7492_v20 = vld [vmem:[%s7925_s30 + $0x340] sm:$0xf0] }
 0x4fa   : > { %4878 = vmatpush.bf16.msrb.mxu1 %v7169_v3  ;;  %v6056_v3 = vld [vmem:[%s7925_s30 + $0x1e8] sm:$0xf] }
 0x4fb   : > { %4866 = vmatpush.bf16.msrb.mxu0 %v7061_v33  ;;  %v7474_v33 = vld [vmem:[%s7925_s30 + $0x2b0] sm:$0xf0]  ;;  %v4647_v15 = vpop.f32.mrf.mxu0  ;;  %v6057_v1 = vor.u32 %v7450_v54, %v6056_v3  ;;  %v6225_v54 = vor.u32 %v7492_v20, %v6224_v19 }
 0x4fc   : > { %4904 = vmatpush.bf16.msra.mxu2 %v5829_v25  ;;  %v6165_v25 = vor.u32 %v7477_v30, %v6164_v46  ;;  %v4688_v48 = vpop.f32.mrf.mxu3  ;;  %v6020_v46 = vld [vmem:[%s7925_s30 + $0x1a0] sm:$0xf] }
 0x4fd   : > { %4917 = vmatpush.bf16.msra.mxu3 %v5925_v9  ;;  %v6248_v9 = vld [vmem:[%s7925_s30 + $0x368] sm:$0xf] }
 0x4fe   : > { %4879 = vmatpush.bf16.msrb.mxu1 %v7157_v43  ;;  %4867 = vmatmul.bf16.vlgmr.msrb.gmra.mxu0 %v9252_v28  ;;  %v6153_v43 = vor.u32 %v7474_v33, %v6152_v45  ;;  %v6249_v47 = vor.u32 %v7498_v10, %v6248_v9  ;;  %v6212_v45 = vld [vmem:[%s7925_s30 + $0x320] sm:$0xf]  ;;  %v7489_v33 = vld [vmem:[%s7925_s30 + $0x328] sm:$0xf0]  ;;  %v6008_v10 = vld [vmem:[%s7925_s30 + $0x188] sm:$0xf] }
 0x4ff   : > { %4924 = vmatpush.bf16.msra.mxu0 %v6093_v40  ;;  %v4648_v40 = vadd.f32 %v4647_v15, %v9503_v2  ;;  %v7495_v2 = vld [vmem:[%s7925_s30 + $0x358] sm:$0xf0]  ;;  %v7438_v15 = vld [vmem:[%s7925_s30 + $0x190] sm:$0xf0]  ;;  %v6213_v29 = vor.u32 %v7489_v33, %v6212_v45  ;;  %v6548_v45 = vld [vmem:[%s7925_s30 + $0x5c0] sm:$0xf] }
 0x500   : > { %4905 = vmatpush.bf16.msra.mxu2 %v5817_v49  ;;  %v6237_v31 = vor.u32 %v7495_v2, %v6236_v50  ;;  %v7579_v50 = vld [vmem:[%s7925_s30 + $0x5f8] sm:$0xf0]  ;;  %v6668_v2 = vld [vmem:[%s7925_s30 + $0x6b0] sm:$0xf]  ;;  %v7573_v33 = vld [vmem:[%s7925_s30 + $0x5c8] sm:$0xf0] }
 0x501   : > { %4880 = vmatmul.bf16.vlgmr.msrb.gmra.mxu1 %v9248_v21  ;;  %4918 = vmatpush.bf16.msra.mxu3 %v5913_v59  ;;  %v6332_v59 = vld [vmem:[%s7925_s30 + $0x410] sm:$0xf]  ;;  %v6573_v19 = vor.u32 %v7579_v50, %v6572_v16  ;;  %v7543_v16 = vld [vmem:[%s7925_s30 + $0x4d8] sm:$0xf0] }
 0x502   : > { %4937 = vmatpush.bf16.msra.mxu1 %v6189_v53  ;;  %v6345_v53 = vor.u32 %v7522_v42, %v6344_v41  ;;  %v7555_v41 = vld [vmem:[%s7925_s30 + $0x538] sm:$0xf0]  ;;  %v6104_v42 = vld [vmem:[%s7925_s30 + $0x248] sm:$0xf] }
 0x503   : > { %4925 = vmatpush.bf16.msra.mxu0 %v6081_v0  ;;  %4906 = vmatmul.bf16.vlgmr.msra.gmra.mxu2 %v9019_v8  ;;  %v6357_v8 = vor.u32 %v7525_v38, %v6356_v17  ;;  %v6128_v0 = vld [vmem:[%s7925_s30 + $0x278] sm:$0xf]  ;;  %v4649_v30 = vpop.f32.mrf.mxu0  ;;  %v6116_v17 = vld [vmem:[%s7925_s30 + $0x260] sm:$0xf] }
 0x504   : > { %4950 = vmatpush.bf16.msrb.mxu2 %v6285_v56  ;;  %4919 = vmatmul.bf16.vlgmr.msra.gmra.mxu3 %v9026_v24  ;;  %v4660_v24 = vpop.f32.mrf.mxu1  ;;  %v6032_v56 = vld [vmem:[%s7925_s30 + $0x1b8] sm:$0xf]  ;;  %v6129_v3 = vor.u32 %v7468_v5, %v6128_v0  ;;  %v6764_v0 = vld [vmem:[%s7925_s30 + $0x770] sm:$0xf]  ;;  %v7600_v30 = vld [vmem:[%s7925_s30 + $0x6a0] sm:$0xf0] }
 0x505   : > { %4963 = vmatpush.bf16.msrb.mxu3 %v6381_v4  ;;  %v4661_v49 = vadd.f32 %v4660_v24, %v4648_v40  ;;  %v4673_v4 = vpop.f32.mrf.mxu2  ;;  %v7462_v24 = vld [vmem:[%s7925_s30 + $0x250] sm:$0xf0] }
 0x506   : > { %4938 = vmatpush.bf16.msra.mxu1 %v6177_v27  ;;  %v6033_v27 = vor.u32 %v7444_v58, %v6032_v56  ;;  %v6296_v56 = vld [vmem:[%s7925_s30 + $0x3c8] sm:$0xf]  ;;  %v7510_v58 = vld [vmem:[%s7925_s30 + $0x3d0] sm:$0xf0] }
 0x507   : > { %4926 = vmatpush.bf16.msra.mxu0 %v6069_v14  ;;  %v4674_v60 = vadd.f32 %v4673_v4, %v4661_v49  ;;  %v7516_v14 = vld [vmem:[%s7925_s30 + $0x400] sm:$0xf0]  ;;  %v9585_v38 = vpop.f32.mrf.mxu3  ;;  %v6009_v49 = vor.u32 %v7438_v15, %v6008_v10  ;;  %v7627_v4 = vld [vmem:[%s7925_s30 + $0x778] sm:$0xf0] }
 0x508   : > { %4951 = vmatpush.bf16.msrb.mxu2 %v6273_v13  ;;  %v6333_v13 = vor.u32 %v7519_v61, %v6332_v59  ;;  %v6321_v9 = vor.u32 %v7516_v14, %v6320_v35  ;;  %v6464_v59 = vld [vmem:[%s7925_s30 + $0x518] sm:$0xf]  ;;  %v6105_v61 = vor.u32 %v7462_v24, %v6104_v42  ;;  %v6765_v35 = vor.u32 %v7627_v4, %v6764_v0  ;;  %v6452_v14 = vld [vmem:[%s7925_s30 + $0x500] sm:$0xf]  ;;  %v7570_v42 = vld [vmem:[%s7925_s30 + $0x5b0] sm:$0xf0] }
 0x509   : > { %4964 = vmatpush.bf16.msrb.mxu3 %v6369_v36  ;;  %v9582_v36 = vadd.f32 %v9544_v62, %v4674_v60  ;;  %v6021_v62 = vor.u32 %v7441_v32, %v6020_v46  ;;  %v6560_v60 = vld [vmem:[%s7925_s30 + $0x5d8] sm:$0xf]  ;;  %v6632_v24 = vld [vmem:[%s7925_s30 + $0x668] sm:$0xf]  ;;  %v7615_v0 = vld [vmem:[%s7925_s30 + $0x718] sm:$0xf0] }
 0x50a   : > { %4939 = vmatpush.bf16.msra.mxu1 %v6165_v25  ;;  %v6656_v46 = vld [vmem:[%s7925_s30 + $0x698] sm:$0xf] }
 0x50b   : > { %4927 = vmatpush.bf16.msra.mxu0 %v6057_v1  ;;  %v6308_v1 = vld [vmem:[%s7925_s30 + $0x3e0] sm:$0xf] }
 0x50c   : > { %4952 = vmatpush.bf16.msrb.mxu2 %v6261_v39  ;;  %v4662_v25 = vpop.f32.mrf.mxu1  ;;  %v7465_v39 = vld [vmem:[%s7925_s30 + $0x268] sm:$0xf0] }
 0x50d   : > { %4965 = vmatpush.bf16.msrb.mxu3 %v6357_v8  ;;  %v7513_v8 = vld [vmem:[%s7925_s30 + $0x3e8] sm:$0xf0]  ;;  %v6117_v40 = vor.u32 %v7465_v39, %v6116_v17  ;;  %v4675_v48 = vpop.f32.mrf.mxu2  ;;  %v7624_v17 = vld [vmem:[%s7925_s30 + $0x760] sm:$0xf0]  ;;  %v6657_v39 = vor.u32 %v7600_v30, %v6656_v46 }
 0x50e   : > { %4940 = vmatpush.bf16.msra.mxu1 %v6153_v43  ;;  %v6200_v43 = vld [vmem:[%s7925_s30 + $0x308] sm:$0xf]  ;;  %v6309_v12 = vor.u32 %v7513_v8, %v6308_v1  ;;  %v7546_v8 = vld [vmem:[%s7925_s30 + $0x4f0] sm:$0xf0]  ;;  %v7588_v46 = vld [vmem:[%s7925_s30 + $0x640] sm:$0xf0] }
 0x50f   : > { %4928 = vmatpush.bf16.msra.mxu0 %v6045_v51  ;;  %v7603_v51 = vld [vmem:[%s7925_s30 + $0x6b8] sm:$0xf0]  ;;  %v4701_v5 = vpop.f32.mrf.mxu3  ;;  %v6440_v1 = vld [vmem:[%s7925_s30 + $0x4e8] sm:$0xf] }
 0x510   : > { %4953 = vmatpush.bf16.msrb.mxu2 %v6249_v47  ;;  %v7486_v47 = vld [vmem:[%s7925_s30 + $0x310] sm:$0xf0]  ;;  %v6669_v20 = vor.u32 %v7603_v51, %v6668_v2  ;;  %v6728_v48 = vld [vmem:[%s7925_s30 + $0x728] sm:$0xf]  ;;  %v6524_v2 = vld [vmem:[%s7925_s30 + $0x590] sm:$0xf] }
 0x511   : > { %4966 = vmatpush.bf16.msrb.mxu3 %v6345_v53  ;;  %v6477_v53 = vor.u32 %v7555_v41, %v6476_v7  ;;  %v6740_v7 = vld [vmem:[%s7925_s30 + $0x740] sm:$0xf]  ;;  %v6536_v41 = vld [vmem:[%s7925_s30 + $0x5a8] sm:$0xf]  ;;  %v7567_v51 = vld [vmem:[%s7925_s30 + $0x598] sm:$0xf0] }
 0x512   : > { %4941 = vmatpush.bf16.msra.mxu1 %v6141_v63  ;;  %v6201_v63 = vor.u32 %v7486_v47, %v6200_v43  ;;  %v7594_v43 = vld [vmem:[%s7925_s30 + $0x670] sm:$0xf0]  ;;  %v6428_v47 = vld [vmem:[%s7925_s30 + $0x4d0] sm:$0xf]  ;;  %v6525_v5 = vor.u32 %v7567_v51, %v6524_v2 }
 0x513   : > { %4929 = vmatpush.bf16.msra.mxu0 %v6033_v27  ;;  %v6297_v27 = vor.u32 %v7510_v58, %v6296_v56  ;;  %v6633_v50 = vor.u32 %v7594_v43, %v6632_v24  ;;  %v6429_v56 = vor.u32 %v7543_v16, %v6428_v47  ;;  %v6860_v24 = vld [vmem:[%s7925_s30 + $0x830] sm:$0xf]  ;;  %v6488_v47 = vld [vmem:[%s7925_s30 + $0x548] sm:$0xf]  ;;  %v7558_v16 = vld [vmem:[%s7925_s30 + $0x550] sm:$0xf0] }
 0x514   : > { %4954 = vmatpush.bf16.msrb.mxu2 %v6237_v31  ;;  %v7552_v31 = vld [vmem:[%s7925_s30 + $0x520] sm:$0xf0] }
 0x515   : > { %4967 = vmatpush.bf16.msrb.mxu3 %v6333_v13  ;;  %v7576_v13 = vld [vmem:[%s7925_s30 + $0x5e0] sm:$0xf0]  ;;  %v6465_v32 = vor.u32 %v7552_v31, %v6464_v59  ;;  %v6416_v59 = vld [vmem:[%s7925_s30 + $0x4b8] sm:$0xf]  ;;  %v6716_v31 = vld [vmem:[%s7925_s30 + $0x710] sm:$0xf] }
 0x516   : > { %4942 = vmatpush.bf16.msra.mxu1 %v6129_v3  ;;  %v7549_v3 = vld [vmem:[%s7925_s30 + $0x508] sm:$0xf0]  ;;  %v6561_v25 = vor.u32 %v7576_v13, %v6560_v60  ;;  %v6608_v13 = vld [vmem:[%s7925_s30 + $0x638] sm:$0xf] }
 0x517   : > { %4930 = vmatpush.bf16.msra.mxu0 %v6021_v62  ;;  %v6644_v62 = vld [vmem:[%s7925_s30 + $0x680] sm:$0xf]  ;;  %v6453_v10 = vor.u32 %v7549_v3, %v6452_v14  ;;  %v7537_v3 = vld [vmem:[%s7925_s30 + $0x4a8] sm:$0xf0] }
 0x518   : > { %4955 = vmatpush.bf16.msrb.mxu2 %v6225_v54  ;;  %v6752_v54 = vld [vmem:[%s7925_s30 + $0x758] sm:$0xf] }
 0x519   : > { %4968 = vmatpush.bf16.msrb.mxu3 %v6321_v9  ;;  %v7597_v9 = vld [vmem:[%s7925_s30 + $0x688] sm:$0xf0]  ;;  %v6753_v15 = vor.u32 %v7624_v17, %v6752_v54  ;;  %v6704_v54 = vld [vmem:[%s7925_s30 + $0x6f8] sm:$0xf]  ;;  %v7612_v17 = vld [vmem:[%s7925_s30 + $0x700] sm:$0xf0] }
 0x51a   : > { %4943 = vmatpush.bf16.msra.mxu1 %v6117_v40  ;;  %v7621_v40 = vld [vmem:[%s7925_s30 + $0x748] sm:$0xf0] }
 0x51b   : > { %4931 = vmatpush.bf16.msra.mxu0 %v6009_v49  ;;  %v7618_v49 = vld [vmem:[%s7925_s30 + $0x730] sm:$0xf0] }
 0x51c   : > { %4956 = vmatpush.bf16.msrb.mxu2 %v6213_v29  ;;  %v6645_v29 = vor.u32 %v7597_v9, %v6644_v62  ;;  %v6729_v58 = vor.u32 %v7618_v49, %v6728_v48  ;;  %v7561_v9 = vld [vmem:[%s7925_s30 + $0x568] sm:$0xf0]  ;;  %v6584_v49 = vld [vmem:[%s7925_s30 + $0x608] sm:$0xf] }
 0x51d   : > { %4969 = vmatpush.bf16.msrb.mxu3 %v6309_v12  ;;  %v6537_v12 = vor.u32 %v7570_v42, %v6536_v41  ;;  %v6692_v41 = vld [vmem:[%s7925_s30 + $0x6e0] sm:$0xf]  ;;  %v7609_v42 = vld [vmem:[%s7925_s30 + $0x6e8] sm:$0xf0] }
 0x51e   : > { %4944 = vmatpush.bf16.msra.mxu1 %v6105_v61  ;;  %4932 = vmatmul.bf16.vlgmr.msra.gmra.mxu0 %v9017_v52  ;;  %v6549_v52 = vor.u32 %v7573_v33, %v6548_v45  ;;  %v4712_v61 = vpop.f32.mrf.mxu0  ;;  %v4725_v60 = vpop.f32.mrf.mxu1  ;;  %v6609_v45 = vor.u32 %v7588_v46, %v6608_v13  ;;  %v6500_v33 = vld [vmem:[%s7925_s30 + $0x560] sm:$0xf]  ;;  %v6693_v51 = vor.u32 %v7609_v42, %v6692_v41  ;;  %v7723_v13 = vld [vmem:[%s7925_s30 + $0xa78] sm:$0xf0]  ;;  %v6920_v42 = vld [vmem:[%s7925_s30 + $0x8a8] sm:$0xf] }
 0x51f   : > { %4976 = vmatpush.bf16.msrb.mxu0 %v6477_v53  ;;  %v7591_v53 = vld [vmem:[%s7925_s30 + $0x658] sm:$0xf0]  ;;  %v4713_v4 = vadd.f32 %v4712_v61, %v9585_v38  ;;  %v6717_v38 = vor.u32 %v7615_v0, %v6716_v31  ;;  %v6501_v43 = vor.u32 %v7561_v9, %v6500_v33  ;;  %v6680_v61 = vld [vmem:[%s7925_s30 + $0x6c8] sm:$0xf]  ;;  %v6489_v31 = vor.u32 %v7558_v16, %v6488_v47  ;;  %v7669_v9 = vld [vmem:[%s7925_s30 + $0x8c8] sm:$0xf0] }
 0x520   : > { %4957 = vmatpush.bf16.msrb.mxu2 %v6201_v63  ;;  %v7540_v63 = vld [vmem:[%s7925_s30 + $0x4c0] sm:$0xf0]  ;;  %v7639_v47 = vld [vmem:[%s7925_s30 + $0x7d8] sm:$0xf0] }
 0x521   : > { %4970 = vmatpush.bf16.msrb.mxu3 %v6297_v27  ;;  %4945 = vmatmul.bf16.vlgmr.msra.gmra.mxu1 %v9021_v18  ;;  %v6741_v18 = vor.u32 %v7621_v40, %v6740_v7  ;;  %v7564_v27 = vld [vmem:[%s7925_s30 + $0x580] sm:$0xf0]  ;;  %v4726_v30 = vadd.f32 %v4725_v60, %v4713_v4  ;;  %v6705_v7 = vor.u32 %v7612_v17, %v6704_v54  ;;  %v6392_v40 = vld [vmem:[%s7925_s30 + $0x488] sm:$0xf]  ;;  %v6848_v4 = vld [vmem:[%s7925_s30 + $0x818] sm:$0xf] }
 0x522   : > { %4989 = vmatpush.bf16.msrb.mxu1 %v6573_v19  ;;  %v4738_v14 = vpop.f32.mrf.mxu2  ;;  %v6836_v54 = vld [vmem:[%s7925_s30 + $0x800] sm:$0xf]  ;;  %v7645_v17 = vld [vmem:[%s7925_s30 + $0x808] sm:$0xf0] }
 0x523   : > { %4977 = vmatpush.bf16.msrb.mxu0 %v6465_v32  ;;  %4958 = vmatmul.bf16.vlgmr.msrb.gmra.mxu2 %v9080_v11  ;;  %v6441_v11 = vor.u32 %v7546_v8, %v6440_v1  ;;  %v6417_v32 = vor.u32 %v7540_v63, %v6416_v59  ;;  %v7606_v63 = vld [vmem:[%s7925_s30 + $0x6d0] sm:$0xf0] }
 0x524   : > { %5002 = vmatpush.bf16.msra.mxu2 %v6669_v20  ;;  %4971 = vmatmul.bf16.vlgmr.msrb.gmra.mxu3 %v9090_v37  ;;  %v6620_v37 = vld [vmem:[%s7925_s30 + $0x650] sm:$0xf]  ;;  %v6512_v20 = vld [vmem:[%s7925_s30 + $0x578] sm:$0xf]  ;;  %v6681_v46 = vor.u32 %v7606_v63, %v6680_v61  ;;  %v7636_v63 = vld [vmem:[%s7925_s30 + $0x7c0] sm:$0xf0] }
 0x525   : > { %5015 = vmatpush.bf16.msra.mxu3 %v6765_v35  ;;  %v6621_v19 = vor.u32 %v7591_v53, %v6620_v37  ;;  %v6404_v35 = vld [vmem:[%s7925_s30 + $0x4a0] sm:$0xf]  ;;  %v7675_v37 = vld [vmem:[%s7925_s30 + $0x8f8] sm:$0xf0]  ;;  %v7052_v53 = vld [vmem:[%s7925_s30 + $0x9b0] sm:$0xf] }
 0x526   : > { %4990 = vmatpush.bf16.msrb.mxu1 %v6561_v25  ;;  %v4739_v25 = vadd.f32 %v4738_v14, %v4726_v30  ;;  %v6405_v8 = vor.u32 %v7537_v3, %v6404_v35  ;;  %v4727_v48 = vpop.f32.mrf.mxu1  ;;  %v6944_v30 = vld [vmem:[%s7925_s30 + $0x8d8] sm:$0xf]  ;;  %v7696_v14 = vld [vmem:[%s7925_s30 + $0x9a0] sm:$0xf0] }
 0x527   : > { %4978 = vmatpush.bf16.msrb.mxu0 %v6453_v10  ;;  %v4751_v62 = vpop.f32.mrf.mxu3  ;;  %v6596_v10 = vld [vmem:[%s7925_s30 + $0x620] sm:$0xf]  ;;  %v7040_v35 = vld [vmem:[%s7925_s30 + $0x998] sm:$0xf]  ;;  %v7112_v48 = vld [vmem:[%s7925_s30 + $0xa28] sm:$0xf] }
 0x528   : > { %5003 = vmatpush.bf16.msra.mxu2 %v6657_v39  ;;  %v6513_v39 = vor.u32 %v7564_v27, %v6512_v20  ;;  %v9659_v1 = vadd.f32 %v4751_v62, %v4739_v25  ;;  %v7148_v27 = vld [vmem:[%s7925_s30 + $0xa70] sm:$0xf]  ;;  %v7041_v33 = vor.u32 %v7696_v14, %v7040_v35  ;;  %v6932_v62 = vld [vmem:[%s7925_s30 + $0x8c0] sm:$0xf]  ;;  %v6800_v61 = vld [vmem:[%s7925_s30 + $0x7b8] sm:$0xf] }
 0x529   : > { %5016 = vmatpush.bf16.msra.mxu3 %v6753_v15  ;;  %v7585_v15 = vld [vmem:[%s7925_s30 + $0x628] sm:$0xf0]  ;;  %v7149_v3 = vor.u32 %v7723_v13, %v7148_v27  ;;  %v7660_v27 = vld [vmem:[%s7925_s30 + $0x880] sm:$0xf0]  ;;  %v6801_v13 = vor.u32 %v7636_v63, %v6800_v61  ;;  %v6788_v35 = vld [vmem:[%s7925_s30 + $0x7a0] sm:$0xf] }
 0x52a   : > { %4991 = vmatpush.bf16.msrb.mxu1 %v6549_v52  ;;  %v7534_v52 = vld [vmem:[%s7925_s30 + $0x490] sm:$0xf0]  ;;  %v7633_v14 = vld [vmem:[%s7925_s30 + $0x7a8] sm:$0xf0] }
 0x52b   : > { %4979 = vmatpush.bf16.msrb.mxu0 %v6441_v11  ;;  %v6597_v11 = vor.u32 %v7585_v15, %v6596_v10  ;;  %v6393_v2 = vor.u32 %v7534_v52, %v6392_v40  ;;  %v6837_v10 = vor.u32 %v7645_v17, %v6836_v54  ;;  %v7028_v15 = vld [vmem:[%s7925_s30 + $0x980] sm:$0xf]  ;;  %v7642_v40 = vld [vmem:[%s7925_s30 + $0x7f0] sm:$0xf0]  ;;  %v6933_v52 = vor.u32 %v7669_v9, %v6932_v62  ;;  %v7088_v17 = vld [vmem:[%s7925_s30 + $0x9f8] sm:$0xf] }
 0x52c   : > { %5004 = vmatpush.bf16.msra.mxu2 %v6645_v29  ;;  %v4714_v29 = vpop.f32.mrf.mxu0  ;;  %v7657_v62 = vld [vmem:[%s7925_s30 + $0x868] sm:$0xf0]  ;;  %v6789_v9 = vor.u32 %v7633_v14, %v6788_v35 }
 0x52d   : > { %5017 = vmatpush.bf16.msra.mxu3 %v6741_v18  ;;  %v7651_v18 = vld [vmem:[%s7925_s30 + $0x838] sm:$0xf0]  ;;  %v7717_v29 = vld [vmem:[%s7925_s30 + $0xa48] sm:$0xf0] }
 0x52e   : > { %4992 = vmatpush.bf16.msrb.mxu1 %v6537_v12  ;;  %v7582_v12 = vld [vmem:[%s7925_s30 + $0x610] sm:$0xf0]  ;;  %v6861_v59 = vor.u32 %v7651_v18, %v6860_v24 }
 0x52f   : > { %4980 = vmatpush.bf16.msrb.mxu0 %v6429_v56  ;;  %v7699_v56 = vld [vmem:[%s7925_s30 + $0x9b8] sm:$0xf0]  ;;  %v6585_v0 = vor.u32 %v7582_v12, %v6584_v49  ;;  %v7666_v24 = vld [vmem:[%s7925_s30 + $0x8b0] sm:$0xf0] }
 0x530   : > { %5005 = vmatpush.bf16.msra.mxu2 %v6633_v50  ;;  %v6956_v50 = vld [vmem:[%s7925_s30 + $0x8f0] sm:$0xf]  ;;  %v7053_v60 = vor.u32 %v7699_v56, %v7052_v53  ;;  %v6921_v16 = vor.u32 %v7666_v24, %v6920_v42  ;;  %v7714_v49 = vld [vmem:[%s7925_s30 + $0xa30] sm:$0xf0]  ;;  %v7687_v56 = vld [vmem:[%s7925_s30 + $0x958] sm:$0xf0] }
 0x531   : > { %5018 = vmatpush.bf16.msra.mxu3 %v6729_v58  ;;  %v4740_v58 = vpop.f32.mrf.mxu2  ;;  %v6957_v20 = vor.u32 %v7675_v37, %v6956_v50  ;;  %v6908_v50 = vld [vmem:[%s7925_s30 + $0x890] sm:$0xf]  ;;  %v7747_v42 = vld [vmem:[%s7925_s30 + $0xb38] sm:$0xf0] }
 0x532   : > { %4993 = vmatpush.bf16.msrb.mxu1 %v6525_v5  ;;  %v7648_v5 = vld [vmem:[%s7925_s30 + $0x820] sm:$0xf0]  ;;  %v7004_v53 = vld [vmem:[%s7925_s30 + $0x950] sm:$0xf] }
 0x533   : > { %4981 = vmatpush.bf16.msrb.mxu0 %v6417_v32  ;;  %v7672_v32 = vld [vmem:[%s7925_s30 + $0x8e0] sm:$0xf0] }
 0x534   : > { %5006 = vmatpush.bf16.msra.mxu2 %v6621_v19  ;;  %v4753_v19 = vpop.f32.mrf.mxu3  ;;  %v6945_v25 = vor.u32 %v7672_v32, %v6944_v30  ;;  %v7684_v30 = vld [vmem:[%s7925_s30 + $0x940] sm:$0xf0] }
 0x535   : > { %5019 = vmatpush.bf16.msra.mxu3 %v6717_v38  ;;  %v6849_v38 = vor.u32 %v7648_v5, %v6848_v4  ;;  %v7100_v4 = vld [vmem:[%s7925_s30 + $0xa10] sm:$0xf]  ;;  %v7711_v5 = vld [vmem:[%s7925_s30 + $0xa18] sm:$0xf0] }
 0x536   : > { %4994 = vmatpush.bf16.msrb.mxu1 %v6513_v39  ;;  %v7136_v39 = vld [vmem:[%s7925_s30 + $0xa58] sm:$0xf] }
 0x537   : > { %4982 = vmatpush.bf16.msrb.mxu0 %v6405_v8  ;;  %v7693_v8 = vld [vmem:[%s7925_s30 + $0x988] sm:$0xf0] }
 0x538   : > { %5007 = vmatpush.bf16.msra.mxu2 %v6609_v45  ;;  %v7720_v45 = vld [vmem:[%s7925_s30 + $0xa60] sm:$0xf0]  ;;  %v7029_v41 = vor.u32 %v7693_v8, %v7028_v15  ;;  %v7681_v15 = vld [vmem:[%s7925_s30 + $0x928] sm:$0xf0] }
 0x539   : > { %5020 = vmatpush.bf16.msra.mxu3 %v6705_v7  ;;  %v7137_v7 = vor.u32 %v7720_v45, %v7136_v39 }
 0x53a   : > { %4995 = vmatpush.bf16.msrb.mxu1 %v6501_v43  ;;  %v7016_v43 = vld [vmem:[%s7925_s30 + $0x968] sm:$0xf] }
 0x53b   : > { %4983 = vmatpush.bf16.msrb.mxu0 %v6393_v2  ;;  %v7663_v2 = vld [vmem:[%s7925_s30 + $0x898] sm:$0xf0] }
 0x53c   : > { %5008 = vmatpush.bf16.msra.mxu2 %v6597_v11  ;;  %v7690_v11 = vld [vmem:[%s7925_s30 + $0x970] sm:$0xf0] }
 0x53d   : > { %5021 = vmatpush.bf16.msra.mxu3 %v6693_v51  ;;  %v7017_v12 = vor.u32 %v7690_v11, %v7016_v43  ;;  %v4764_v51 = vpop.f32.mrf.mxu0  ;;  %v6872_v43 = vld [vmem:[%s7925_s30 + $0x848] sm:$0xf]  ;;  %v7654_v11 = vld [vmem:[%s7925_s30 + $0x850] sm:$0xf0] }
 0x53e   : > { %4996 = vmatpush.bf16.msrb.mxu1 %v6489_v31  ;;  %4984 = vmatmul.bf16.vlgmr.msrb.gmra.mxu0 %v9075_v34  ;;  %v6824_v34 = vld [vmem:[%s7925_s30 + $0x7e8] sm:$0xf]  ;;  %v4765_v58 = vadd.f32 %v4764_v51, %v9659_v1  ;;  %v4777_v31 = vpop.f32.mrf.mxu1 }
 0x53f   : > { %5028 = vmatpush.bf16.msra.mxu0 %v6861_v59  ;;  %v7113_v59 = vor.u32 %v7714_v49, %v7112_v48  ;;  %v7064_v51 = vld [vmem:[%s7925_s30 + $0x9c8] sm:$0xf] }
 0x540   : > { %5009 = vmatpush.bf16.msra.mxu2 %v6585_v0  ;;  %v6909_v0 = vor.u32 %v7663_v2, %v6908_v50  ;;  %v4778_v19 = vadd.f32 %v4777_v31, %v4765_v58  ;;  %v7750_v50 = vld [vmem:[%s7925_s30 + $0xb50] sm:$0xf0]  ;;  %v6873_v2 = vor.u32 %v7654_v11, %v6872_v43  ;;  %v7232_v58 = vld [vmem:[%s7925_s30 + $0xb18] sm:$0xf] }
 0x541   : > { %5022 = vmatpush.bf16.msra.mxu3 %v6681_v46  ;;  %4997 = vmatmul.bf16.vlgmr.msrb.gmra.mxu1 %v9082_v57  ;;  %v6825_v57 = vor.u32 %v7642_v40, %v6824_v34  ;;  %v6992_v46 = vld [vmem:[%s7925_s30 + $0x938] sm:$0xf]  ;;  %v6776_v34 = vld [vmem:[%s7925_s30 + $0x788] sm:$0xf]  ;;  %v7630_v40 = vld [vmem:[%s7925_s30 + $0x790] sm:$0xf0] }
 0x542   : > { %5041 = vmatpush.bf16.msra.mxu1 %v6957_v20  ;;  %v7005_v20 = vor.u32 %v7687_v56, %v7004_v53  ;;  %v4790_v1 = vpop.f32.mrf.mxu2  ;;  %v6993_v45 = vor.u32 %v7684_v30, %v6992_v46 }
 0x543   : > { %5029 = vmatpush.bf16.msra.mxu0 %v6849_v38  ;;  %5010 = vmatmul.bf16.vlgmr.msra.gmra.mxu2 %v9156_v44  ;;  %v7124_v44 = vld [vmem:[%s7925_s30 + $0xa40] sm:$0xf]  ;;  %v4791_v32 = vadd.f32 %v4790_v1, %v4778_v19  ;;  %v7101_v38 = vor.u32 %v7711_v5, %v7100_v4  ;;  %v7741_v4 = vld [vmem:[%s7925_s30 + $0xb08] sm:$0xf0]  ;;  %v7208_v19 = vld [vmem:[%s7925_s30 + $0xae8] sm:$0xf] }
 0x544   : > { %5054 = vmatpush.bf16.msrb.mxu2 %v7053_v60  ;;  %5023 = vmatmul.bf16.vlgmr.msra.gmra.mxu3 %v9170_v6  ;;  %v7125_v18 = vor.u32 %v7717_v29, %v7124_v44  ;;  %v6812_v6 = vld [vmem:[%s7925_s30 + $0x7d0] sm:$0xf]  ;;  %v6896_v60 = vld [vmem:[%s7925_s30 + $0x878] sm:$0xf]  ;;  %v7705_v29 = vld [vmem:[%s7925_s30 + $0x9e8] sm:$0xf0] }
 0x545   : > { %5067 = vmatpush.bf16.msrb.mxu3 %v7149_v3  ;;  %v6813_v37 = vor.u32 %v7639_v47, %v6812_v6  ;;  %v6897_v54 = vor.u32 %v7660_v27, %v6896_v60  ;;  %v4766_v8 = vpop.f32.mrf.mxu0  ;;  %v6968_v6 = vld [vmem:[%s7925_s30 + $0x908] sm:$0xf]  ;;  %v7678_v47 = vld [vmem:[%s7925_s30 + $0x910] sm:$0xf0]  ;;  %v7196_v1 = vld [vmem:[%s7925_s30 + $0xad0] sm:$0xf] }
 0x546   : > { %5042 = vmatpush.bf16.msra.mxu1 %v6945_v25  ;;  %v7708_v25 = vld [vmem:[%s7925_s30 + $0xa00] sm:$0xf0]  ;;  %v4779_v24 = vpop.f32.mrf.mxu1  ;;  %v6969_v56 = vor.u32 %v7678_v47, %v6968_v6 }
 0x547   : > { %5030 = vmatpush.bf16.msra.mxu0 %v6837_v10  ;;  %v4803_v3 = vpop.f32.mrf.mxu3  ;;  %v6980_v10 = vld [vmem:[%s7925_s30 + $0x920] sm:$0xf] }
 0x548   : > { %5055 = vmatpush.bf16.msrb.mxu2 %v7041_v33  ;;  %v9726_v39 = vadd.f32 %v4803_v3, %v4791_v32  ;;  %v6884_v33 = vld [vmem:[%s7925_s30 + $0x860] sm:$0xf]  ;;  %v7732_v32 = vld [vmem:[%s7925_s30 + $0xac0] sm:$0xf0] }
 0x549   : > { %5068 = vmatpush.bf16.msrb.mxu3 %v7137_v7  ;;  %v7089_v7 = vor.u32 %v7708_v25, %v7088_v17  ;;  %v6885_v44 = vor.u32 %v7657_v62, %v6884_v33  ;;  %v7172_v3 = vld [vmem:[%s7925_s30 + $0xaa0] sm:$0xf]  ;;  %v7160_v33 = vld [vmem:[%s7925_s30 + $0xa88] sm:$0xf]  ;;  %v7726_v62 = vld [vmem:[%s7925_s30 + $0xa90] sm:$0xf0] }
 0x54a   : > { %5043 = vmatpush.bf16.msra.mxu1 %v6933_v52  ;;  %v7076_v52 = vld [vmem:[%s7925_s30 + $0x9e0] sm:$0xf] }
 0x54b   : > { %5031 = vmatpush.bf16.msra.mxu0 %v6825_v57  ;;  %v6981_v57 = vor.u32 %v7681_v15, %v6980_v10  ;;  %v7077_v48 = vor.u32 %v7705_v29, %v7076_v52  ;;  %v7161_v10 = vor.u32 %v7726_v62, %v7160_v33 }
 0x54c   : > { %5056 = vmatpush.bf16.msrb.mxu2 %v7029_v41  ;;  %v7244_v41 = vld [vmem:[%s7925_s30 + $0xb30] sm:$0xf] }
 0x54d   : > { %5069 = vmatpush.bf16.msrb.mxu3 %v7125_v18  ;;  %v6777_v18 = vor.u32 %v7630_v40, %v6776_v34  ;;  %v7245_v49 = vor.u32 %v7747_v42, %v7244_v41 }
 0x54e   : > { %5044 = vmatpush.bf16.msra.mxu1 %v6921_v16  ;;  %v4792_v16 = vpop.f32.mrf.mxu2 }
 0x54f   : > { %5032 = vmatpush.bf16.msra.mxu0 %v6813_v37  ;;  %v7702_v37 = vld [vmem:[%s7925_s30 + $0x9d0] sm:$0xf0]  ;;  %v4805_v53 = vpop.f32.mrf.mxu3 }
 0x550   : > { %5057 = vmatpush.bf16.msrb.mxu2 %v7017_v12  ;;  %v7256_v12 = vld [vmem:[%s7925_s30 + $0xb48] sm:$0xf]  ;;  %v7065_v63 = vor.u32 %v7702_v37, %v7064_v51 }
 0x551   : > { %5070 = vmatpush.bf16.msrb.mxu3 %v7113_v59  ;;  %v7744_v59 = vld [vmem:[%s7925_s30 + $0xb20] sm:$0xf0]  ;;  %v7257_v61 = vor.u32 %v7750_v50, %v7256_v12 }
 0x552   : > { %5045 = vmatpush.bf16.msra.mxu1 %v6909_v0  ;;  %v7233_v31 = vor.u32 %v7744_v59, %v7232_v58  ;;  %v7220_v0 = vld [vmem:[%s7925_s30 + $0xb00] sm:$0xf] }
 0x553   : > { %5033 = vmatpush.bf16.msra.mxu0 %v6801_v13  ;;  %v7221_v5 = vor.u32 %v7741_v4, %v7220_v0 }
 0x554   : > { %5058 = vmatpush.bf16.msrb.mxu2 %v7005_v20  ;;  %v7738_v20 = vld [vmem:[%s7925_s30 + $0xaf0] sm:$0xf0] }
 0x555   : > { %5071 = vmatpush.bf16.msrb.mxu3 %v7101_v38  ;;  %v7209_v60 = vor.u32 %v7738_v20, %v7208_v19 }
 0x556   : > { %5046 = vmatpush.bf16.msra.mxu1 %v6897_v54  ;;  %v7729_v54 = vld [vmem:[%s7925_s30 + $0xaa8] sm:$0xf0] }
 0x557   : > { %5034 = vmatpush.bf16.msra.mxu0 %v6789_v9 }
 0x558   : > { %5059 = vmatpush.bf16.msrb.mxu2 %v6993_v45  ;;  %v7173_v45 = vor.u32 %v7729_v54, %v7172_v3 }
 0x559   : > { %5072 = vmatpush.bf16.msrb.mxu3 %v7089_v7 }
 0x55a   : > { %5047 = vmatpush.bf16.msra.mxu1 %v6885_v44 }
 0x55b   : > { %5035 = vmatpush.bf16.msra.mxu0 %v6777_v18 }
 0x55c   : > { %5060 = vmatpush.bf16.msrb.mxu2 %v6981_v57 }
 0x55d   : > { %5073 = vmatpush.bf16.msrb.mxu3 %v7077_v48 }
 0x55e   : > { %5048 = vmatpush.bf16.msra.mxu1 %v6873_v2  ;;  %5036 = vmatmul.bf16.vlgmr.msra.gmra.mxu0 %v9160_v55  ;;  %v4816_v55 = vpop.f32.mrf.mxu0  ;;  %v4829_v13 = vpop.f32.mrf.mxu1 }
 0x55f   : > { %5080 = vmatpush.bf16.msrb.mxu0 %v7245_v49  ;;  %v4817_v27 = vadd.f32 %v4816_v55, %v9726_v39 }
 0x560   : > { %5061 = vmatpush.bf16.msrb.mxu2 %v6969_v56 }
 0x561   : > { %5049 = vmatmul.bf16.vlgmr.msra.gmra.mxu1 %v9168_v26  ;;  %5074 = vmatpush.bf16.msrb.mxu3 %v7065_v63  ;;  %v7735_v26 = vld [vmem:[%s7925_s30 + $0xad8] sm:$0xf0]  ;;  %v4830_v46 = vadd.f32 %v4829_v13, %v4817_v27 }
 0x562   : > { %5100 = vmatpush.bf16.msrb.mxu1 %v7257_v61  ;;  %v7197_v30 = vor.u32 %v7735_v26, %v7196_v1  ;;  %v4842_v38 = vpop.f32.mrf.mxu2 }
 0x563   : > { %5081 = vmatpush.bf16.msrb.mxu0 %v7233_v31  ;;  %5062 = vmatmul.bf16.vlgmr.msrb.gmra.mxu2 %v9243_v22  ;;  %v7184_v22 = vld [vmem:[%s7925_s30 + $0xab8] sm:$0xf]  ;;  %v4843_v35 = vadd.f32 %v4842_v38, %v4830_v46 }
 0x564   : > { %5075 = vmatmul.bf16.vlgmr.msrb.gmra.mxu3 %v9252_v28  ;;  %v7185_v28 = vor.u32 %v7732_v32, %v7184_v22 }
 0x566   : > { %v4818_v14 = vpop.f32.mrf.mxu0  ;;  %v4831_v25 = vpop.f32.mrf.mxu1 }
 0x567   : > { %5082 = vmatpush.bf16.msrb.mxu0 %v7221_v5  ;;  %v4855_v17 = vpop.f32.mrf.mxu3 }
 0x568   : > { %v4856_v39 = vadd.f32 %v4855_v17, %v4843_v35 }
 0x56a   : > { %v4844_v9 = vpop.f32.mrf.mxu2 }
 0x56b   : > { %5083 = vmatpush.bf16.msrb.mxu0 %v7209_v60 }
 0x56f   : > { %5084 = vmatpush.bf16.msrb.mxu0 %v7197_v30  ;;  %v4857_v15 = vpop.f32.mrf.mxu3 }
 0x571   : > { %7260 = vmatmul.msk.bf16.vlgmr.msrb.gmra.mxu1 %vm4478_vm4, %v9209_v23 }
 0x572   : > { %v4894_v8 = vpop.f32.mrf.mxu2 }
 0x573   : > { %5085 = vmatpush.bf16.msrb.mxu0 %v7185_v28 }
 0x577   : > { %5086 = vmatpush.bf16.msrb.mxu0 %v7173_v45  ;;  %v2057_v45 = vld [vmem:[#allocation3] sm:$0x7] }
 0x57a   : > { %v4896_v34 = vpop.f32.mrf.mxu2 }
 0x57b   : > { %5087 = vmatpush.bf16.msrb.mxu0 %v7161_v10  ;;  %v4868_v7 = vpop.f32.mrf.mxu0 }
 0x57c   : > { %v4869_v40 = vadd.f32 %v4868_v7, %v4856_v39  ;;  %v5117_v39 = vlaneseq }
 0x57e   : > { %5088 = vmatmul.bf16.vlgmr.msrb.gmra.mxu0 %v9248_v21  ;;  %v4881_v52 = vpop.f32.mrf.mxu1  ;;  %vm5119_vm7 = vcmp.lt.s32.totalorder %v5117_v39, 345 }
 0x57f   : > { %v4882_v44 = vadd.f32 %v4881_v52, %v4869_v40 }
 0x581   : > { %v4895_v29 = vadd.f32 %v4894_v8, %v4882_v44 }
 0x583   : > { %v5109_v23 = vrot.slane %v4895_v29, 7  ;;  %v4870_v41 = vpop.f32.mrf.mxu0 }
 0x585   : > { %v5112_v42 = vsel %vm5111_vm5, %v9582_v36, %v5109_v23 }
 0x586   : > { %v4907_v24 = vpop.f32.mrf.mxu2  ;;  %v4883_v57 = vpop.f32.mrf.mxu1 }
 0x587   : > { %v4920_v43 = vpop.f32.mrf.mxu3 }
 0x588   : > { %v4921_v11 = vadd.f32 %v4920_v43, %v4907_v24 }
 0x58e   : > { %v4909_v18 = vpop.f32.mrf.mxu2 }
 0x58f   : > { %v4922_v6 = vpop.f32.mrf.mxu3 }
 0x59b   : > { %v4933_v47 = vpop.f32.mrf.mxu0 }
 0x59c   : > { %v4934_v61 = vadd.f32 %v4933_v47, %v4921_v11 }
 0x59e   : > { %v4946_v21 = vpop.f32.mrf.mxu1 }
 0x59f   : > { %v4947_v31 = vadd.f32 %v4946_v21, %v4934_v61 }
 0x5a3   : > { %v4935_v48 = vpop.f32.mrf.mxu0 }
 0x5a6   : > { %v4959_v16 = vpop.f32.mrf.mxu2  ;;  %v4948_v12 = vpop.f32.mrf.mxu1 }
 0x5a7   : > { %v4972_v49 = vpop.f32.mrf.mxu3  ;;  %v4960_v0 = vadd.f32 %v4959_v16, %v4947_v31 }
 0x5a9   : > { %v4973_v5 = vadd.f32 %v4972_v49, %v4960_v0 }
 0x5ae   : > { %v4961_v50 = vpop.f32.mrf.mxu2 }
 0x5af   : > { %v4974_v2 = vpop.f32.mrf.mxu3 }
 0x5bb   : > { %v4985_v51 = vpop.f32.mrf.mxu0 }
 0x5bc   : > { %v4986_v20 = vadd.f32 %v4985_v51, %v4973_v5 }
 0x5be   : > { %v4998_v37 = vpop.f32.mrf.mxu1 }
 0x5bf   : > { %v4999_v60 = vadd.f32 %v4998_v37, %v4986_v20 }
 0x5c3   : > { %v4987_v56 = vpop.f32.mrf.mxu0 }
 0x5c6   : > { %v5011_v53 = vpop.f32.mrf.mxu2  ;;  %v5000_v36 = vpop.f32.mrf.mxu1 }
 0x5c7   : > { %v5024_v58 = vpop.f32.mrf.mxu3  ;;  %v5012_v13 = vadd.f32 %v5011_v53, %v4999_v60 }
 0x5c9   : > { %v5025_v46 = vadd.f32 %v5024_v58, %v5012_v13 }
 0x5ce   : > { %v5013_v59 = vpop.f32.mrf.mxu2 }
 0x5cf   : > { %v5026_v63 = vpop.f32.mrf.mxu3 }
 0x5db   : > { %v5037_v4 = vpop.f32.mrf.mxu0 }
 0x5dc   : > { %v5038_v32 = vadd.f32 %v5037_v4, %v5025_v46 }
 0x5de   : > { %v5050_v19 = vpop.f32.mrf.mxu1 }
 0x5df   : > { %v5051_v35 = vadd.f32 %v5050_v19, %v5038_v32 }
 0x5e3   : > { %v5039_v55 = vpop.f32.mrf.mxu0 }
 0x5e6   : > { %v5063_v27 = vpop.f32.mrf.mxu2  ;;  %v5052_v1 = vpop.f32.mrf.mxu1 }
 0x5e7   : > { %v5076_v26 = vpop.f32.mrf.mxu3  ;;  %v5064_v28 = vadd.f32 %v5063_v27, %v5051_v35 }
 0x5e9   : > { %v5077_v3 = vadd.f32 %v5076_v26, %v5064_v28 }
 0x5ee   : > { %v5065_v30 = vpop.f32.mrf.mxu2  ;;  %v5102_v22 = vpop.f32.mrf.mxu1 }
 0x5ef   : > { %v5078_v38 = vpop.f32.mrf.mxu3 }
 0x5f6   : > { %v5104_v14 = vpop.f32.mrf.mxu1 }
 0x5fb   : > { %v5089_v54 = vpop.f32.mrf.mxu0 }
 0x5fc   : > { %v5090_v17 = vadd.f32 %v5089_v54, %v5077_v3 }
 0x5fe   : > { %v5103_v25 = vadd.f32 %v5102_v22, %v5090_v17 }
 0x600   : > { %v5110_v33 = vrot.slane %v5103_v25, 6 }
 0x601   : > { %5125 = sbr.rel (%p7261_p5) target bundleno = 1707 (0x6ab), region = 56 }
 0x602   : > { %v5114_v62 = vsel %vm5113_vm6, %v5112_v42, %v5110_v33 }
 0x603   : > { %v5116_v9 = vadd.f32 %v5114_v62, %v2057_v45  ;;  %v5091_v10 = vpop.f32.mrf.mxu0 }
 0x605   : > { %5121 = vst.msk [vmem:[#allocation3] sm:$0x7] %vm5119_vm7, %v5116_v9 }
 0x606   : > { %v5145_v15 = vld [vmem:[%s9922_s5 + $0x78] sm:$0xff]  ;;  %v5144_v8 = vld [vmem:[%s9922_s5 + $0x70] sm:$0xff]  ;;  %v5143_v40 = vld [vmem:[%s9922_s5 + $0x68] sm:$0xff]  ;;  %vm5181_vm10 = vcmask 728064   ;;  %vm5247_vm12 = vcmask 8192  }
 0x607   : > { %v5161_v7 = vld [vmem:[%s9922_s5 + $0xf8] sm:$0xff]  ;;  %5187 = vmatpush.msra.mxu0 %v5145_v15  ;;  %v5160_v34 = vld [vmem:[%s9922_s5 + $0xf0] sm:$0xff]  ;;  %v5159_v52 = vld [vmem:[%s9922_s5 + $0xe8] sm:$0xff] }
 0x608   : > { %5207 = vmatpush.msra.mxu1 %v5161_v7  ;;  %v5173_v44 = vld [vmem:[%s9922_s5 + $0x158] sm:$0x1]  ;;  %v5172_v29 = vld [vmem:[%s9922_s5 + $0x150] sm:$0xff]  ;;  %v5142_v23 = vld [vmem:[%s9922_s5 + $0x60] sm:$0xff] }
 0x609   : > { %5188 = vmatpush.msra.mxu0 %v5144_v8  ;;  %7262 = vmatpush.msk.msra.mxu2 %vm5111_vm5, %v5173_v44  ;;  %v5158_v41 = vld [vmem:[%s9922_s5 + $0xe0] sm:$0xff]  ;;  %v5171_v42 = vld [vmem:[%s9922_s5 + $0x148] sm:$0xff]  ;;  %v5141_v24 = vld [vmem:[%s9922_s5 + $0x58] sm:$0xff] }
 0x60a   : > { %5208 = vmatpush.msra.mxu1 %v5160_v34  ;;  %v5157_v57 = vld [vmem:[%s9922_s5 + $0xd8] sm:$0xff]  ;;  %v5170_v43 = vld [vmem:[%s9922_s5 + $0x140] sm:$0xff]  ;;  %v5140_v11 = vld [vmem:[%s9922_s5 + $0x50] sm:$0xff] }
 0x60b   : > { %5189 = vmatpush.msra.mxu0 %v5143_v40  ;;  %5232 = vmatpush.msra.mxu2 %v5172_v29  ;;  %v5156_v18 = vld [vmem:[%s9922_s5 + $0xd0] sm:$0xff]  ;;  %v5169_v6 = vld [vmem:[%s9922_s5 + $0x138] sm:$0xff]  ;;  %v5139_v47 = vld [vmem:[%s9922_s5 + $0x48] sm:$0xff] }
 0x60c   : > { %5209 = vmatpush.msra.mxu1 %v5159_v52  ;;  %v5155_v21 = vld [vmem:[%s9922_s5 + $0xc8] sm:$0xff]  ;;  %v5168_v16 = vld [vmem:[%s9922_s5 + $0x130] sm:$0xff]  ;;  %v5138_v48 = vld [vmem:[%s9922_s5 + $0x40] sm:$0xff] }
 0x60d   : > { %5190 = vmatpush.msra.mxu0 %v5142_v23  ;;  %5233 = vmatpush.msra.mxu2 %v5171_v42  ;;  %v5154_v49 = vld [vmem:[%s9922_s5 + $0xc0] sm:$0xff]  ;;  %v5167_v12 = vld [vmem:[%s9922_s5 + $0x128] sm:$0xff]  ;;  %v5137_v2 = vld [vmem:[%s9922_s5 + $0x38] sm:$0xff] }
 0x60e   : > { %5210 = vmatpush.msra.mxu1 %v5158_v41  ;;  %v5126_v50 = vld [vmem:[#allocation3] sm:$0x7]  ;;  %v5153_v51 = vld [vmem:[%s9922_s5 + $0xb8] sm:$0xff]  ;;  %v5127_v37 = vld [vmem:[%s9921_s4] sm:$0x7] }
 0x60f   : > { %5191 = vmatpush.msra.mxu0 %v5141_v24  ;;  %5234 = vmatpush.msra.mxu2 %v5170_v43  ;;  %v5166_v53 = vld [vmem:[%s9922_s5 + $0x120] sm:$0xff]  ;;  %v5136_v56 = vld [vmem:[%s9922_s5 + $0x30] sm:$0xff]  ;;  %v5128_v36 = vadd.f32 %v5127_v37, %v5126_v50  ;;  %v5165_v59 = vld [vmem:[%s9922_s5 + $0x118] sm:$0xff] }
 0x610   : > { %5211 = vmatpush.msra.mxu1 %v5157_v57  ;;  %v5152_v58 = vld [vmem:[%s9922_s5 + $0xb0] sm:$0xff]  ;;  %v5135_v61 = vld [vmem:[%s9922_s5 + $0x28] sm:$0xff]  ;;  %v5134_v0 = vld [vmem:[%s9922_s5 + $0x20] sm:$0xff] }
 0x611   : > { %5192 = vmatpush.msra.mxu0 %v5140_v11  ;;  %5235 = vmatpush.msra.mxu2 %v5169_v6  ;;  %v5151_v63 = vld [vmem:[%s9922_s5 + $0xa8] sm:$0xff]  ;;  %v5164_v31 = vld [vmem:[%s9922_s5 + $0x110] sm:$0xff]  ;;  %v5150_v4 = vld [vmem:[%s9922_s5 + $0xa0] sm:$0xff]  ;;  %v5129_v5 = vmax.f32 %v5128_v36, 0.0 }
 0x612   : > { %5212 = vmatpush.msra.mxu1 %v5156_v18  ;;  %v5163_v19 = vld [vmem:[%s9922_s5 + $0x108] sm:$0xff]  ;;  %v5133_v20 = vld [vmem:[%s9922_s5 + $0x18] sm:$0xff]  ;;  %v5162_v60 = vld [vmem:[%s9922_s5 + $0x100] sm:$0xff] }
 0x613   : > { %5193 = vmatpush.msra.mxu0 %v5139_v47  ;;  %5236 = vmatpush.msra.mxu2 %v5168_v16  ;;  %v5149_v55 = vld [vmem:[%s9922_s5 + $0x98] sm:$0xff]  ;;  %v5132_v27 = vld [vmem:[%s9922_s5 + $0x10] sm:$0xff]  ;;  %v5178_v26 = vperm.slane %v5129_v5, 2  ;;  %v5131_v13 = vld [vmem:[%s9922_s5 + $0x8] sm:$0xff]  ;;  %v5176_v22 = vperm.slane %v5129_v5, 0  ;;  %v5177_v38 = vperm.slane %v5129_v5, 1 }
 0x614   : > { %5213 = vmatpush.msra.mxu1 %v5155_v21  ;;  %v5148_v1 = vld [vmem:[%s9922_s5 + $0x90] sm:$0xff]  ;;  %v5147_v46 = vld [vmem:[%s9922_s5 + $0x88] sm:$0xff]  ;;  %v5130_v30 = vld [vmem:[%s9922_s5] sm:$0xff] }
 0x615   : > { %5194 = vmatpush.msra.mxu0 %v5138_v48  ;;  %5237 = vmatpush.msra.mxu2 %v5167_v12  ;;  %v5146_v32 = vld [vmem:[%s9922_s5 + $0x80] sm:$0xff] }
 0x616   : > { %5214 = vmatpush.msra.mxu1 %v5154_v49  ;;  %v5174_v35 = vld [vmem:[%s9923_s6] sm:$0x1] }
 0x617   : > { %5195 = vmatpush.msra.mxu0 %v5137_v2  ;;  %5238 = vmatpush.msra.mxu2 %v5166_v53 }
 0x618   : > { %5215 = vmatpush.msra.mxu1 %v5153_v51 }
 0x619   : > { %5196 = vmatpush.msra.mxu0 %v5136_v56  ;;  %5239 = vmatpush.msra.mxu2 %v5165_v59 }
 0x61a   : > { %5216 = vmatpush.msra.mxu1 %v5152_v58 }
 0x61b   : > { %5197 = vmatpush.msra.mxu0 %v5135_v61  ;;  %5240 = vmatpush.msra.mxu2 %v5164_v31 }
 0x61c   : > { %5217 = vmatpush.msra.mxu1 %v5151_v63 }
 0x61d   : > { %5198 = vmatpush.msra.mxu0 %v5134_v0  ;;  %5241 = vmatpush.msra.mxu2 %v5163_v19 }
 0x61e   : > { %5218 = vmatpush.msra.mxu1 %v5150_v4 }
 0x61f   : > { %5199 = vmatpush.msra.mxu0 %v5133_v20  ;;  %5242 = vmatpush.msra.mxu2 %v5162_v60 }
 0x620   : > { %5219 = vmatpush.msra.mxu1 %v5149_v55  ;;  %7263 = vmatmul.msk.f32.vlgmr.msra.gmra.mxu2 %vm5181_vm10, %v5178_v26 }
 0x621   : > { %5200 = vmatpush.msra.mxu0 %v5132_v27 }
 0x622   : > { %5220 = vmatpush.msra.mxu1 %v5148_v1 }
 0x623   : > { %5201 = vmatpush.msra.mxu0 %v5131_v13 }
 0x624   : > { %5221 = vmatpush.msra.mxu1 %v5147_v46 }
 0x625   : > { %5202 = vmatpush.msra.mxu0 %v5130_v30 }
 0x626   : > { %5222 = vmatpush.msra.mxu1 %v5146_v32  ;;  %5203 = vmatmul.f32.vlgmr.msra.gmra.mxu0 %v5176_v22 }
 0x627   : > { %5223 = vmatmul.f32.vlgmr.msra.gmra.mxu1 %v5177_v38 }
 0x6a3   : > { %v5204_v28 = vpop.f32.mrf.mxu0  ;;  %v5244_v54 = vpop.f32.mrf.mxu2 }
 0x6a4   : > { %v5224_v14 = vpop.f32.mrf.mxu1  ;;  %v5205_v3 = vadd.f32 %v5204_v28, %v5174_v35 }
 0x6a6   : > { %v5225_v17 = vadd.f32 %v5224_v14, %v5205_v3 }
 0x6a8   : > { %v5245_v25 = vadd.f32 %v5244_v54, %v5225_v17 }
 0x6aa   : > { %5248 = vst.msk [vmem:[#allocation4] sm:$0x1] %vm5247_vm12, %v5245_v25 }
 0x6ab PF: > { %p7772_p6 = scmp.eq.s32.totalorder %s7917_s25, 2  ;;  %s7870_s23 = smov [#allocation4]  }
 0x6ac   : > { %s5255_s26 = sshll.u32 %s7870_s23, 4  ;;  %s5257_s28 = sshll.u32 %s9924_s7, 4  ;;  %s5256_s26 = int_to_ptr.vmem [resolvable:$true] %s5255_s26  ;;  %s5258_s28 = int_to_ptr.hbm [resolvable:$true] %s5257_s28 }
 0x6ad   : > { %7769 = dma.vmem_to_hbm [thread:$0]  (%p7772_p6), %s5256_s26, 16, %s5258_s28, [#allocation5]  }
 0x6ae   : > { %7847 = dma.done.wait (%p7772_p6), [#allocation5], 16  }
 0x6af   : > { %7849 = vsyncadd (%p7772_p6), [#allocation5], 4294967280 }
 0x6b0 PF: > { %s18_s24 = sadd.s32 1, %s7852_s24  }
 0x6b1   : > { %p15_p7 = scmp.ge.s32.totalorder %s18_s24, 5  }
 0x6b3   :  { %17 = sbr.rel (!%p15_p7) target bundleno = 1 (0x1), region = 129 }
 0x6b8   :  { %5271 = vsyncpa [#allocation5], 1 }
 0x6b9   :  { %5273 = vsyncpa [#allocation5 + $0x1], 1 }

</bundles_post_ra>
